<compile_context>
chip_gen: v5e
topology: v5e:2x2
jax: 0.10.0
libtpu: 0.0.40
codegen_flags: <defaults>
</compile_context>

<pallas_src>
import functools
import math

import jax
import jax.numpy as jnp
from jax.experimental import pallas as pl
from jax.experimental.pallas import tpu as pltpu


def _round_up(v, m):
    return ((v + m - 1) // m) * m


def _double_conv_kernel(x_ref, w1_ref, s1_ref, b1_ref, w2_ref, s2_ref, b2_ref,
                        o_ref, hbuf_ref, acc1_ref, acc2_ref, *, img_h, img_w):
    # x_ref  : (TH+4, Wx, Ck)    bf16 row tile of the zero-padded NHWC input (2-row/2-col halo)
    # w1_ref : (3, 3*Ck, Cm)     bf16 conv1 weights, horizontal taps folded into K
    # s1/b1  : (1, Cm)           f32 folded conv-bias + BN1 scale / bias
    # w2_ref : (3, 3*Cm, Co)     bf16 conv2 weights, horizontal taps folded into K
    # s2/b2  : (1, Co)           f32 folded conv-bias + BN2 scale / bias
    # o_ref  : (Co, TH*Wo)       output tile, channel-major (NCHW) and lane-dense
    # hbuf   : (TH+2, Wh, Cm)    bf16 scratch: conv1 activation incl. conv2 halo + zero ring
    # acc1   : ((TH+2)*Wh, Cm)   f32 scratch accumulator for conv1
    # acc2   : (TH*Wo, Co)       f32 scratch accumulator for conv2
    t = pl.program_id(1)
    th2, wh, cm = hbuf_ref.shape
    th = th2 - 2
    co, thwo = o_ref.shape
    wo = thwo // th
    k1 = w1_ref.shape[1]
    k2 = w2_ref.shape[1]

    # ---- conv1: K = 3*Ck (dw taps folded into the contraction) -------------
    # Column-shifted copies built once; row-tap (dh) slicing below is a free
    # major-axis slice.
    xcat = jnp.concatenate([x_ref[:, dw:dw + wh, :] for dw in range(3)], axis=-1)
    for dh in range(3):
        xs = xcat[dh:dh + th2].reshape(th2 * wh, k1)
        p = jnp.dot(xs, w1_ref[dh], preferred_element_type=jnp.float32)
        if dh == 0:
            acc1_ref[...] = p
        else:
            acc1_ref[...] += p

    # Folded BN1 + ReLU in f32, then zero the conv2 padding ring (rows/cols that
    # fall outside the image) with an in-kernel iota mask — no HBM mask input.
    h = jnp.maximum(acc1_ref[...] * s1_ref[...] + b1_ref[...], 0.0)
    h = h.reshape(th2, wh, cm)
    row = jax.lax.broadcasted_iota(jnp.int32, (th2, wh, 1), 0) + (t * th - 1)
    col = jax.lax.broadcasted_iota(jnp.int32, (th2, wh, 1), 1)
    valid = (row >= 0) & (row < img_h) & (col >= 1) & (col <= img_w)
    hbuf_ref[...] = jnp.where(valid, h, 0.0).astype(hbuf_ref.dtype)

    # ---- conv2: K = 3*Cm on the bf16 intermediate ---------------------------
    hcat = jnp.concatenate([hbuf_ref[:, dw:dw + wo, :] for dw in range(3)], axis=-1)
    for dh in range(3):
        hs = hcat[dh:dh + th].reshape(th * wo, k2)
        p = jnp.dot(hs, w2_ref[dh], preferred_element_type=jnp.float32)
        if dh == 0:
            acc2_ref[...] = p
        else:
            acc2_ref[...] += p

    y = jnp.maximum(acc2_ref[...] * s2_ref[...] + b2_ref[...], 0.0)   # (TH*Wo, Co) f32
    # Channel-major store: last dim TH*Wo is a multiple of 128 -> unmasked vst,
    # and the wrapper's NCHW view is a free reshape (no output transpose pass).
    o_ref[...] = y.T.astype(o_ref.dtype)


@functools.partial(jax.jit, static_argnames=("eps", "row_tile"))
def inconv_forward(x, w1, b1, g1, be1, m1, v1, w2, b2, g2, be2, m2, v2,
                   *, eps=1e-5, row_tile=8):
    """inconv / double_conv forward.

    x: (N, C_in, H, W)
    w1: (C_mid, C_in, 3, 3), b1: (C_mid,)   + BN1 params (g1, be1, m1, v1)
    w2: (C_out, C_mid, 3, 3), b2: (C_out,)  + BN2 params (g2, be2, m2, v2)
    returns (N, C_out, H, W)
    """
    N, Ci, H, W = x.shape
    Cm = w1.shape[0]
    Co = w2.shape[0]

    Ck = _round_up(Ci, 8)          # conv1 input channels (zero padded)
    Wo = _round_up(W, 8)           # output columns computed per row
    Wh = Wo + 8                    # stored conv1-frame width (covers the W+2 ring, mult of 8)
    Wx = Wh + 2                    # input tile width (image cols [-2, Wh-2))

    # Row tile: pick TH so TH*Wo is a multiple of 128 (lane-dense output stores).
    unit = 128 // math.gcd(Wo, 128)
    TH = max(unit, (row_tile // unit) * unit)
    Hp = _round_up(H, TH)
    nT = Hp // TH

    # ---- input prep: NHWC, halo padding, overlapping row tiles (bf16) -------
    xh = jnp.transpose(x, (0, 2, 3, 1)).astype(jnp.bfloat16)
    xp = jnp.pad(xh, ((0, 0), (2, Hp - H + 2), (2, Wx - 2 - W), (0, Ck - Ci)))
    row_idx = jnp.arange(nT)[:, None] * TH + jnp.arange(TH + 4)[None, :]
    x_tiles = xp[:, row_idx]                        # (N, nT, TH+4, Wx, Ck)

    # ---- weights: per-row-tap matrices, horizontal taps folded into K -------
    w1c = jnp.transpose(w1, (2, 3, 1, 0))           # (3, 3, Ci, Cm)
    w1c = jnp.pad(w1c, ((0, 0), (0, 0), (0, Ck - Ci), (0, 0)))
    w1c = w1c.reshape(3, 3 * Ck, Cm).astype(jnp.bfloat16)
    w2c = jnp.transpose(w2, (2, 3, 1, 0)).reshape(3, 3 * Cm, Co).astype(jnp.bfloat16)

    # ---- fold conv bias + inference BatchNorm into per-channel scale/bias ---
    s1 = (g1 / jnp.sqrt(v1 + eps)).astype(jnp.float32)
    t1 = (be1 + s1 * (b1 - m1)).astype(jnp.float32)
    s2 = (g2 / jnp.sqrt(v2 + eps)).astype(jnp.float32)
    t2 = (be2 + s2 * (b2 - m2)).astype(jnp.float32)

    kernel = functools.partial(_double_conv_kernel, img_h=H, img_w=W)

    # Rough per-step VMEM estimate (lane-padded), with headroom, clamped safely.
    lane = lambda c: _round_up(c, 128)
    est = (2 * (TH + 4) * Wx * lane(Ck) * 2                        # x block (dbl-buffered)
           + 2 * Co * _round_up(TH * Wo, 128) * x.dtype.itemsize   # out block
           + (TH + 2) * Wh * lane(Cm) * (2 + 4)                    # hbuf + acc1
           + TH * Wo * lane(Co) * 4                                # acc2
           + (TH + 4) * Wh * lane(3 * Ck) * 2                      # xcat temp
           + (TH + 2) * Wo * lane(3 * Cm) * 2                      # hcat temp
           + 4 * (3 * Ck * lane(Cm) + 3 * Cm * lane(Co)) * 2)      # weights
    vmem_limit = int(min(64 * 1024 * 1024, max(16 * 1024 * 1024, 2 * est)))

    out = pl.pallas_call(
        kernel,
        out_shape=jax.ShapeDtypeStruct((N, Co, Hp * Wo), x.dtype),
        grid_spec=pltpu.PrefetchScalarGridSpec(
            num_scalar_prefetch=0,
            grid=(N, nT),
            in_specs=[
                pl.BlockSpec((None, None, TH + 4, Wx, Ck),
                             lambda n, t: (n, t, 0, 0, 0)),
                pl.BlockSpec((3, 3 * Ck, Cm), lambda n, t: (0, 0, 0)),
                pl.BlockSpec((1, Cm), lambda n, t: (0, 0)),
                pl.BlockSpec((1, Cm), lambda n, t: (0, 0)),
                pl.BlockSpec((3, 3 * Cm, Co), lambda n, t: (0, 0, 0)),
                pl.BlockSpec((1, Co), lambda n, t: (0, 0)),
                pl.BlockSpec((1, Co), lambda n, t: (0, 0)),
            ],
            out_specs=pl.BlockSpec((None, Co, TH * Wo), lambda n, t: (n, 0, t)),
            scratch_shapes=[
                pltpu.VMEM((TH + 2, Wh, Cm), jnp.bfloat16),
                pltpu.VMEM(((TH + 2) * Wh, Cm), jnp.float32),
                pltpu.VMEM((TH * Wo, Co), jnp.float32),
            ],
        ),
        compiler_params=pltpu.CompilerParams(
            dimension_semantics=("parallel", "parallel"),
            vmem_limit_bytes=vmem_limit,
        ),
    )(x_tiles, w1c,
      s1.reshape(1, Cm), t1.reshape(1, Cm),
      w2c,
      s2.reshape(1, Co), t2.reshape(1, Co))

    out = out.reshape(N, Co, Hp, Wo)          # free: output is already channel-major (NCHW)
    if Hp != H or Wo != W:
        out = out[:, :, :H, :W]
    return out


def _reference(x, w1, b1, g1, be1, m1, v1, w2, b2, g2, be2, m2, v2, eps=1e-5):
    """Plain-JAX reference: Conv3x3 -> BN(eval) -> ReLU, twice (NCHW)."""
    def block(z, w, b, g, be, m, v):
        z = jax.lax.conv_general_dilated(
            z, w, window_strides=(1, 1), padding=((1, 1), (1, 1)),
            dimension_numbers=("NCHW", "OIHW", "NCHW"))
        z = z + b.reshape(1, -1, 1, 1)
        z = (z - m.reshape(1, -1, 1, 1)) / jnp.sqrt(v.reshape(1, -1, 1, 1) + eps)
        z = z * g.reshape(1, -1, 1, 1) + be.reshape(1, -1, 1, 1)
        return jnp.maximum(z, 0.0)
    return block(block(x, w1, b1, g1, be1, m1, v1), w2, b2, g2, be2, m2, v2)


if __name__ == "__main__":
    key = jax.random.PRNGKey(0)
    ks = jax.random.split(key, 8)

    # inconv(in_ch=4, out_ch=8) on a small input (2 row tiles of 8 rows each).
    N, C_in, C_out, H, W = 2, 4, 8, 16, 16

    x = jax.random.normal(ks[0], (N, C_in, H, W), dtype=jnp.float32)

    # Conv params: xavier-normal weights, zero bias (matches double_conv.init_weights).
    std1 = (2.0 / (C_in * 9 + C_out * 9)) ** 0.5
    std2 = (2.0 / (C_out * 9 + C_out * 9)) ** 0.5
    w1 = std1 * jax.random.normal(ks[1], (C_out, C_in, 3, 3), dtype=jnp.float32)
    b1 = jnp.zeros((C_out,), dtype=jnp.float32)
    w2 = std2 * jax.random.normal(ks[2], (C_out, C_out, 3, 3), dtype=jnp.float32)
    b2 = jnp.zeros((C_out,), dtype=jnp.float32)

    # BatchNorm (inference) parameters; BN1 exercised with non-trivial stats.
    g1 = jax.random.uniform(ks[3], (C_out,), minval=0.5, maxval=1.5)
    be1 = 0.1 * jax.random.normal(ks[4], (C_out,))
    m1 = 0.1 * jax.random.normal(ks[5], (C_out,))
    v1 = jax.random.uniform(ks[6], (C_out,), minval=0.5, maxval=1.5)
    g2 = jnp.ones((C_out,), dtype=jnp.float32)
    be2 = jnp.zeros((C_out,), dtype=jnp.float32)
    m2 = jnp.zeros((C_out,), dtype=jnp.float32)
    v2 = jnp.ones((C_out,), dtype=jnp.float32)

    out = inconv_forward(x, w1, b1, g1, be1, m1, v1, w2, b2, g2, be2, m2, v2)
    out = jax.block_until_ready(out)

    ref = _reference(x, w1, b1, g1, be1, m1, v1, w2, b2, g2, be2, m2, v2)
    assert out.shape == (N, C_out, H, W)
    # bf16 matmul operands (f32 accumulation) -> loosened tolerance vs f32 reference.
    max_err = float(jnp.max(jnp.abs(out - ref)))
    assert jnp.allclose(out, ref, atol=1e-1, rtol=1e-1), max_err

    print("KERNEL_OK")
</pallas_src>

<mosaic_0001>
module attributes {stable_mosaic.version = 11 : i64} {
  func.func @_double_conv_kernel(%arg0: i32, %arg1: i32, %arg2: memref<1x1x12x26x8xbf16, #tpu.memory_space<vmem>>, %arg3: memref<3x24x8xbf16, #tpu.memory_space<vmem>>, %arg4: memref<1x8xf32, #tpu.memory_space<vmem>>, %arg5: memref<1x8xf32, #tpu.memory_space<vmem>>, %arg6: memref<3x24x8xbf16, #tpu.memory_space<vmem>>, %arg7: memref<1x8xf32, #tpu.memory_space<vmem>>, %arg8: memref<1x8xf32, #tpu.memory_space<vmem>>, %arg9: memref<1x8x128xf32, #tpu.memory_space<vmem>>, %arg10: memref<10x24x8xbf16, #tpu.memory_space<vmem>>, %arg11: memref<240x8xf32, #tpu.memory_space<vmem>>, %arg12: memref<128x8xf32, #tpu.memory_space<vmem>>) attributes {dimension_semantics = [#tpu.dimension_semantics<parallel>, #tpu.dimension_semantics<parallel>], iteration_bounds = array<i64: 2, 2>, scalar_prefetch = 0 : i64, scratch_operands = 3 : i64, tpu.core_type = #tpu.core_type<tc>, window_params = [{transform_indices = @transform_0, window_bounds = array<i64: 1, 1, 12, 26, 8>}, {pipeline_mode = #tpu.pipeline_mode<synchronous>, transform_indices = @transform_1, window_bounds = array<i64: 3, 24, 8>}, {pipeline_mode = #tpu.pipeline_mode<synchronous>, transform_indices = @transform_2, window_bounds = array<i64: 1, 8>}, {pipeline_mode = #tpu.pipeline_mode<synchronous>, transform_indices = @transform_3, window_bounds = array<i64: 1, 8>}, {pipeline_mode = #tpu.pipeline_mode<synchronous>, transform_indices = @transform_4, window_bounds = array<i64: 3, 24, 8>}, {pipeline_mode = #tpu.pipeline_mode<synchronous>, transform_indices = @transform_5, window_bounds = array<i64: 1, 8>}, {pipeline_mode = #tpu.pipeline_mode<synchronous>, transform_indices = @transform_6, window_bounds = array<i64: 1, 8>}, {transform_indices = @transform_7, window_bounds = array<i64: 1, 8, 128>}]} {
    %c0 = arith.constant 0 : index
    %c0_0 = arith.constant 0 : index
    %c0_1 = arith.constant 0 : index
    %c0_2 = arith.constant 0 : index
    %c0_3 = arith.constant 0 : index
    %0 = vector.load %arg2[%c0, %c0_0, %c0_1, %c0_2, %c0_3] : memref<1x1x12x26x8xbf16, #tpu.memory_space<vmem>>, vector<1x1x12x24x8xbf16>
    %1 = vector.shape_cast %0 : vector<1x1x12x24x8xbf16> to vector<12x24x8xbf16>
    %c0_4 = arith.constant 0 : index
    %c0_5 = arith.constant 0 : index
    %c0_6 = arith.constant 0 : index
    %c1 = arith.constant 1 : index
    %c0_7 = arith.constant 0 : index
    %2 = vector.load %arg2[%c0_4, %c0_5, %c0_6, %c1, %c0_7] : memref<1x1x12x26x8xbf16, #tpu.memory_space<vmem>>, vector<1x1x12x24x8xbf16>
    %3 = vector.shape_cast %2 : vector<1x1x12x24x8xbf16> to vector<12x24x8xbf16>
    %c0_8 = arith.constant 0 : index
    %c0_9 = arith.constant 0 : index
    %c0_10 = arith.constant 0 : index
    %c2 = arith.constant 2 : index
    %c0_11 = arith.constant 0 : index
    %4 = vector.load %arg2[%c0_8, %c0_9, %c0_10, %c2, %c0_11] : memref<1x1x12x26x8xbf16, #tpu.memory_space<vmem>>, vector<1x1x12x24x8xbf16>
    %5 = vector.shape_cast %4 : vector<1x1x12x24x8xbf16> to vector<12x24x8xbf16>
    %6 = tpu.concatenate %1, %3, %5 in 2 : vector<12x24x8xbf16>, vector<12x24x8xbf16>, vector<12x24x8xbf16> -> vector<12x24x24xbf16>
    %7 = vector.extract_strided_slice %6 {offsets = [0, 0, 0], sizes = [10, 24, 24], strides = [1, 1, 1]} : vector<12x24x24xbf16> to vector<10x24x24xbf16>
    %8 = vector.shape_cast %7 : vector<10x24x24xbf16> to vector<240x24xbf16>
    %c0_12 = arith.constant 0 : index
    %c0_13 = arith.constant 0 : index
    %c0_14 = arith.constant 0 : index
    %9 = vector.load %arg3[%c0_12, %c0_13, %c0_14] : memref<3x24x8xbf16, #tpu.memory_space<vmem>>, vector<1x24x8xbf16>
    %10 = vector.shape_cast %9 : vector<1x24x8xbf16> to vector<24x8xbf16>
    %cst = arith.constant dense<0.000000e+00> : vector<240x8xf32>
    %11 = tpu.matmul %8, %10, %cst {dimension_numbers = #tpu.dot_dimension_numbers<[1], [0], [0], [1], [0, 0, 1, 1], [], []>} : vector<240x24xbf16>, vector<24x8xbf16>, vector<240x8xf32> -> vector<240x8xf32>
    %c0_15 = arith.constant 0 : index
    %c0_16 = arith.constant 0 : index
    %12 = vector.load %arg11[%c0_15, %c0_16] : memref<240x8xf32, #tpu.memory_space<vmem>>, vector<240x8xf32>
    tpu.vector_store %arg11[%c0_15, %c0_16], %11 {strides = array<i32>} : memref<240x8xf32, #tpu.memory_space<vmem>>, vector<240x8xf32>,
    %13 = vector.extract_strided_slice %6 {offsets = [1, 0, 0], sizes = [10, 24, 24], strides = [1, 1, 1]} : vector<12x24x24xbf16> to vector<10x24x24xbf16>
    %14 = vector.shape_cast %13 : vector<10x24x24xbf16> to vector<240x24xbf16>
    %c1_17 = arith.constant 1 : index
    %c0_18 = arith.constant 0 : index
    %c0_19 = arith.constant 0 : index
    %15 = vector.load %arg3[%c1_17, %c0_18, %c0_19] : memref<3x24x8xbf16, #tpu.memory_space<vmem>>, vector<1x24x8xbf16>
    %16 = vector.shape_cast %15 : vector<1x24x8xbf16> to vector<24x8xbf16>
    %cst_20 = arith.constant dense<0.000000e+00> : vector<240x8xf32>
    %17 = tpu.matmul %14, %16, %cst_20 {dimension_numbers = #tpu.dot_dimension_numbers<[1], [0], [0], [1], [0, 0, 1, 1], [], []>} : vector<240x24xbf16>, vector<24x8xbf16>, vector<240x8xf32> -> vector<240x8xf32>
    %c0_21 = arith.constant 0 : index
    %c0_22 = arith.constant 0 : index
    %18 = vector.load %arg11[%c0_21, %c0_22] : memref<240x8xf32, #tpu.memory_space<vmem>>, vector<240x8xf32>
    %19 = arith.addf %18, %17 : vector<240x8xf32>
    %c0_23 = arith.constant 0 : index
    %c0_24 = arith.constant 0 : index
    %20 = vector.load %arg11[%c0_23, %c0_24] : memref<240x8xf32, #tpu.memory_space<vmem>>, vector<240x8xf32>
    tpu.vector_store %arg11[%c0_23, %c0_24], %19 {strides = array<i32>} : memref<240x8xf32, #tpu.memory_space<vmem>>, vector<240x8xf32>,
    %21 = vector.extract_strided_slice %6 {offsets = [2, 0, 0], sizes = [10, 24, 24], strides = [1, 1, 1]} : vector<12x24x24xbf16> to vector<10x24x24xbf16>
    %22 = vector.shape_cast %21 : vector<10x24x24xbf16> to vector<240x24xbf16>
    %c2_25 = arith.constant 2 : index
    %c0_26 = arith.constant 0 : index
    %c0_27 = arith.constant 0 : index
    %23 = vector.load %arg3[%c2_25, %c0_26, %c0_27] : memref<3x24x8xbf16, #tpu.memory_space<vmem>>, vector<1x24x8xbf16>
    %24 = vector.shape_cast %23 : vector<1x24x8xbf16> to vector<24x8xbf16>
    %cst_28 = arith.constant dense<0.000000e+00> : vector<240x8xf32>
    %25 = tpu.matmul %22, %24, %cst_28 {dimension_numbers = #tpu.dot_dimension_numbers<[1], [0], [0], [1], [0, 0, 1, 1], [], []>} : vector<240x24xbf16>, vector<24x8xbf16>, vector<240x8xf32> -> vector<240x8xf32>
    %c0_29 = arith.constant 0 : index
    %c0_30 = arith.constant 0 : index
    %26 = vector.load %arg11[%c0_29, %c0_30] : memref<240x8xf32, #tpu.memory_space<vmem>>, vector<240x8xf32>
    %27 = arith.addf %26, %25 : vector<240x8xf32>
    %c0_31 = arith.constant 0 : index
    %c0_32 = arith.constant 0 : index
    %28 = vector.load %arg11[%c0_31, %c0_32] : memref<240x8xf32, #tpu.memory_space<vmem>>, vector<240x8xf32>
    tpu.vector_store %arg11[%c0_31, %c0_32], %27 {strides = array<i32>} : memref<240x8xf32, #tpu.memory_space<vmem>>, vector<240x8xf32>,
    %c0_33 = arith.constant 0 : index
    %c0_34 = arith.constant 0 : index
    %29 = vector.load %arg11[%c0_33, %c0_34] : memref<240x8xf32, #tpu.memory_space<vmem>>, vector<240x8xf32>
    %c0_35 = arith.constant 0 : index
    %c0_36 = arith.constant 0 : index
    %30 = vector.load %arg4[%c0_35, %c0_36] : memref<1x8xf32, #tpu.memory_space<vmem>>, vector<1x8xf32>
    %31 = vector.broadcast %30 : vector<1x8xf32> to vector<240x8xf32>
    %32 = arith.mulf %29, %31 : vector<240x8xf32>
    %c0_37 = arith.constant 0 : index
    %c0_38 = arith.constant 0 : index
    %33 = vector.load %arg5[%c0_37, %c0_38] : memref<1x8xf32, #tpu.memory_space<vmem>>, vector<1x8xf32>
    %34 = vector.broadcast %33 : vector<1x8xf32> to vector<240x8xf32>
    %35 = arith.addf %32, %34 : vector<240x8xf32>
    %cst_39 = arith.constant 0.000000e+00 : f32
    %36 = vector.broadcast %cst_39 : f32 to vector<240x8xf32>
    %37 = arith.maximumf %35, %36 : vector<240x8xf32>
    %38 = vector.shape_cast %37 : vector<240x8xf32> to vector<10x24x8xf32>
    %39 = tpu.iota {dimensions = array<i32: 0>} : vector<10x24x1xi32>
    %c8_i32 = arith.constant 8 : i32
    %40 = arith.muli %arg1, %c8_i32 : i32
    %c1_i32 = arith.constant 1 : i32
    %41 = arith.subi %40, %c1_i32 : i32
    %42 = vector.broadcast %41 : i32 to vector<10x24x1xi32>
    %43 = arith.addi %39, %42 : vector<10x24x1xi32>
    %44 = tpu.iota {dimensions = array<i32: 1>} : vector<10x24x1xi32>
    %c0_i32 = arith.constant 0 : i32
    %45 = vector.broadcast %c0_i32 : i32 to vector<10x24x1xi32>
    %46 = arith.cmpi sge, %43, %45 : vector<10x24x1xi32>
    %c16_i32 = arith.constant 16 : i32
    %47 = vector.broadcast %c16_i32 : i32 to vector<10x24x1xi32>
    %48 = arith.cmpi slt, %43, %47 : vector<10x24x1xi32>
    %49 = arith.andi %46, %48 : vector<10x24x1xi1>
    %c1_i32_40 = arith.constant 1 : i32
    %50 = vector.broadcast %c1_i32_40 : i32 to vector<10x24x1xi32>
    %51 = arith.cmpi sge, %44, %50 : vector<10x24x1xi32>
    %52 = arith.andi %49, %51 : vector<10x24x1xi1>
    %c16_i32_41 = arith.constant 16 : i32
    %53 = vector.broadcast %c16_i32_41 : i32 to vector<10x24x1xi32>
    %54 = arith.cmpi sle, %44, %53 : vector<10x24x1xi32>
    %55 = arith.andi %52, %54 : vector<10x24x1xi1>
    %cst_42 = arith.constant 0.000000e+00 : f32
    %56 = vector.shape_cast %55 : vector<10x24x1xi1> to vector<10x24x1xi1>
    %57 = vector.broadcast %56 : vector<10x24x1xi1> to vector<10x24x8xi1>
    %58 = vector.broadcast %cst_42 : f32 to vector<10x24x8xf32>
    %59 = arith.select %57, %38, %58 : vector<10x24x8xi1>, vector<10x24x8xf32>
    %60 = arith.truncf %59 : vector<10x24x8xf32> to vector<10x24x8xbf16>
    %c0_43 = arith.constant 0 : index
    %c0_44 = arith.constant 0 : index
    %c0_45 = arith.constant 0 : index
    %61 = vector.load %arg10[%c0_43, %c0_44, %c0_45] : memref<10x24x8xbf16, #tpu.memory_space<vmem>>, vector<10x24x8xbf16>
    tpu.vector_store %arg10[%c0_43, %c0_44, %c0_45], %60 {strides = array<i32>} : memref<10x24x8xbf16, #tpu.memory_space<vmem>>, vector<10x24x8xbf16>,
    %c0_46 = arith.constant 0 : index
    %c0_47 = arith.constant 0 : index
    %c0_48 = arith.constant 0 : index
    %62 = vector.load %arg10[%c0_46, %c0_47, %c0_48] : memref<10x24x8xbf16, #tpu.memory_space<vmem>>, vector<10x16x8xbf16>
    %c0_49 = arith.constant 0 : index
    %c1_50 = arith.constant 1 : index
    %c0_51 = arith.constant 0 : index
    %63 = vector.load %arg10[%c0_49, %c1_50, %c0_51] : memref<10x24x8xbf16, #tpu.memory_space<vmem>>, vector<10x16x8xbf16>
    %c0_52 = arith.constant 0 : index
    %c2_53 = arith.constant 2 : index
    %c0_54 = arith.constant 0 : index
    %64 = vector.load %arg10[%c0_52, %c2_53, %c0_54] : memref<10x24x8xbf16, #tpu.memory_space<vmem>>, vector<10x16x8xbf16>
    %65 = tpu.concatenate %62, %63, %64 in 2 : vector<10x16x8xbf16>, vector<10x16x8xbf16>, vector<10x16x8xbf16> -> vector<10x16x24xbf16>
    %66 = vector.extract_strided_slice %65 {offsets = [0, 0, 0], sizes = [8, 16, 24], strides = [1, 1, 1]} : vector<10x16x24xbf16> to vector<8x16x24xbf16>
    %67 = vector.shape_cast %66 : vector<8x16x24xbf16> to vector<128x24xbf16>
    %c0_55 = arith.constant 0 : index
    %c0_56 = arith.constant 0 : index
    %c0_57 = arith.constant 0 : index
    %68 = vector.load %arg6[%c0_55, %c0_56, %c0_57] : memref<3x24x8xbf16, #tpu.memory_space<vmem>>, vector<1x24x8xbf16>
    %69 = vector.shape_cast %68 : vector<1x24x8xbf16> to vector<24x8xbf16>
    %cst_58 = arith.constant dense<0.000000e+00> : vector<128x8xf32>
    %70 = tpu.matmul %67, %69, %cst_58 {dimension_numbers = #tpu.dot_dimension_numbers<[1], [0], [0], [1], [0, 0, 1, 1], [], []>} : vector<128x24xbf16>, vector<24x8xbf16>, vector<128x8xf32> -> vector<128x8xf32>
    %c0_59 = arith.constant 0 : index
    %c0_60 = arith.constant 0 : index
    %71 = vector.load %arg12[%c0_59, %c0_60] : memref<128x8xf32, #tpu.memory_space<vmem>>, vector<128x8xf32>
    tpu.vector_store %arg12[%c0_59, %c0_60], %70 {strides = array<i32>} : memref<128x8xf32, #tpu.memory_space<vmem>>, vector<128x8xf32>,
    %72 = vector.extract_strided_slice %65 {offsets = [1, 0, 0], sizes = [8, 16, 24], strides = [1, 1, 1]} : vector<10x16x24xbf16> to vector<8x16x24xbf16>
    %73 = vector.shape_cast %72 : vector<8x16x24xbf16> to vector<128x24xbf16>
    %c1_61 = arith.constant 1 : index
    %c0_62 = arith.constant 0 : index
    %c0_63 = arith.constant 0 : index
    %74 = vector.load %arg6[%c1_61, %c0_62, %c0_63] : memref<3x24x8xbf16, #tpu.memory_space<vmem>>, vector<1x24x8xbf16>
    %75 = vector.shape_cast %74 : vector<1x24x8xbf16> to vector<24x8xbf16>
    %cst_64 = arith.constant dense<0.000000e+00> : vector<128x8xf32>
    %76 = tpu.matmul %73, %75, %cst_64 {dimension_numbers = #tpu.dot_dimension_numbers<[1], [0], [0], [1], [0, 0, 1, 1], [], []>} : vector<128x24xbf16>, vector<24x8xbf16>, vector<128x8xf32> -> vector<128x8xf32>
    %c0_65 = arith.constant 0 : index
    %c0_66 = arith.constant 0 : index
    %77 = vector.load %arg12[%c0_65, %c0_66] : memref<128x8xf32, #tpu.memory_space<vmem>>, vector<128x8xf32>
    %78 = arith.addf %77, %76 : vector<128x8xf32>
    %c0_67 = arith.constant 0 : index
    %c0_68 = arith.constant 0 : index
    %79 = vector.load %arg12[%c0_67, %c0_68] : memref<128x8xf32, #tpu.memory_space<vmem>>, vector<128x8xf32>
    tpu.vector_store %arg12[%c0_67, %c0_68], %78 {strides = array<i32>} : memref<128x8xf32, #tpu.memory_space<vmem>>, vector<128x8xf32>,
    %80 = vector.extract_strided_slice %65 {offsets = [2, 0, 0], sizes = [8, 16, 24], strides = [1, 1, 1]} : vector<10x16x24xbf16> to vector<8x16x24xbf16>
    %81 = vector.shape_cast %80 : vector<8x16x24xbf16> to vector<128x24xbf16>
    %c2_69 = arith.constant 2 : index
    %c0_70 = arith.constant 0 : index
    %c0_71 = arith.constant 0 : index
    %82 = vector.load %arg6[%c2_69, %c0_70, %c0_71] : memref<3x24x8xbf16, #tpu.memory_space<vmem>>, vector<1x24x8xbf16>
    %83 = vector.shape_cast %82 : vector<1x24x8xbf16> to vector<24x8xbf16>
    %cst_72 = arith.constant dense<0.000000e+00> : vector<128x8xf32>
    %84 = tpu.matmul %81, %83, %cst_72 {dimension_numbers = #tpu.dot_dimension_numbers<[1], [0], [0], [1], [0, 0, 1, 1], [], []>} : vector<128x24xbf16>, vector<24x8xbf16>, vector<128x8xf32> -> vector<128x8xf32>
    %c0_73 = arith.constant 0 : index
    %c0_74 = arith.constant 0 : index
    %85 = vector.load %arg12[%c0_73, %c0_74] : memref<128x8xf32, #tpu.memory_space<vmem>>, vector<128x8xf32>
    %86 = arith.addf %85, %84 : vector<128x8xf32>
    %c0_75 = arith.constant 0 : index
    %c0_76 = arith.constant 0 : index
    %87 = vector.load %arg12[%c0_75, %c0_76] : memref<128x8xf32, #tpu.memory_space<vmem>>, vector<128x8xf32>
    tpu.vector_store %arg12[%c0_75, %c0_76], %86 {strides = array<i32>} : memref<128x8xf32, #tpu.memory_space<vmem>>, vector<128x8xf32>,
    %c0_77 = arith.constant 0 : index
    %c0_78 = arith.constant 0 : index
    %88 = vector.load %arg12[%c0_77, %c0_78] : memref<128x8xf32, #tpu.memory_space<vmem>>, vector<128x8xf32>
    %c0_79 = arith.constant 0 : index
    %c0_80 = arith.constant 0 : index
    %89 = vector.load %arg7[%c0_79, %c0_80] : memref<1x8xf32, #tpu.memory_space<vmem>>, vector<1x8xf32>
    %90 = vector.broadcast %89 : vector<1x8xf32> to vector<128x8xf32>
    %91 = arith.mulf %88, %90 : vector<128x8xf32>
    %c0_81 = arith.constant 0 : index
    %c0_82 = arith.constant 0 : index
    %92 = vector.load %arg8[%c0_81, %c0_82] : memref<1x8xf32, #tpu.memory_space<vmem>>, vector<1x8xf32>
    %93 = vector.broadcast %92 : vector<1x8xf32> to vector<128x8xf32>
    %94 = arith.addf %91, %93 : vector<128x8xf32>
    %cst_83 = arith.constant 0.000000e+00 : f32
    %95 = vector.broadcast %cst_83 : f32 to vector<128x8xf32>
    %96 = arith.maximumf %94, %95 : vector<128x8xf32>
    %97 = tpu.transpose %96, [1, 0] : vector<128x8xf32> -> vector<8x128xf32>
    %c0_84 = arith.constant 0 : index
    %c0_85 = arith.constant 0 : index
    %c0_86 = arith.constant 0 : index
    %98 = vector.load %arg9[%c0_84, %c0_85, %c0_86] : memref<1x8x128xf32, #tpu.memory_space<vmem>>, vector<1x8x128xf32>
    %99 = vector.shape_cast %98 : vector<1x8x128xf32> to vector<8x128xf32>
    %100 = vector.shape_cast %97 : vector<8x128xf32> to vector<1x8x128xf32>
    tpu.vector_store %arg9[%c0_84, %c0_85, %c0_86], %100 {strides = array<i32>} : memref<1x8x128xf32, #tpu.memory_space<vmem>>, vector<1x8x128xf32>,
    return
  }
  func.func @transform_0(%arg0: i32, %arg1: i32) -> (i32, i32, i32, i32, i32) {
    %c0_i32 = arith.constant 0 : i32
    %c0_i32_0 = arith.constant 0 : i32
    %c0_i32_1 = arith.constant 0 : i32
    %c0_i32_2 = arith.constant 0 : i32
    return %arg0, %arg1, %c0_i32, %c0_i32_0, %c0_i32_1 : i32, i32, i32, i32, i32
  }
  func.func @transform_1(%arg0: i32, %arg1: i32) -> (i32, i32, i32) {
    %c0_i32 = arith.constant 0 : i32
    %c0_i32_0 = arith.constant 0 : i32
    %c0_i32_1 = arith.constant 0 : i32
    %c0_i32_2 = arith.constant 0 : i32
    return %c0_i32, %c0_i32_0, %c0_i32_1 : i32, i32, i32
  }
  func.func @transform_2(%arg0: i32, %arg1: i32) -> (i32, i32) {
    %c0_i32 = arith.constant 0 : i32
    %c0_i32_0 = arith.constant 0 : i32
    %c0_i32_1 = arith.constant 0 : i32
    return %c0_i32, %c0_i32_0 : i32, i32
  }
  func.func @transform_3(%arg0: i32, %arg1: i32) -> (i32, i32) {
    %c0_i32 = arith.constant 0 : i32
    %c0_i32_0 = arith.constant 0 : i32
    %c0_i32_1 = arith.constant 0 : i32
    return %c0_i32, %c0_i32_0 : i32, i32
  }
  func.func @transform_4(%arg0: i32, %arg1: i32) -> (i32, i32, i32) {
    %c0_i32 = arith.constant 0 : i32
    %c0_i32_0 = arith.constant 0 : i32
    %c0_i32_1 = arith.constant 0 : i32
    %c0_i32_2 = arith.constant 0 : i32
    return %c0_i32, %c0_i32_0, %c0_i32_1 : i32, i32, i32
  }
  func.func @transform_5(%arg0: i32, %arg1: i32) -> (i32, i32) {
    %c0_i32 = arith.constant 0 : i32
    %c0_i32_0 = arith.constant 0 : i32
    %c0_i32_1 = arith.constant 0 : i32
    return %c0_i32, %c0_i32_0 : i32, i32
  }
  func.func @transform_6(%arg0: i32, %arg1: i32) -> (i32, i32) {
    %c0_i32 = arith.constant 0 : i32
    %c0_i32_0 = arith.constant 0 : i32
    %c0_i32_1 = arith.constant 0 : i32
    return %c0_i32, %c0_i32_0 : i32, i32
  }
  func.func @transform_7(%arg0: i32, %arg1: i32) -> (i32, i32, i32) {
    %c0_i32 = arith.constant 0 : i32
    %c0_i32_0 = arith.constant 0 : i32
    return %arg0, %c0_i32, %arg1 : i32, i32, i32
  }
}

</mosaic_0001>

<bundles_post_ra>
// kernel: inconv_forward.1
= control target key start
LH: loop header
LB: loop body
LE: loop exit
PB: predicated region body
PF: predicated region fallthrough
CT: control target
= control target key end

     0   :  { %s3369_s24 = smov 0   ;;  %s3371_s25 = smov 0   ;;  %s4574_s0 = inlined_call_operand.vmem [shape: bf16[2,2,12,26,8], index: 0, kind: input, shape index: {}]   ;;  %s4575_s1 = inlined_call_operand.vmem [shape: bf16[3,24,8], index: 1, kind: input, shape index: {}]   ;;  %s4576_s2 = inlined_call_operand.vmem [shape: f32[1,8], index: 2, kind: input, shape index: {}]   ;;  %s4577_s3 = inlined_call_operand.vmem [shape: f32[1,8], index: 3, kind: input, shape index: {}]   ;;  %s4578_s4 = inlined_call_operand.vmem [shape: bf16[3,24,8], index: 4, kind: input, shape index: {}]   ;;  %s4579_s5 = inlined_call_operand.vmem [shape: f32[1,8], index: 5, kind: input, shape index: {}]   ;;  %s4580_s6 = inlined_call_operand.vmem [shape: f32[1,8], index: 6, kind: input, shape index: {}]   ;;  %s4581_s7 = inlined_call_operand.vmem [shape: f32[2,8,256], index: 7, kind: output, shape index: {}]  }
   0x1   :  { %s3373_s26 = smov 0   ;;  %s3375_s27 = smov 0  }
   0x2   :  { %s3377_s28 = smov 0  }
   0x3 LB: > { %s26_s29 = sadd.s32 1, %s3317_s26  ;;  %s29_s30 = sadd.s32 1, %s3321_s27  ;;  %s3325_s28 = sphi %s3377_s28, %s17_s28   ;;  %s3321_s27 = sphi %s3375_s27, %s4607_s27   ;;  %s3317_s26 = sphi %s3373_s26, %s4606_s26   ;;  %s3313_s25 = sphi %s3371_s25, %s4605_s25   ;;  %s3309_s24 = sphi %s3369_s24, %s4604_s24  }
   0x4   : > { %p27_p0 = scmp.ge.s32.totalorder %s26_s29, 2  ;;  %p2964_p1 = scmp.ge.s32.totalorder %s3325_s28, 1 }
   0x5   : > { %p257_p2 = scmp.lt.s32.totalorder %s3325_s28, 5 }
   0x6   : > { %s4609_s29 = smov (%p27_p0, %s26_s29), 0  ;;  %s4611_s30 = smov (!%p27_p0, %s29_s30), %s3321_s27 }
   0x7   : > { %p258_p3 = pnand %p2964_p1, %p257_p2  ;;  %p31_p4 = scmp.ge.s32.totalorder %s4611_s30, 2 }
   0x8   : > { %p296_p5 = scmp.lt.s32.totalorder (!%p258_p3), %s3313_s25, 1  ;;  %p298_p6 = scmp.lt.s32.totalorder (!%p258_p3), %s3309_s24, 1 }
   0x9   : > { %s4613_s30 = smov (%p31_p4, %s4611_s30), 0  ;;  %261 = sbr.rel (%p258_p3) target bundleno = 1049 (0x419), region = 48 }
   0xa   : > { %s3327_s16 = smov (!%p258_p3), 16   ;;  %s3328_s17 = smov (!%p258_p3), 8  }
   0xb   : > { %s3031_s18 = sshll.u32 (!%p258_p3), %s3309_s24, 3 }
   0xc   : > { %s3032_s19 = sadd.s32 (!%p258_p3), 4294967295, %s3031_s18 }
   0xe   : > { %s4615_s25 = smov (!%p296_p5, %s3313_s25), 1  ;;  %vm771_vm0 = vcmask 1046528   ;;  %vm506_vm1 = vsmask.f32 7424  ;;  %vm1089_vm2 = vcmask 1043456   ;;  %vm856_vm3 = vcmask 64512  }
   0xf   : > { %s3405_s8 = scalar_select %p298_p6, %s3309_s24, 1  ;;  %vm917_vm4 = vcmask 130048   ;;  %vm1043_vm5 = vcmask 195584   ;;  %vm2029_vm11 = vcmask 60416  }
  0x10   : > { %s3222_s9 = smul.u32 96, %s4615_s25 }
  0x11   : > { %s3221_s10 = smul.u32 48, %s3405_s8 }
  0x13   : > { %s302_s11 = sadd.s32 %s3222_s9, %s3221_s10 }
  0x14   : > { %s2965_s12 = sshll.u32 %s302_s11, 2 }
  0x15   : > { %s3412_s15 = scalar_lea.vmem %s4574_s0, %s2965_s12  ;;  %s2966_s12 = sshll.u32 %s4615_s25, 1 }
  0x16   : > { %v334_v0 = vld [vmem:[%s3412_s15 + $0x68] sm:$0xf]  ;;  %v356_v1 = vld [vmem:[%s3412_s15 + $0x6c] sm:$0x1]  ;;  %v3183_v2 = vld [vmem:[%s3412_s15 + $0x70] sm:$0xf0]  ;;  %s310_s13 = sadd.s32 %s2966_s12, %s3405_s8 }
  0x17   : > { %v3417_v3 = vunpack.c.l.b16 %v334_v0  ;;  %v488_v4 = vunpack.c.l.b16 %v356_v1  ;;  %v337_v5 = vld [vmem:[%s3412_s15 + $0x78] sm:$0xf]  ;;  %v357_v6 = vld [vmem:[%s3412_s15 + $0x7c] sm:$0x1]  ;;  %v3184_v7 = vld [vmem:[%s3412_s15 + $0x70] sm:$0xe] }
  0x18   : > { %v3422_v8 = vunpack.c.l.b16 %v337_v5  ;;  %v489_v9 = vunpack.c.l.b16 %v357_v6  ;;  %v3185_v10 = vor.u32 %v3184_v7, %v3183_v2  ;;  %v3425_v11 = vld [vmem:[%s3412_s15 + $0x70] sm:$0xff]   ;;  %v343_v12 = vld [vmem:[%s3412_s15 + $0x98] sm:$0xf]  ;;  %v359_v15 = vld [vmem:[%s3412_s15 + $0x9c] sm:$0x1]  ;;  %s2967_s14 = sshll.u32 %s310_s13, 3 }
  0x19   : > { %v3429_v13 = vpack.c.b16 %v488_v4, %v3417_v3  ;;  %v615_v14 = vshll.u32 %v3425_v11, 16  ;;  %v3434_v17 = vunpack.c.l.b16 %v343_v12  ;;  %v491_v18 = vunpack.c.l.b16 %v359_v15  ;;  %v340_v19 = vld [vmem:[%s3412_s15 + $0x88] sm:$0xf]  ;;  %v358_v20 = vld [vmem:[%s3412_s15 + $0x8c] sm:$0x1]  ;;  %v3442_v24 = vld [vmem:[%s3412_s15 + $0x90] sm:$0xff]   ;;  %s312_s20 = scalar_lea.vmem %s4581_s7, %s2967_s14 }
  0x1a   : > { %v501_v16 = vpack.c.b16 %v489_v9, %v3422_v8  ;;  %v793_v25 = vrot.slane %v3185_v10, 1  ;;  %v613_v27 = vshrl.u32 %v3425_v11, 16  ;;  %v3450_v30 = vunpack.c.l.b16 %v340_v19  ;;  %v3466_v44 = vld [vmem:[%s3412_s15 + $0x80] sm:$0xff]   ;;  %v3189_v53 = vld [vmem:[%s3412_s15 + $0x90] sm:$0xf0] }
  0x1b   : > { %v791_v21 = vrot.slane %v3429_v13, 1  ;;  %v605_v22 = vshll.u32 %v3429_v13, 16  ;;  %v609_v23 = vshrl.u32 %v3429_v13, 16  ;;  %v617_v29 = vrot.slane %v615_v14, 1  ;;  %v3190_v54 = vld [vmem:[%s3412_s15 + $0x90] sm:$0xe] }
  0x1c   : > { %v794_v26 = vrot.slane %v501_v16, 1  ;;  %v490_v31 = vunpack.c.l.b16 %v358_v20  ;;  %v620_v32 = vshll.u32 %v501_v16, 16  ;;  %v3453_v33 = vpack.c.b16 %v491_v18, %v3434_v17  ;;  %v319_v58 = vld [vmem:[%s3412_s15 + $0x18] sm:$0xf]  ;;  %v351_v59 = vld [vmem:[%s3412_s15 + $0x1c] sm:$0x1] }
  0x1d   : > { %834 = vrot.lane.b32.xlu1 %v791_v21, %s3327_s16  ;;  %v3448_v28 = vrot.slane %v605_v22, 1  ;;  %v645_v34 = vshll.u32 %v3442_v24, 16  ;;  %v618_v37 = vor.u32 %v617_v29, %v613_v27  ;;  %v643_v38 = vshrl.u32 %v3442_v24, 16  ;;  %v3488_v4 = vld [vmem:[%s3412_s15 + $0x10] sm:$0xff]   ;;  %v322_v5 = vld [vmem:[%s3412_s15 + $0x28] sm:$0xf] }
  0x1e   : > { %838 = vrot.lane.b32.xlu2 %v794_v26, %s3327_s16  ;;  %v795_v36 = vsel %vm771_vm0, %v793_v25, %v794_v26  ;;  %v3462_v39 = vpack.c.b16 %v490_v31, %v3450_v30  ;;  %v622_v40 = vrot.slane %v620_v32, 1  ;;  %v650_v42 = vshll.u32 %v3453_v33, 16  ;;  %v352_v6 = vld [vmem:[%s3412_s15 + $0x2c] sm:$0x1]  ;;  %v3186_v15 = vld [vmem:[%s3412_s15 + $0x80] sm:$0xf0] }
  0x1f   : > { %v611_v35 = vor.u32 %v609_v23, %v3448_v28  ;;  %v647_v41 = vrot.slane %v645_v34, 1  ;;  %v624_v43 = vshrl.u32 %v501_v16, 16  ;;  %v630_v50 = vshll.u32 %v3466_v44, 16  ;;  %v3187_v16 = vld [vmem:[%s3412_s15 + $0x80] sm:$0xe] }
  0x20   : > { %v635_v46 = vshll.u32 %v3462_v39, 16  ;;  %v623_v47 = vsel %vm506_vm1, %v618_v37, %v622_v40  ;;  %v652_v49 = vrot.slane %v650_v42, 1  ;;  %v639_v52 = vshrl.u32 %v3462_v39, 16  ;;  %v3504_v22 = vld [vmem:[%s3412_s15 + $0x20] sm:$0xff]  }
  0x21   : > { %713 = vrot.lane.b32.xlu0 %v611_v35, %s3328_s17  ;;  %v626_v45 = vor.u32 %v624_v43, %v622_v40  ;;  %v648_v48 = vor.u32 %v647_v41, %v643_v38  ;;  %v628_v56 = vshrl.u32 %v3466_v44, 16  ;;  %v632_v57 = vrot.slane %v630_v50, 1  ;;  %v3168_v35 = vld [vmem:[%s3412_s15 + $0x20] sm:$0xf0]  ;;  %v3166_v40 = vld [vmem:[%s3412_s15 + $0x10] sm:$0xe] }
  0x22   : > { %v637_v51 = vrot.slane %v635_v46, 1  ;;  %v797_v60 = vrot.slane %v3462_v39, 1  ;;  %v3191_v62 = vor.u32 %v3190_v54, %v3189_v53  ;;  %v3483_v63 = vunpack.c.l.b16 %v319_v58  ;;  %v3165_v39 = vld [vmem:[%s3412_s15 + $0x10] sm:$0xf0]  ;;  %v316_v43 = vld [vmem:[%s3412_s15 + $0x8] sm:$0xf] }
  0x23   : > { %v653_v55 = vsel %vm506_vm1, %v648_v48, %v652_v49  ;;  %v483_v0 = vunpack.c.l.b16 %v351_v59  ;;  %v633_v1 = vor.u32 %v632_v57, %v628_v56  ;;  %v654_v2 = vshrl.u32 %v3453_v33, 16  ;;  %v3162_v54 = vld [vmem:[%s3412_s15] sm:$0xf0] }
  0x24   : > { %v641_v61 = vor.u32 %v639_v52, %v637_v51  ;;  %v525_v7 = vshll.u32 %v3488_v4, 16  ;;  %v799_v9 = vrot.slane %v3191_v62, 1  ;;  %v800_v10 = vrot.slane %v3453_v33, 1  ;;  %v3533_v56 = vld [vmem:[%s3412_s15] sm:$0xff]  }
  0x25   : > { %836 = vrot.lane.b32.xlu1 %v795_v36, %s3327_s16  ;;  %v3496_v12 = vpack.c.b16 %v483_v0, %v3483_v63  ;;  %v638_v14 = vsel %vm506_vm1, %v633_v1, %v637_v51  ;;  %v3501_v18 = vunpack.c.l.b16 %v322_v5  ;;  %v484_v19 = vunpack.c.l.b16 %v352_v6  ;;  %v3169_v36 = vld [vmem:[%s3412_s15 + $0x20] sm:$0xe]  ;;  %v325_v5 = vld [vmem:[%s3412_s15 + $0x38] sm:$0xf]  ;;  %v353_v6 = vld [vmem:[%s3412_s15 + $0x3c] sm:$0x1] }
  0x26   : > { %717 = vrot.lane.b32.xlu2 %v626_v45, %s3328_s17  ;;  %v656_v20 = vor.u32 %v654_v2, %v652_v49  ;;  %v523_v23 = vshrl.u32 %v3488_v4, 16  ;;  %v527_v25 = vrot.slane %v525_v7, 1  ;;  %v3188_v27 = vor.u32 %v3187_v16, %v3186_v15  ;;  %v350_v45 = vld [vmem:[%s3412_s15 + $0xc] sm:$0x1] }
  0x27   : > { %v530_v26 = vshll.u32 %v3496_v12, 16  ;;  %v801_v29 = vsel %vm771_vm0, %v799_v9, %v800_v10  ;;  %v3511_v31 = vpack.c.b16 %v484_v19, %v3501_v18  ;;  %v540_v32 = vshll.u32 %v3504_v22, 16 }
  0x28   : > { %v528_v33 = vor.u32 %v527_v25, %v523_v23  ;;  %v796_v37 = vrot.slane %v3188_v27, 1  ;;  %v538_v38 = vshrl.u32 %v3504_v22, 16  ;;  %v3167_v48 = vor.u32 %v3166_v40, %v3165_v39  ;;  %v3171_v40 = vld [vmem:[%s3412_s15 + $0x30] sm:$0xf0] }
  0x29   : > { %715 = vrot.lane.b32.xlu0 %v623_v47, %s3328_s17  ;;  %v532_v34 = vrot.slane %v530_v26, 1  ;;  %v542_v41 = vrot.slane %v540_v32, 1  ;;  %v545_v42 = vshll.u32 %v3511_v31, 16  ;;  %v3170_v47 = vor.u32 %v3169_v36, %v3168_v35 }
  0x2a   : > { %v3526_v49 = vunpack.c.l.b16 %v316_v43  ;;  %v482_v50 = vunpack.c.l.b16 %v350_v45  ;;  %v798_v51 = vsel %vm771_vm0, %v796_v37, %v797_v60  ;;  %v779_v58 = vrot.slane %v3511_v31, 1 }
  0x2b   : > { %v533_v46 = vsel %vm506_vm1, %v528_v33, %v532_v34  ;;  %v543_v52 = vor.u32 %v542_v41, %v538_v38  ;;  %v547_v53 = vrot.slane %v545_v42, 1  ;;  %v778_v57 = vrot.slane %v3170_v47, 1  ;;  %v3172_v41 = vld [vmem:[%s3412_s15 + $0x30] sm:$0xe] }
  0x2c   : > { %v775_v59 = vrot.slane %v3167_v48, 1  ;;  %v510_v1 = vshll.u32 %v3533_v56, 16  ;;  %v534_v19 = vshrl.u32 %v3496_v12, 16  ;;  %v3556_v23 = vunpack.c.l.b16 %v325_v5 }
  0x2d   : > { %723 = vrot.lane.b32.xlu1 %v653_v55, %s3328_s17  ;;  %v3163_v55 = vld [vmem:[%s3412_s15] sm:$0xe]  ;;  %v548_v0 = vsel %vm506_vm1, %v543_v52, %v547_v53  ;;  %v780_v2 = vsel %vm771_vm0, %v778_v57, %v779_v58  ;;  %v485_v25 = vunpack.c.l.b16 %v353_v6  ;;  %v549_v37 = vshrl.u32 %v3511_v31, 16  ;;  %v354_v52 = vld [vmem:[%s3412_s15 + $0x4c] sm:$0x1] }
  0x2e   : > { %842 = vrot.lane.b32.xlu2 %v797_v60, %s3327_s16  ;;  %v3539_v60 = vpack.c.b16 %v482_v50, %v3526_v49  ;;  %v3164_v62 = vor.u32 %v3163_v55, %v3162_v54  ;;  %v512_v15 = vrot.slane %v510_v1, 1  ;;  %v536_v33 = vor.u32 %v534_v19, %v532_v34  ;;  %v331_v6 = vld [vmem:[%s3412_s15 + $0x58] sm:$0xf] }
  0x2f   : > { %v551_v34 = vor.u32 %v549_v37, %v547_v53  ;;  %v3173_v45 = vor.u32 %v3172_v41, %v3171_v40  ;;  %v486_v57 = vunpack.c.l.b16 %v354_v52  ;;  %v3177_v41 = vld [vmem:[%s3412_s15 + $0x50] sm:$0xf0]  ;;  %v459_v13 = vpack.c.b16 %v3417_v3, %v3417_v3  ;;  %v3011_v3 = vld [vmem:[%s4575_s1 + $0x20] sm:$0xf] }
  0x30   : > { %v772_v9 = vrot.slane %v3164_v62, 1  ;;  %v515_v16 = vshll.u32 %v3539_v60, 16  ;;  %v519_v48 = vshrl.u32 %v3539_v60, 16  ;;  %v3174_v62 = vld [vmem:[%s3412_s15 + $0x40] sm:$0xf0] }
  0x31   : > { %721 = vrot.lane.b32.xlu0 %v641_v61, %s3328_s17  ;;  %v776_v61 = vrot.slane %v3496_v12, 1  ;;  %v497_v12 = vpack.c.b16 %v485_v25, %v3556_v23  ;;  %v781_v31 = vrot.slane %v3173_v45, 1 }
  0x32   : > { %v517_v32 = vrot.slane %v515_v16, 1  ;;  %v3596_v16 = vunpack.c.l.b16 %v331_v6 }
  0x33   : > { %v777_v7 = vsel %vm771_vm0, %v775_v59, %v776_v61  ;;  %v560_v38 = vshll.u32 %v497_v12, 16  ;;  %v782_v47 = vrot.slane %v497_v12, 1  ;;  %v564_v54 = vshrl.u32 %v497_v12, 16  ;;  %v3584_v59 = vld [vmem:[%s3412_s15 + $0x40] sm:$0xff]  }
  0x34   : > { %v521_v53 = vor.u32 %v519_v48, %v517_v32 }
  0x35   : > { %719 = vrot.lane.b32.xlu1 %v638_v14, %s3328_s17  ;;  %v508_v14 = vshrl.u32 %v3533_v56, 16  ;;  %v562_v43 = vrot.slane %v560_v38, 1  ;;  %v783_v50 = vsel %vm771_vm0, %v781_v31, %v782_v47 }
  0x36   : > { %725 = vrot.lane.b32.xlu2 %v656_v20, %s3328_s17  ;;  %v3554_v20 = vld [vmem:[%s3412_s15 + $0x30] sm:$0xff]  }
  0x37   : > { %v555_v26 = vshll.u32 %v3554_v20, 16  ;;  %v553_v35 = vshrl.u32 %v3554_v20, 16 }
  0x39   : > { %844 = vrot.lane.b32.xlu0 %v801_v29, %s3327_s16  ;;  %v513_v29 = vor.u32 %v512_v15, %v508_v14  ;;  %v557_v36 = vrot.slane %v555_v26, 1  ;;  %v3600_v26 = vld [vmem:[%s3412_s15 + $0x50] sm:$0xff]  }
  0x3a   : > { %v583_v37 = vshrl.u32 %v3600_v26, 16 }
  0x3b   : > { %v518_v39 = vsel %vm506_vm1, %v513_v29, %v517_v32  ;;  %v558_v42 = vor.u32 %v557_v36, %v553_v35 }
  0x3d   : > { %846 = vrot.lane.b32.xlu1 %v800_v10, %s3327_s16  ;;  %v773_v10 = vrot.slane %v3539_v60, 1 }
  0x3e   : > { %691 = vrot.lane.b32.xlu2 %v533_v46, %s3328_s17  ;;  %v563_v46 = vsel %vm506_vm1, %v558_v42, %v562_v43  ;;  %v3178_v42 = vld [vmem:[%s3412_s15 + $0x50] sm:$0xe] }
  0x3f   : > { %v774_v27 = vsel %vm771_vm0, %v772_v9, %v773_v10  ;;  %v568_v9 = vshrl.u32 %v3584_v59, 16 }
  0x41   : > { %840 = vrot.lane.b32.xlu0 %v798_v51, %s3327_s16  ;;  %v328_v51 = vld [vmem:[%s3412_s15 + $0x48] sm:$0xf] }
  0x42   : > { %v3581_v55 = vunpack.c.l.b16 %v328_v51  ;;  %v3623_v51 = vld [vmem:[%s3412_s15 + $0x60] sm:$0xff]  }
  0x44   : > { %v498_v1 = vpack.c.b16 %v486_v57, %v3581_v55  ;;  %v3180_v57 = vld [vmem:[%s3412_s15 + $0x60] sm:$0xf0] }
  0x45   : > { %695 = vrot.lane.b32.xlu1 %v548_v0, %s3328_s17  ;;  %v3175_v0 = vld [vmem:[%s3412_s15 + $0x40] sm:$0xe] }
  0x46   : > { %816 = vrot.lane.b32.xlu2 %v780_v2, %s3327_s16  ;;  %v570_v2 = vshll.u32 %v3584_v59, 16  ;;  %v3176_v5 = vor.u32 %v3175_v0, %v3174_v62  ;;  %v575_v15 = vshll.u32 %v498_v1, 16  ;;  %v785_v25 = vrot.slane %v498_v1, 1  ;;  %v3181_v62 = vld [vmem:[%s3412_s15 + $0x60] sm:$0xe] }
  0x47   : > { %v579_v35 = vshrl.u32 %v498_v1, 16  ;;  %v598_v0 = vshrl.u32 %v3623_v51, 16  ;;  %v3182_v6 = vor.u32 %v3181_v62, %v3180_v57  ;;  %v3079_v62 = vld [vmem:[%s4575_s1 + $0x18] sm:$0xff] }
  0x48   : > { %v572_v14 = vrot.slane %v570_v2, 1  ;;  %v577_v29 = vrot.slane %v575_v15, 1  ;;  %v3077_v2 = vld [vmem:[%s4575_s1] sm:$0xff] }
  0x49   : > { %812 = vrot.lane.b32.xlu0 %v777_v7, %s3327_s16  ;;  %v355_v7 = vld [vmem:[%s3412_s15 + $0x5c] sm:$0x1] }
  0x4a   : > { %v487_v19 = vunpack.c.l.b16 %v355_v7 }
  0x4c   : > { %v499_v32 = vpack.c.b16 %v487_v19, %v3596_v16  ;;  %v2989_v19 = vld [vmem:[%s4575_s1 + $0x14] sm:$0xf] }
  0x4d   : > { %808 = vrot.lane.b32.xlu1 %v774_v27, %s3327_s16  ;;  %v573_v27 = vor.u32 %v572_v14, %v568_v9  ;;  %v790_v9 = vrot.slane %v3182_v6, 1 }
  0x4e   : > { %693 = vrot.lane.b32.xlu2 %v536_v33, %s3328_s17  ;;  %v585_v33 = vshll.u32 %v3600_v26, 16  ;;  %v590_v60 = vshll.u32 %v499_v32, 16  ;;  %v788_v45 = vrot.slane %v499_v32, 1  ;;  %v594_v52 = vshrl.u32 %v499_v32, 16 }
  0x4f   : > { %v578_v36 = vsel %vm506_vm1, %v573_v27, %v577_v29  ;;  %v792_v14 = vsel %vm771_vm0, %v790_v9, %v791_v21 }
  0x50   : > { %v587_v38 = vrot.slane %v585_v33, 1  ;;  %v592_v40 = vrot.slane %v590_v60, 1 }
  0x51   : > { %687 = vrot.lane.b32.xlu0 %v518_v39, %s3328_s17 }
  0x52   : > { %v588_v39 = vor.u32 %v587_v38, %v583_v37  ;;  %v596_v1 = vor.u32 %v594_v52, %v592_v40 }
  0x54   : > { %v593_v31 = vsel %vm506_vm1, %v588_v39, %v592_v40  ;;  %v1479_v39 = vunpack.c.l.b16 %v3011_v3 }
  0x55   : > { %697 = vrot.lane.b32.xlu1 %v551_v34, %s3328_s17  ;;  %v3179_v34 = vor.u32 %v3178_v42, %v3177_v41  ;;  %v3078_v42 = vld [vmem:[%s4575_s1 + $0xc] sm:$0xff] }
  0x56   : > { %699 = vrot.lane.b32.xlu2 %v563_v46, %s3328_s17  ;;  %v1018_v46 = vld [vmem:[%s4575_s1 + $0x8] sm:$0xf] }
  0x59   : > { %814 = vrot.lane.b32.xlu0 %v776_v61, %s3327_s16  ;;  %v566_v61 = vor.u32 %v564_v54, %v562_v43  ;;  %v787_v43 = vrot.slane %v3179_v34, 1 }
  0x5b   : > { %v789_v48 = vsel %vm771_vm0, %v787_v43, %v788_v45  ;;  %v463_v43 = vpack.c.b16 %v3450_v30, %v3450_v30 }
  0x5d   : > { %820 = vrot.lane.b32.xlu1 %v783_v50, %s3327_s16 }
  0x5e   : > { %689 = vrot.lane.b32.xlu2 %v521_v53, %s3328_s17  ;;  %v600_v53 = vshll.u32 %v3623_v51, 16 }
  0x61   : > { %818 = vrot.lane.b32.xlu0 %v779_v58, %s3327_s16  ;;  %v784_v58 = vrot.slane %v3176_v5, 1 }
  0x63   : > { %v786_v12 = vsel %vm771_vm0, %v784_v58, %v785_v25  ;;  %v1236_v58 = vunpack.c.l.b16 %v2989_v19 }
  0x65   : > { %701 = vrot.lane.b32.xlu1 %v566_v61, %s3328_s17  ;;  %v602_v61 = vrot.slane %v600_v53, 1 }
  0x66   : > { %822 = vrot.lane.b32.xlu2 %v782_v47, %s3327_s16  ;;  %v1039_v47 = vunpack.c.l.b16 %v1018_v46  ;;  %v461_v46 = vpack.c.b16 %v3422_v8, %v3422_v8 }
  0x67   : > { %v603_v5 = vor.u32 %v602_v61, %v598_v0 }
  0x68   : > { %v1041_v50 = vpack.c.b16 %v1039_v47, %v1039_v47 }
  0x69   : > { %810 = vrot.lane.b32.xlu0 %v773_v10, %s3327_s16  ;;  %v581_v10 = vor.u32 %v579_v35, %v577_v29  ;;  %v608_v7 = vsel %vm506_vm1, %v603_v5, %v3448_v28  ;;  %v1238_v28 = vpack.c.b16 %v1236_v58, %v1236_v58 }
  0x6a   : > { %v1091_v54 = vsel %vm1089_vm2, %v1041_v50, 0 }
  0x6b   : > { %3217 = vmatpush.bf16.msra.mxu1 %v1091_v54  ;;  %3218 = vmatpush.bf16.msra.mxu2 %v1091_v54 }
  0x6c   : > { %1099 = vmatpush.bf16.msra.mxu0 %v1091_v54 }
  0x6d   : > { %824 = vrot.lane.b32.xlu1 %v786_v12, %s3327_s16 }
  0x6e   : > { %705 = vrot.lane.b32.xlu2 %v581_v10, %s3328_s17 }
  0x6f   : > { %3219 = vmatpush.bf16.msra.mxu1 %v3077_v2  ;;  %3220 = vmatpush.bf16.msra.mxu2 %v3077_v2 }
  0x70   : > { %1100 = vmatpush.bf16.msra.mxu0 %v3077_v2 }
  0x71   : > { %703 = vrot.lane.b32.xlu0 %v578_v36, %s3328_s17 }
  0x75   : > { %826 = vrot.lane.b32.xlu1 %v785_v25, %s3327_s16  ;;  %v1286_v25 = vsel %vm1089_vm2, %v1238_v28, 0 }
  0x76   : > { %828 = vrot.lane.b32.xlu2 %v789_v48, %s3327_s16  ;;  %1294 = vmatpush.bf16.msrb.mxu1 %v1286_v25 }
  0x78   : > { %v839_v15 = vpop.permute.xlu2 %838 }
  0x79   : > { %707 = vrot.lane.b32.xlu0 %v593_v31, %s3328_s17 }
  0x7a   : > { %1295 = vmatpush.bf16.msrb.mxu1 %v3078_v42  ;;  %v449_v42 = vpack.c.b16 %v3483_v63, %v3483_v63 }
  0x7d   : > { %830 = vrot.lane.b32.xlu1 %v788_v45, %s3327_s16 }
  0x7e   : > { %711 = vrot.lane.b32.xlu2 %v608_v7, %s3328_s17  ;;  %v465_v7 = vpack.c.b16 %v3434_v17, %v3434_v17 }
  0x80   : > { %v718_v29 = vpop.permute.xlu2 %717 }
  0x81   : > { %709 = vrot.lane.b32.xlu0 %v596_v1, %s3328_s17  ;;  %v896_v50 = vsel %vm856_vm3, %v461_v46, %v718_v29 }
  0x82   : > { %v3685_v30 = vsel %vm917_vm4, %v896_v50, %v839_v15 }
  0x83   : > { %v1009_v61 = vunpack.c.l.b16 %v3685_v30 }
  0x88   : > { %v843_v37 = vpop.permute.xlu2 %842 }
  0x89   : > { %832 = vrot.lane.b32.xlu0 %v792_v14, %s3327_s16 }
  0x8f   : > { %v835_v27 = vpop.permute.xlu1 %834 }
  0x90   : > { %v726_v31 = vpop.permute.xlu2 %725 }
  0x91   : > { %v906_v14 = vsel %vm856_vm3, %v465_v7, %v726_v31 }
  0x93   : > { %v714_v32 = vpop.permute.xlu0 %713 }
  0x94   : > { %v891_v33 = vsel %vm856_vm3, %v459_v13, %v714_v32 }
  0x95   : > { %v3651_v12 = vsel %vm917_vm4, %v891_v33, %v835_v27 }
  0x96   : > { %v1006_v60 = vunpack.c.l.b16 %v3651_v12 }
  0x97   : > { %v837_v21 = vpop.permute.xlu1 %836 }
  0x98   : > { %v692_v5 = vpop.permute.xlu2 %691 }
  0x9b   : > { %v716_v35 = vpop.permute.xlu0 %715 }
  0x9c   : > { %v893_v36 = vsel %vm856_vm3, %v3425_v11, %v716_v35  ;;  %v1481_v11 = vpack.c.b16 %v1479_v39, %v1479_v39 }
  0x9d   : > { %v3656_v38 = vsel %vm917_vm4, %v893_v36, %v837_v21 }
  0x9e   : > { %v1007_v10 = vunpack.c.l.b16 %v3656_v38  ;;  %v1493_v34 = vsel %vm1089_vm2, %v1481_v11, 0  ;;  %v1008_v8 = vunpack.c.h.b16 %v3656_v38 }
  0x9f   : > { %v724_v40 = vpop.permute.xlu1 %723  ;;  %1501 = vmatpush.bf16.msrb.mxu2 %v1493_v34 }
  0xa0   : > { %v3665_v41 = vpack.c.b16 %v1007_v10, %v1006_v60  ;;  %v903_v52 = vsel %vm856_vm3, %v3442_v24, %v724_v40  ;;  %v3703_v6 = vpack.c.b16 %v1009_v61, %v1008_v8  ;;  %v817_v58 = vpop.permute.xlu2 %816  ;;  %v863_v10 = vsel %vm856_vm3, %v3488_v4, %v692_v5 }
  0xa2   : > { %2982 = vmatmul.msk.bf16.vlgmr.msra.gmra.mxu1 %vm1043_vm5, %v3665_v41 }
  0xa3   : > { %v722_v45 = vpop.permute.xlu0 %721  ;;  %1502 = vmatpush.bf16.msrb.mxu2 %v3079_v62 }
  0xa4   : > { %v901_v47 = vsel %vm856_vm3, %v463_v43, %v722_v45  ;;  %v447_v43 = vpack.c.b16 %v3526_v49, %v3526_v49 }
  0xa5   : > { %v3682_v53 = vsel %vm917_vm4, %v901_v47, %v843_v37 }
  0xa6   : > { %v1012_v0 = vunpack.c.l.b16 %v3682_v53 }
  0xa7   : > { %v720_v48 = vpop.permute.xlu1 %719 }
  0xa8   : > { %v898_v17 = vsel %vm856_vm3, %v3466_v44, %v720_v48  ;;  %v694_v33 = vpop.permute.xlu2 %693 }
  0xa9   : > { %v866_v45 = vsel %vm856_vm3, %v449_v42, %v694_v33 }
  0xab   : > { %v845_v54 = vpop.permute.xlu0 %844 }
  0xac   : > { %v3688_v57 = vsel %vm917_vm4, %v903_v52, %v845_v54 }
  0xad   : > { %v1013_v24 = vunpack.c.l.b16 %v3688_v57  ;;  %v1014_v27 = vunpack.c.h.b16 %v3688_v57 }
  0xaf   : > { %v847_v1 = vpop.permute.xlu1 %846  ;;  %v3699_v2 = vpack.c.b16 %v1013_v24, %v1012_v0 }
  0xb0   : > { %v3713_v15 = vsel %vm917_vm4, %v906_v14, %v847_v1  ;;  %v700_v39 = vpop.permute.xlu2 %699 }
  0xb1   : > { %2985 = vmatmul.msk.bf16.vlgmr.msra.gmra.mxu2 %vm1043_vm5, %v3699_v2  ;;  %v1015_v28 = vunpack.c.l.b16 %v3713_v15  ;;  %v873_v4 = vsel %vm856_vm3, %v3554_v20, %v700_v39 }
  0xb2   : > { %2983 = vmatmul.msk.bf16.gmra.mxu1 %vm1043_vm5, %v3703_v6 }
  0xb3   : > { %v841_v9 = vpop.permute.xlu0 %840  ;;  %v3721_v29 = vpack.c.b16 %v1015_v28, %v1014_v27 }
  0xb4   : > { %v3724_v32 = vsel %vm917_vm4, %v898_v17, %v841_v9  ;;  %v453_v9 = vpack.c.b16 %v3556_v23, %v3556_v23 }
  0xb7   : > { %v696_v19 = vpop.permute.xlu1 %695 }
  0xb8   : > { %v868_v37 = vsel %vm856_vm3, %v3504_v22, %v696_v19  ;;  %v690_v31 = vpop.permute.xlu2 %689 }
  0xb9   : > { %v927_v40 = vsel %vm917_vm4, %v868_v37, %v817_v58  ;;  %v861_v48 = vsel %vm856_vm3, %v447_v43, %v690_v31 }
  0xba   : > { %v992_v24 = vunpack.c.l.b16 %v927_v40 }
  0xbb   : > { %v813_v25 = vpop.permute.xlu0 %812 }
  0xbc   : > { %v923_v11 = vsel %vm917_vm4, %v863_v10, %v813_v25  ;;  %v455_v10 = vpack.c.b16 %v3581_v55, %v3581_v55 }
  0xbd   : > { %v989_v62 = vunpack.c.l.b16 %v923_v11  ;;  %v990_v17 = vunpack.c.h.b16 %v923_v11 }
  0xbf   : > { %v809_v13 = vpop.permute.xlu1 %808 }
  0xc0   : > { %v823_v58 = vpop.permute.xlu2 %822 }
  0xc1   : > { %2986 = vmatmul.msk.bf16.gmra.mxu2 %vm1043_vm5, %v3721_v29 }
  0xc2   : > { %2984 = vmatmul.msk.bf16.gmra.mxu1 %vm1043_vm5, %v3724_v32 }
  0xc3   : > { %v688_v21 = vpop.permute.xlu0 %687 }
  0xc4   : > { %v858_v35 = vsel %vm856_vm3, %v3533_v56, %v688_v21  ;;  %v451_v56 = vpack.c.b16 %v3501_v18, %v3501_v18  ;;  %v993_v21 = vunpack.c.h.b16 %v927_v40 }
  0xc5   : > { %v919_v44 = vsel %vm917_vm4, %v858_v35, %v809_v13 }
  0xc6   : > { %2972 = vmatmul.msk.bf16.vlgmr.msra.gmra.mxu0 %vm1043_vm5, %v919_v44 }
  0xc7   : > { %v698_v3 = vpop.permute.xlu1 %697 }
  0xc8   : > { %v871_v34 = vsel %vm856_vm3, %v451_v56, %v698_v3 }
  0xcb   : > { %v815_v36 = vpop.permute.xlu0 %814 }
  0xcc   : > { %v925_v63 = vsel %vm917_vm4, %v866_v45, %v815_v36  ;;  %v706_v36 = vpop.permute.xlu2 %705 }
  0xcd   : > { %v991_v8 = vunpack.c.l.b16 %v925_v63  ;;  %v881_v56 = vsel %vm856_vm3, %v455_v10, %v706_v36 }
  0xcf   : > { %v821_v46 = vpop.permute.xlu1 %820  ;;  %v1217_v7 = vpack.c.b16 %v992_v24, %v991_v8  ;;  %v1021_v33 = vpack.c.b16 %v991_v8, %v990_v17 }
  0xd0   : > { %v931_v18 = vsel %vm917_vm4, %v873_v4, %v821_v46  ;;  %v457_v46 = vpack.c.b16 %v3596_v16, %v3596_v16 }
  0xd1   : > { %3016 = vmatmul.msk.bf16.vlgmr.msrb.gmra.mxu2 %vm1043_vm5, %v927_v40  ;;  %v995_v50 = vunpack.c.l.b16 %v931_v18  ;;  %v996_v13 = vunpack.c.h.b16 %v931_v18 }
  0xd2   : > { %2994 = vmatmul.msk.bf16.vlgmr.msrb.gmra.mxu1 %vm1043_vm5, %v923_v11 }
  0xd3   : > { %v819_v22 = vpop.permute.xlu0 %818 }
  0xd4   : > { %v929_v47 = vsel %vm917_vm4, %v871_v34, %v819_v22  ;;  %v829_v34 = vpop.permute.xlu2 %828 }
  0xd5   : > { %v994_v52 = vunpack.c.l.b16 %v929_v47 }
  0xd7   : > { %v1023_v5 = vpack.c.b16 %v995_v50, %v994_v52  ;;  %v702_v14 = vpop.permute.xlu1 %701  ;;  %v1218_v44 = vpack.c.b16 %v994_v52, %v993_v21 }
  0xd8   : > { %v876_v19 = vsel %vm856_vm3, %v453_v9, %v702_v14 }
  0xd9   : > { %v933_v25 = vsel %vm917_vm4, %v876_v19, %v823_v58 }
  0xda   : > { %v997_v27 = vunpack.c.l.b16 %v933_v25 }
  0xdb   : > { %v811_v54 = vpop.permute.xlu0 %810 }
  0xdc   : > { %v921_v20 = vsel %vm917_vm4, %v861_v48, %v811_v54  ;;  %v1024_v35 = vpack.c.b16 %v997_v27, %v996_v13 }
  0xdd   : > { %v988_v49 = vunpack.c.l.b16 %v921_v20 }
  0xdf   : > { %v1020_v1 = vpack.c.b16 %v989_v62, %v988_v49  ;;  %v825_v37 = vpop.permute.xlu1 %824  ;;  %v712_v62 = vpop.permute.xlu2 %711 }
  0xe0   : > { %v888_v49 = vsel %vm856_vm3, %v3623_v51, %v712_v62 }
  0xe1   : > { %2973 = vmatmul.msk.bf16.gmra.mxu0 %vm1043_vm5, %v1020_v1  ;;  %3017 = vmatmul.msk.bf16.gmra.mxu2 %vm1043_vm5, %v1023_v5 }
  0xe2   : > { %2995 = vmatmul.msk.bf16.gmra.mxu1 %vm1043_vm5, %v1217_v7 }
  0xe3   : > { %v704_v23 = vpop.permute.xlu0 %703 }
  0xe4   : > { %v878_v3 = vsel %vm856_vm3, %v3584_v59, %v704_v23 }
  0xe5   : > { %v935_v39 = vsel %vm917_vm4, %v878_v3, %v825_v37 }
  0xe6   : > { %v998_v45 = vunpack.c.l.b16 %v935_v39  ;;  %v999_v52 = vunpack.c.h.b16 %v935_v39 }
  0xe7   : > { %v827_v22 = vpop.permute.xlu1 %826 }
  0xe8   : > { %v937_v55 = vsel %vm917_vm4, %v881_v56, %v827_v22  ;;  %v1220_v31 = vpack.c.b16 %v998_v45, %v997_v27  ;;  %v3828_v22 = vld [vmem:[%s4576_s2] ss:$0 sm:$0xff] }
  0xe9   : > { %v1000_v43 = vunpack.c.l.b16 %v937_v55  ;;  %v3840_v55 = vld [vmem:[%s4577_s3] ss:$0 sm:$0xff] }
  0xeb   : > { %v708_v11 = vpop.permute.xlu0 %707  ;;  %v1221_v16 = vpack.c.b16 %v1000_v43, %v999_v52 }
  0xec   : > { %v883_v42 = vsel %vm856_vm3, %v3600_v26, %v708_v11 }
  0xed   : > { %v939_v59 = vsel %vm917_vm4, %v883_v42, %v829_v34 }
  0xee   : > { %v1001_v4 = vunpack.c.l.b16 %v939_v59  ;;  %v1002_v48 = vunpack.c.h.b16 %v939_v59 }
  0xef   : > { %v831_v47 = vpop.permute.xlu1 %830 }
  0xf1   : > { %2974 = vmatmul.msk.bf16.gmra.mxu0 %vm1043_vm5, %v1021_v33  ;;  %3018 = vmatmul.msk.bf16.gmra.mxu2 %vm1043_vm5, %v1024_v35 }
  0xf2   : > { %2996 = vmatmul.msk.bf16.gmra.mxu1 %vm1043_vm5, %v1218_v44 }
 0x101   : > { %2975 = vmatmul.msk.bf16.gmra.mxu0 %vm1043_vm5, %v927_v40  ;;  %3019 = vmatmul.msk.bf16.gmra.mxu2 %vm1043_vm5, %v935_v39  ;;  %v1026_v40 = vpack.c.b16 %v1001_v4, %v1000_v43 }
 0x102   : > { %2997 = vmatmul.msk.bf16.gmra.mxu1 %vm1043_vm5, %v931_v18  ;;  %v710_v18 = vpop.permute.xlu0 %709 }
 0x103   : > { %v886_v26 = vsel %vm856_vm3, %v457_v46, %v710_v18 }
 0x104   : > { %v941_v63 = vsel %vm917_vm4, %v886_v26, %v831_v47 }
 0x105   : > { %v1003_v50 = vunpack.c.l.b16 %v941_v63 }
 0x107   : > { %v1027_v54 = vpack.c.b16 %v1003_v50, %v1002_v48 }
 0x10a   : > { %v833_v24 = vpop.permute.xlu0 %832 }
 0x111   : > { %2976 = vmatmul.msk.bf16.gmra.mxu0 %vm1043_vm5, %v1023_v5  ;;  %3020 = vmatmul.msk.bf16.gmra.mxu2 %vm1043_vm5, %v1026_v40  ;;  %v943_v5 = vsel %vm917_vm4, %v888_v49, %v833_v24 }
 0x112   : > { %2998 = vmatmul.msk.bf16.gmra.mxu1 %vm1043_vm5, %v1220_v31  ;;  %v1004_v14 = vunpack.c.l.b16 %v943_v5  ;;  %v1005_v21 = vunpack.c.h.b16 %v943_v5 }
 0x114   : > { %v1223_v19 = vpack.c.b16 %v1004_v14, %v1003_v50  ;;  %v1224_v23 = vpack.c.b16 %v1006_v60, %v1005_v21  ;;  %v1809_v60 = vlaneseq }
 0x116   : > { %v3830_v34 = vshrl.u32 %v1809_v60, 7 }
 0x118   : > { %vm1843_vm9 = vcmp.ge.s32.totalorder %v3830_v34, 1  ;;  %v3882_v21 = vadd.s32 16, %v3830_v34 }
 0x11a   : > { %vm1878_vm12 = vcmp.le.s32.totalorder %v3882_v21, 16 }
 0x11f   : > { %v1152_v8 = vpop.f32.mrf.mxu1 }
 0x120   : > { %1197 = vst.msk [vmem:[#allocation3 + $0xa0] sm:$0xff] %vm856_vm3, %v1152_v8 }
 0x121   : > { %2977 = vmatmul.msk.bf16.gmra.mxu0 %vm1043_vm5, %v1024_v35  ;;  %3021 = vmatmul.msk.bf16.gmra.mxu2 %vm1043_vm5, %v1027_v54 }
 0x122   : > { %2999 = vmatmul.msk.bf16.gmra.mxu1 %vm1043_vm5, %v1221_v16 }
 0x127   : > { %v1154_v20 = vpop.f32.mrf.mxu1 }
 0x128   : > { %1198 = vst.msk [vmem:[#allocation3 + $0xa8] sm:$0xff] %vm856_vm3, %v1154_v20 }
 0x12f   : > { %v1157_v1 = vpop.f32.mrf.mxu1 }
 0x130   : > { %1199 = vst.msk [vmem:[#allocation3 + $0xb0] sm:$0xff] %vm856_vm3, %v1157_v1 }
 0x131   : > { %2978 = vmatmul.msk.bf16.gmra.mxu0 %vm1043_vm5, %v935_v39  ;;  %3022 = vmatmul.msk.bf16.gmra.mxu2 %vm1043_vm5, %v943_v5 }
 0x132   : > { %3000 = vmatmul.msk.bf16.gmra.mxu1 %vm1043_vm5, %v939_v59 }
 0x134   : > { %v1167_v7 = vpop.f32.mrf.mxu2 }
 0x135   : > { %1203 = vst.msk [vmem:[#allocation3 + $0xd0] sm:$0xff] %vm856_vm3, %v1167_v7 }
 0x137   : > { %v1159_v9 = vpop.f32.mrf.mxu1 }
 0x138   : > { %1200 = vst.msk [vmem:[#allocation3 + $0xb8] sm:$0xff] %vm856_vm3, %v1159_v9 }
 0x13c   : > { %v1169_v51 = vpop.f32.mrf.mxu2 }
 0x13d   : > { %1204 = vst.msk [vmem:[#allocation3 + $0xd8] sm:$0xff] %vm856_vm3, %v1169_v51 }
 0x13f   : > { %v1162_v58 = vpop.f32.mrf.mxu1 }
 0x140   : > { %1201 = vst.msk [vmem:[#allocation3 + $0xc0] sm:$0xff] %vm856_vm3, %v1162_v58  ;;  %v360_v58 = vld [vmem:[%s3412_s15 + $0xac] sm:$0x1] }
 0x141   : > { %2979 = vmatmul.msk.bf16.gmra.mxu0 %vm1043_vm5, %v1026_v40  ;;  %3023 = vmatmul.msk.bf16.gmra.mxu2 %vm1043_vm5, %v3665_v41  ;;  %v492_v30 = vunpack.c.l.b16 %v360_v58 }
 0x142   : > { %3001 = vmatmul.msk.bf16.gmra.mxu1 %vm1043_vm5, %v1223_v19  ;;  %v346_v19 = vld [vmem:[%s3412_s15 + $0xa8] sm:$0xf] }
 0x143   : > { %v1102_v25 = vpop.f32.mrf.mxu0 }
 0x144   : > { %1177 = vst.msk [vmem:[#allocation3] sm:$0xff] %vm856_vm3, %v1102_v25  ;;  %v1172_v27 = vpop.f32.mrf.mxu2 }
 0x145   : > { %1205 = vst.msk [vmem:[#allocation3 + $0xe0] sm:$0xff] %vm856_vm3, %v1172_v27  ;;  %v3874_v27 = vunpack.c.l.b16 %v346_v19 }
 0x147   : > { %v1164_v17 = vpop.f32.mrf.mxu1 }
 0x148   : > { %1202 = vst.msk [vmem:[#allocation3 + $0xc8] sm:$0xff] %vm856_vm3, %v1164_v17  ;;  %v3160_v17 = vld [vmem:[%s3412_s15 + $0xa0] sm:$0xff]  }
 0x14b   : > { %v1104_v13 = vpop.f32.mrf.mxu0  ;;  %v1372_v35 = vld [vmem:[#allocation3] sm:$0xff] }
 0x14c   : > { %1178 = vst.msk [vmem:[#allocation3 + $0x8] sm:$0xff] %vm856_vm3, %v1104_v13  ;;  %v1174_v33 = vpop.f32.mrf.mxu2  ;;  %v3879_v13 = vpack.c.b16 %v492_v30, %v3874_v27 }
 0x14d   : > { %1206 = vst.msk [vmem:[#allocation3 + $0xe8] sm:$0xff] %vm856_vm3, %v1174_v33 }
 0x14f   : > { %v1297_v41 = vpop.f32.mrf.mxu1 }
 0x150   : > { %v1402_v44 = vadd.f32 %v1372_v35, %v1297_v41 }
 0x151   : > { %2980 = vmatmul.msk.bf16.gmra.mxu0 %vm1043_vm5, %v1027_v54  ;;  %3024 = vmatmul.msk.bf16.gmra.mxu2 %vm1043_vm5, %v3703_v6  ;;  %v3822_v6 = vstv %s3032_s19  ;;  %v1010_v54 = vunpack.c.l.b16 %v3724_v32 }
 0x152   : > { %1432 = vst.msk [vmem:[#allocation3] sm:$0xff] %vm856_vm3, %v1402_v44  ;;  %3002 = vmatmul.msk.bf16.gmra.mxu1 %vm1043_vm5, %v1224_v23  ;;  %vm1813_vm6 = vcmp.ge.s32.totalorder %v3822_v6, 0  ;;  %vm1823_vm7 = vcmp.lt.s32.totalorder %v3822_v6, 16  ;;  %v658_v23 = vshrl.u32 %v3160_v17, 16 }
 0x153   : > { %v1373_v3 = vld [vmem:[#allocation3 + $0x8] sm:$0xff]  ;;  %vm3846_vm8 = vmand %vm1813_vm6, %vm1823_vm7  ;;  %v1226_v9 = vpack.c.b16 %v1010_v54, %v1009_v61 }
 0x154   : > { %v1504_v36 = vpop.f32.mrf.mxu2  ;;  %vm1846_vm10 = vmand %vm3846_vm8, %vm1843_vm9 }
 0x155   : > { %vm1881_vm13 = vmand %vm3846_vm8, %vm1878_vm12 }
 0x157   : > { %v1299_v37 = vpop.f32.mrf.mxu1 }
 0x158   : > { %v1403_v10 = vadd.f32 %v1373_v3, %v1299_v37  ;;  %v665_v37 = vshll.u32 %v3879_v13, 16 }
 0x159   : > { %v1579_v39 = vld [vmem:[#allocation3] sm:$0xff] }
 0x15a   : > { %v1609_v11 = vadd.f32 %v1579_v39, %v1504_v36  ;;  %1433 = vst.msk [vmem:[#allocation3 + $0x8] sm:$0xff] %vm856_vm3, %v1403_v10 }
 0x15c   : > { %1639 = vst.msk [vmem:[#allocation3] sm:$0xff] %vm856_vm3, %v1609_v11  ;;  %v1506_v12 = vpop.f32.mrf.mxu2  ;;  %v3887_v11 = vrot.slane %v665_v37, 1 }
 0x15e   : > { %v1107_v56 = vpop.f32.mrf.mxu0 }
 0x15f   : > { %1179 = vst.msk [vmem:[#allocation3 + $0x10] sm:$0xff] %vm856_vm3, %v1107_v56  ;;  %v1302_v42 = vpop.f32.mrf.mxu1 }
 0x161   : > { %v1580_v59 = vld [vmem:[#allocation3 + $0x8] sm:$0xff]  ;;  %2981 = vmatmul.msk.bf16.gmra.mxu0 %vm1043_vm5, %v943_v5  ;;  %3025 = vmatmul.msk.bf16.gmra.mxu2 %vm1043_vm5, %v3724_v32 }
 0x162   : > { %v1610_v4 = vadd.f32 %v1580_v59, %v1506_v12  ;;  %3003 = vmatmul.msk.bf16.gmra.mxu1 %vm1043_vm5, %v3656_v38  ;;  %v1800_v59 = vadd.s32 1, %v3822_v6 }
 0x163   : > { %v1669_v43 = vld [vmem:[#allocation3] sm:$0xff] }
 0x164   : > { %v1703_v45 = vmul.f32 %v3828_v22, %v1669_v43  ;;  %1640 = vst.msk [vmem:[#allocation3 + $0x8] sm:$0xff] %vm856_vm3, %v1610_v4  ;;  %v1509_v40 = vpop.f32.mrf.mxu2  ;;  %vm1814_vm14 = vcmp.ge.s32.totalorder %v1800_v59, 0  ;;  %vm1824_vm15 = vcmp.lt.s32.totalorder %v1800_v59, 16 }
 0x165   : > { %vm3911_vm6 = vmand %vm1814_vm14, %vm1824_vm15 }
 0x166   : > { %v1737_v31 = vadd.f32 %v3840_v55, %v1703_v45  ;;  %v1374_v18 = vld [vmem:[#allocation3 + $0x10] sm:$0xff]  ;;  %v1109_v26 = vpop.f32.mrf.mxu0  ;;  %vm1849_vm7 = vmand %vm3911_vm6, %vm1843_vm9 }
 0x167   : > { %v1404_v47 = vadd.f32 %v1374_v18, %v1302_v42  ;;  %1180 = vst.msk [vmem:[#allocation3 + $0x18] sm:$0xff] %vm856_vm3, %v1109_v26  ;;  %v1304_v38 = vpop.f32.mrf.mxu1  ;;  %v1011_v42 = vunpack.c.h.b16 %v3724_v32 }
 0x168   : > { %v1767_v63 = vmax.f32 %v1737_v31, 0.0 }
 0x169   : > { %1434 = vst.msk [vmem:[#allocation3 + $0x10] sm:$0xff] %vm856_vm3, %v1404_v47  ;;  %v1227_v47 = vpack.c.b16 %v1012_v0, %v1011_v42 }
 0x16a   : > { %v1969_v48 = vsel %vm1846_vm10, %v1767_v63, 0.0 }
 0x16b   : > { %v1670_v50 = vld [vmem:[#allocation3 + $0x8] sm:$0xff]  ;;  %v1999_v52 = vpack.c.bf16 %v1969_v48, %v1969_v48 }
 0x16c   : > { %v1704_v8 = vmul.f32 %v3828_v22, %v1670_v50  ;;  %v1511_v16 = vpop.f32.mrf.mxu2 }
 0x16d   : > { %2030 = vst.msk [vmem:[#allocation2] sm:$0xf] %vm2029_vm11, %v1999_v52 }
 0x16e   : > { %v1738_v20 = vadd.f32 %v3840_v55, %v1704_v8  ;;  %v1375_v62 = vld [vmem:[#allocation3 + $0x18] sm:$0xff]  ;;  %v1112_v49 = vpop.f32.mrf.mxu0 }
 0x16f   : > { %v1405_v24 = vadd.f32 %v1375_v62, %v1304_v38  ;;  %1181 = vst.msk [vmem:[#allocation3 + $0x20] sm:$0xff] %vm856_vm3, %v1112_v49  ;;  %v1307_v1 = vpop.f32.mrf.mxu1 }
 0x170   : > { %v1768_v5 = vmax.f32 %v1738_v20, 0.0  ;;  %v1581_v7 = vld [vmem:[#allocation3 + $0x10] sm:$0xff] }
 0x171   : > { %v1611_v14 = vadd.f32 %v1581_v7, %v1509_v40  ;;  %1435 = vst.msk [vmem:[#allocation3 + $0x18] sm:$0xff] %vm856_vm3, %v1405_v24  ;;  %3026 = vmatmul.msk.bf16.gmra.mxu2 %vm1043_vm5, %v3699_v2  ;;  %v660_v2 = vshll.u32 %v3160_v17, 16 }
 0x172   : > { %3004 = vmatmul.msk.bf16.gmra.mxu1 %vm1043_vm5, %v1226_v9  ;;  %v1970_v51 = vsel %vm3846_vm8, %v1768_v5, 0.0  ;;  %vm1884_vm8 = vmand %vm3911_vm6, %vm1878_vm12 }
 0x173   : > { %1641 = vst.msk [vmem:[#allocation3 + $0x10] sm:$0xff] %vm856_vm3, %v1611_v14  ;;  %v2000_v25 = vpack.c.bf16 %v1970_v51, %v1970_v51  ;;  %v662_v36 = vrot.slane %v660_v2, 1 }
 0x174   : > { %v1514_v61 = vpop.f32.mrf.mxu2  ;;  %v3203_v58 = vld [vmem:[#allocation2] sm:$0xe] }
 0x175   : > { %2031 = vst.msk [vmem:[#allocation2 + $0x4] sm:$0xf] %vm2029_vm11, %v2000_v25  ;;  %v663_v39 = vor.u32 %v662_v36, %v658_v23  ;;  %v3193_v23 = vld [vmem:[%s3412_s15 + $0xa0] sm:$0xe] }
 0x176   : > { %v1376_v33 = vld [vmem:[#allocation3 + $0x20] sm:$0xff]  ;;  %v1114_v41 = vpop.f32.mrf.mxu0 }
 0x177   : > { %v1406_v35 = vadd.f32 %v1376_v33, %v1307_v1  ;;  %1182 = vst.msk [vmem:[#allocation3 + $0x28] sm:$0xff] %vm856_vm3, %v1114_v41  ;;  %v1309_v44 = vpop.f32.mrf.mxu1  ;;  %v668_v56 = vsel %vm506_vm1, %v663_v39, %v3887_v11 }
 0x178   : > { %v1582_v3 = vld [vmem:[#allocation3 + $0x18] sm:$0xff]  ;;  %727 = vrot.lane.b32.xlu0 %v668_v56, %s3328_s17 }
 0x179   : > { %v1612_v10 = vadd.f32 %v1582_v3, %v1511_v16  ;;  %1436 = vst.msk [vmem:[#allocation3 + $0x20] sm:$0xff] %vm856_vm3, %v1406_v35 }
 0x17a   : > { %v1671_v12 = vld [vmem:[#allocation3 + $0x10] sm:$0xff] }
 0x17b   : > { %v1705_v60 = vmul.f32 %v3828_v22, %v1671_v12  ;;  %1642 = vst.msk [vmem:[#allocation3 + $0x18] sm:$0xff] %vm856_vm3, %v1612_v10 }
 0x17c   : > { %v1516_v4 = vpop.f32.mrf.mxu2  ;;  %v3922_v62 = vld [vmem:[#allocation2] sm:$0xff]  }
 0x17d   : > { %v1739_v43 = vadd.f32 %v3840_v55, %v1705_v60  ;;  %v3202_v1 = vld [vmem:[#allocation2] sm:$0xf0]  ;;  %v2183_v9 = vshll.u32 %v3922_v62, 16  ;;  %v2181_v60 = vshrl.u32 %v3922_v62, 16 }
 0x17e   : > { %v1377_v45 = vld [vmem:[#allocation3 + $0x28] sm:$0xff]  ;;  %v1117_v40 = vpop.f32.mrf.mxu0 }
 0x17f   : > { %v1769_v31 = vmax.f32 %v1739_v43, 0.0  ;;  %v1407_v18 = vadd.f32 %v1377_v45, %v1309_v44  ;;  %1183 = vst.msk [vmem:[#allocation3 + $0x30] sm:$0xff] %vm856_vm3, %v1117_v40  ;;  %v1312_v26 = vpop.f32.mrf.mxu1  ;;  %v2185_v35 = vrot.slane %v2183_v9, 1  ;;  %v3192_v44 = vld [vmem:[%s3412_s15 + $0xa0] sm:$0xf0] }
 0x180   : > { %v1583_v32 = vld [vmem:[#allocation3 + $0x20] sm:$0xff] }
 0x181   : > { %v1971_v38 = vsel %vm1881_vm13, %v1769_v31, 0.0  ;;  %v1613_v63 = vadd.f32 %v1583_v32, %v1514_v61  ;;  %1437 = vst.msk [vmem:[#allocation3 + $0x28] sm:$0xff] %vm856_vm3, %v1407_v18  ;;  %3027 = vmatmul.msk.bf16.gmra.mxu2 %vm1043_vm5, %v3721_v29  ;;  %v3204_v61 = vor.u32 %v3203_v58, %v3202_v1  ;;  %v2186_v40 = vor.u32 %v2185_v35, %v2181_v60 }
 0x182   : > { %v1672_v46 = vld [vmem:[#allocation3 + $0x18] sm:$0xff]  ;;  %3005 = vmatmul.msk.bf16.gmra.mxu1 %vm1043_vm5, %v1227_v47  ;;  %v2001_v48 = vpack.c.bf16 %v1971_v38, %v1971_v38  ;;  %v1801_v32 = vadd.s32 2, %v3822_v6 }
 0x183   : > { %v1706_v50 = vmul.f32 %v3828_v22, %v1672_v46  ;;  %1643 = vst.msk [vmem:[#allocation3 + $0x20] sm:$0xff] %vm856_vm3, %v1613_v63  ;;  %v2350_v39 = vrot.slane %v3204_v61, 1 }
 0x184   : > { %v1519_v53 = vpop.f32.mrf.mxu2  ;;  %2032 = vst.msk [vmem:[#allocation2 + $0x8] sm:$0xf] %vm2029_vm11, %v2001_v48  ;;  %vm1815_vm10 = vcmp.ge.s32.totalorder %v1801_v32, 0  ;;  %vm1825_vm13 = vcmp.lt.s32.totalorder %v1801_v32, 16 }
 0x185   : > { %v1740_v0 = vadd.f32 %v3840_v55, %v1706_v50  ;;  %v803_v50 = vrot.slane %v3879_v13, 1  ;;  %vm3963_vm14 = vmand %vm1815_vm10, %vm1825_vm13 }
 0x186   : > { %v1378_v54 = vld [vmem:[#allocation3 + $0x30] sm:$0xff]  ;;  %v1119_v8 = vpop.f32.mrf.mxu0  ;;  %vm1852_vm15 = vmand %vm3963_vm14, %vm1843_vm9 }
 0x187   : > { %v1770_v29 = vmax.f32 %v1740_v0, 0.0  ;;  %v1408_v16 = vadd.f32 %v1378_v54, %v1312_v26  ;;  %1184 = vst.msk [vmem:[#allocation3 + $0x38] sm:$0xff] %vm856_vm3, %v1119_v8  ;;  %v1314_v20 = vpop.f32.mrf.mxu1 }
 0x188   : > { %v1584_v49 = vld [vmem:[#allocation3 + $0x28] sm:$0xff] }
 0x189   : > { %v1614_v24 = vadd.f32 %v1584_v49, %v1516_v4  ;;  %1438 = vst.msk [vmem:[#allocation3 + $0x30] sm:$0xff] %vm856_vm3, %v1408_v16  ;;  %v1972_v5 = vsel %vm1849_vm7, %v1770_v29, 0.0  ;;  %v3194_v4 = vor.u32 %v3193_v23, %v3192_v44  ;;  %v349_v29 = vld [vmem:[%s3412_s15 + $0xb8] sm:$0xf]  ;;  %v361_v16 = vld [vmem:[%s3412_s15 + $0xbc] sm:$0x1] }
 0x18a   : > { %v1673_v7 = vld [vmem:[#allocation3 + $0x20] sm:$0xff]  ;;  %v2002_v14 = vpack.c.bf16 %v1972_v5, %v1972_v5 }
 0x18b   : > { %v1707_v51 = vmul.f32 %v3828_v22, %v1673_v7  ;;  %1644 = vst.msk [vmem:[#allocation3 + $0x28] sm:$0xff] %vm856_vm3, %v1614_v24  ;;  %v2080_v19 = vld [vmem:[#allocation2 + $0x8] sm:$0x1]  ;;  %v802_v48 = vrot.slane %v3194_v4, 1 }
 0x18c   : > { %v1521_v25 = vpop.f32.mrf.mxu2  ;;  %v2160_v30 = vunpack.c.l.b16 %v2080_v19  ;;  %2033 = vst.msk [vmem:[#allocation2 + $0xc] sm:$0xf] %vm2029_vm11, %v2002_v14  ;;  %v493_v19 = vunpack.c.l.b16 %v361_v16 }
 0x18d   : > { %v1741_v17 = vadd.f32 %v3840_v55, %v1707_v51  ;;  %v804_v52 = vsel %vm771_vm0, %v802_v48, %v803_v50  ;;  %v3969_v51 = vunpack.c.l.b16 %v349_v29 }
 0x18e   : > { %v1379_v2 = vld [vmem:[#allocation3 + $0x38] sm:$0xff]  ;;  %v1122_v33 = vpop.f32.mrf.mxu0  ;;  %v2170_v41 = vpack.c.b16 %v2160_v30, %v2160_v30 }
 0x18f   : > { %v1771_v36 = vmax.f32 %v1741_v17, 0.0  ;;  %v1409_v37 = vadd.f32 %v1379_v2, %v1314_v20  ;;  %1185 = vst.msk [vmem:[#allocation3 + $0x40] sm:$0xff] %vm856_vm3, %v1122_v33  ;;  %v1317_v3 = vpop.f32.mrf.mxu1  ;;  %v3196_v30 = vld [vmem:[%s3412_s15 + $0xb0] sm:$0xe]  ;;  %v669_v17 = vshrl.u32 %v3879_v13, 16 }
 0x190   : > { %v1585_v10 = vld [vmem:[#allocation3 + $0x30] sm:$0xff]  ;;  %v2351_v12 = vrot.slane %v2170_v41, 1  ;;  %v2188_v56 = vshll.u32 %v2170_v41, 16 }
 0x191   : > { %v1973_v42 = vsel %vm3911_vm6, %v1771_v36, 0.0  ;;  %v1615_v59 = vadd.f32 %v1585_v10, %v1519_v53  ;;  %1439 = vst.msk [vmem:[#allocation3 + $0x38] sm:$0xff] %vm856_vm3, %v1409_v37  ;;  %v3983_v36 = vpack.c.b16 %v493_v19, %v3969_v51  ;;  %vm1887_vm6 = vmand %vm3963_vm14, %vm1878_vm12 }
 0x192   : > { %v1674_v43 = vld [vmem:[#allocation3 + $0x28] sm:$0xff]  ;;  %3006 = vmatmul.msk.bf16.gmra.mxu1 %vm1043_vm5, %v3688_v57  ;;  %v2352_v45 = vsel %vm771_vm0, %v2350_v39, %v2351_v12  ;;  %v2190_v31 = vrot.slane %v2188_v56, 1  ;;  %v2003_v18 = vpack.c.bf16 %v1973_v42, %v1973_v42  ;;  %v671_v39 = vor.u32 %v669_v17, %v3887_v11  ;;  %v3989_v42 = vld [vmem:[%s3412_s15 + $0xb0] sm:$0xff]  }
 0x193   : > { %v1708_v26 = vmul.f32 %v3828_v22, %v1674_v43  ;;  %1645 = vst.msk [vmem:[#allocation3 + $0x30] sm:$0xff] %vm856_vm3, %v1615_v59  ;;  %2380 = vrot.lane.b32.xlu2 %v2352_v45, %s3327_s16  ;;  %v3273_v23 = vld [vmem:[#allocation2 + $0xc] sm:$0xe]  ;;  %v675_v32 = vshll.u32 %v3989_v42, 16 }
 0x194   : > { %v1524_v47 = vpop.f32.mrf.mxu2  ;;  %v2191_v38 = vsel %vm506_vm1, %v2186_v40, %v2190_v31  ;;  %2034 = vst.msk [vmem:[#allocation2 + $0x10] sm:$0xf] %vm2029_vm11, %v2003_v18  ;;  %v806_v40 = vrot.slane %v3983_v36, 1 }
 0x195   : > { %v1742_v57 = vadd.f32 %v3840_v55, %v1708_v26  ;;  %2300 = vrot.lane.b32.xlu1 %v2191_v38, %s3328_s17 }
 0x196   : > { %v1380_v63 = vld [vmem:[#allocation3 + $0x40] sm:$0xff]  ;;  %v1124_v46 = vpop.f32.mrf.mxu0 }
 0x197   : > { %v1772_v53 = vmax.f32 %v1742_v57, 0.0  ;;  %v1410_v0 = vadd.f32 %v1380_v63, %v1317_v3  ;;  %1186 = vst.msk [vmem:[#allocation3 + $0x48] sm:$0xff] %vm856_vm3, %v1124_v46  ;;  %v1319_v54 = vpop.f32.mrf.mxu1 }
 0x198   : > { %v1586_v8 = vld [vmem:[#allocation3 + $0x38] sm:$0xff] }
 0x199   : > { %v1616_v20 = vadd.f32 %v1586_v8, %v1521_v25  ;;  %1440 = vst.msk [vmem:[#allocation3 + $0x40] sm:$0xff] %vm856_vm3, %v1410_v0  ;;  %v1974_v49 = vsel %vm1884_vm8, %v1772_v53, 0.0  ;;  %v3195_v25 = vld [vmem:[%s3412_s15 + $0xb0] sm:$0xf0] }
 0x19a   : > { %v1675_v24 = vld [vmem:[#allocation3 + $0x30] sm:$0xff]  ;;  %v2004_v1 = vpack.c.bf16 %v1974_v49, %v1974_v49  ;;  %v3197_v37 = vor.u32 %v3196_v30, %v3195_v25 }
 0x19b   : > { %v1709_v5 = vmul.f32 %v3828_v22, %v1675_v24  ;;  %1646 = vst.msk [vmem:[#allocation3 + $0x38] sm:$0xff] %vm856_vm3, %v1616_v20  ;;  %v3967_v9 = vld [vmem:[#allocation2 + $0xc] sm:$0xff]  }
 0x19c   : > { %v3272_v14 = vld [vmem:[#allocation2 + $0xc] sm:$0xf0]  ;;  %v1526_v58 = vpop.f32.mrf.mxu2  ;;  %2035 = vst.msk [vmem:[#allocation2 + $0x14] sm:$0xf] %vm2029_vm11, %v2004_v1  ;;  %v2195_v56 = vshll.u32 %v3967_v9, 16  ;;  %v805_v45 = vrot.slane %v3197_v37, 1 }
 0x19d   : > { %v1743_v61 = vadd.f32 %v3840_v55, %v1709_v5  ;;  %848 = vrot.lane.b32.xlu1 %v804_v52, %s3327_s16  ;;  %v3274_v26 = vor.u32 %v3273_v23, %v3272_v14  ;;  %v2193_v20 = vshrl.u32 %v3967_v9, 16  ;;  %v673_v52 = vshrl.u32 %v3989_v42, 16 }
 0x19e   : > { %v1381_v2 = vld [vmem:[#allocation3 + $0x48] sm:$0xff]  ;;  %v1127_v33 = vpop.f32.mrf.mxu0  ;;  %v2197_v63 = vrot.slane %v2195_v56, 1  ;;  %v807_v0 = vsel %vm771_vm0, %v805_v45, %v806_v40  ;;  %v677_v1 = vrot.slane %v675_v32, 1 }
 0x19f   : > { %v1773_v41 = vmax.f32 %v1743_v61, 0.0  ;;  %v1411_v35 = vadd.f32 %v1381_v2, %v1319_v54  ;;  %1187 = vst.msk [vmem:[#allocation3 + $0x50] sm:$0xff] %vm856_vm3, %v1127_v33  ;;  %v1322_v44 = vpop.f32.mrf.mxu1  ;;  %v680_v54 = vshll.u32 %v3983_v36, 16  ;;  %v2353_v29 = vrot.slane %v3274_v26, 1 }
 0x1a0   : > { %v1587_v3 = vld [vmem:[#allocation3 + $0x40] sm:$0xff]  ;;  %v2198_v25 = vor.u32 %v2197_v63, %v2193_v20 }
 0x1a1   : > { %v1617_v10 = vadd.f32 %v1587_v3, %v1524_v47  ;;  %1441 = vst.msk [vmem:[#allocation3 + $0x48] sm:$0xff] %vm856_vm3, %v1411_v35  ;;  %v1975_v12 = vsel %vm1852_vm15, %v1773_v41, 0.0  ;;  %v682_v35 = vrot.slane %v680_v54, 1  ;;  %v678_v3 = vor.u32 %v677_v1, %v673_v52 }
 0x1a2   : > { %v1676_v60 = vld [vmem:[#allocation3 + $0x38] sm:$0xff]  ;;  %v2005_v59 = vpack.c.bf16 %v1975_v12, %v1975_v12 }
 0x1a3   : > { %v1710_v4 = vmul.f32 %v3828_v22, %v1676_v60  ;;  %1647 = vst.msk [vmem:[#allocation3 + $0x40] sm:$0xff] %vm856_vm3, %v1617_v10  ;;  %v2081_v43 = vld [vmem:[#allocation2 + $0x14] sm:$0x1]  ;;  %v683_v7 = vsel %vm506_vm1, %v678_v3, %v682_v35 }
 0x1a4   : > { %v1529_v31 = vpop.f32.mrf.mxu2  ;;  %v2161_v18 = vunpack.c.l.b16 %v2081_v43  ;;  %2036 = vst.msk [vmem:[#allocation2 + $0x18] sm:$0xf] %vm2029_vm11, %v2005_v59 }
 0x1a5   : > { %v1744_v11 = vadd.f32 %v3840_v55, %v1710_v4  ;;  %729 = vrot.lane.b32.xlu1 %v671_v39, %s3328_s17 }
 0x1a6   : > { %v1382_v47 = vld [vmem:[#allocation3 + $0x50] sm:$0xff]  ;;  %v1129_v38 = vpop.f32.mrf.mxu0  ;;  %v2171_v57 = vpack.c.b16 %v2161_v18, %v2161_v18 }
 0x1a7   : > { %v1774_v46 = vmax.f32 %v1744_v11, 0.0  ;;  %v1412_v48 = vadd.f32 %v1382_v47, %v1322_v44  ;;  %1188 = vst.msk [vmem:[#allocation3 + $0x58] sm:$0xff] %vm856_vm3, %v1129_v38  ;;  %v1324_v53 = vpop.f32.mrf.mxu1  ;;  %v684_v44 = vshrl.u32 %v3983_v36, 16 }
 0x1a8   : > { %v1588_v8 = vld [vmem:[#allocation3 + $0x48] sm:$0xff]  ;;  %v2354_v16 = vrot.slane %v2171_v57, 1  ;;  %v2200_v49 = vshll.u32 %v2171_v57, 16 }
 0x1a9   : > { %v1618_v24 = vadd.f32 %v1588_v8, %v1526_v58  ;;  %1442 = vst.msk [vmem:[#allocation3 + $0x50] sm:$0xff] %vm856_vm3, %v1412_v48  ;;  %v1976_v5 = vsel %vm3963_vm14, %v1774_v46, 0.0  ;;  %v1802_v58 = vadd.s32 3, %v3822_v6  ;;  %v686_v4 = vor.u32 %v684_v44, %v682_v35 }
 0x1aa   : > { %v1677_v14 = vld [vmem:[#allocation3 + $0x40] sm:$0xff]  ;;  %v2355_v19 = vsel %vm771_vm0, %v2353_v29, %v2354_v16  ;;  %v2202_v30 = vrot.slane %v2200_v49, 1  ;;  %v2006_v61 = vpack.c.bf16 %v1976_v5, %v1976_v5 }
 0x1ab   : > { %v1711_v17 = vmul.f32 %v3828_v22, %v1677_v14  ;;  %1648 = vst.msk [vmem:[#allocation3 + $0x48] sm:$0xff] %vm856_vm3, %v1618_v24  ;;  %2382 = vrot.lane.b32.xlu0 %v2355_v19, %s3327_s16  ;;  %vm1816_vm7 = vcmp.ge.s32.totalorder %v1802_v58, 0  ;;  %vm1826_vm8 = vcmp.lt.s32.totalorder %v1802_v58, 16  ;;  %v3206_v20 = vld [vmem:[#allocation2 + $0x18] sm:$0xe] }
 0x1ac   : > { %v1531_v2 = vpop.f32.mrf.mxu2  ;;  %v2203_v33 = vsel %vm506_vm1, %v2198_v25, %v2202_v30  ;;  %2037 = vst.msk [vmem:[#allocation2 + $0x1c] sm:$0xf] %vm2029_vm11, %v2006_v61  ;;  %vm4027_vm10 = vmand %vm1816_vm7, %vm1826_vm8 }
 0x1ad   : > { %v1745_v41 = vadd.f32 %v3840_v55, %v1711_v17  ;;  %852 = vrot.lane.b32.xlu1 %v807_v0, %s3327_s16  ;;  %2302 = vrot.lane.b32.xlu2 %v2203_v33, %s3328_s17  ;;  %vm1855_vm13 = vmand %vm4027_vm10, %vm1843_vm9 }
 0x1ae   : > { %v1383_v23 = vld [vmem:[#allocation3 + $0x58] sm:$0xff]  ;;  %v1132_v37 = vpop.f32.mrf.mxu0  ;;  %vm1890_vm14 = vmand %vm4027_vm10, %vm1878_vm12 }
 0x1af   : > { %v1775_v10 = vmax.f32 %v1745_v41, 0.0  ;;  %v1413_v39 = vadd.f32 %v1383_v23, %v1324_v53  ;;  %1189 = vst.msk [vmem:[#allocation3 + $0x60] sm:$0xff] %vm856_vm3, %v1132_v37  ;;  %v1327_v12 = vpop.f32.mrf.mxu1 }
 0x1b0   : > { %v1589_v60 = vld [vmem:[#allocation3 + $0x50] sm:$0xff] }
 0x1b1   : > { %v1977_v56 = vsel %vm1887_vm6, %v1775_v10, 0.0  ;;  %v1619_v59 = vadd.f32 %v1589_v60, %v1529_v31  ;;  %1443 = vst.msk [vmem:[#allocation3 + $0x58] sm:$0xff] %vm856_vm3, %v1413_v39 }
 0x1b2   : > { %v1678_v43 = vld [vmem:[#allocation3 + $0x48] sm:$0xff]  ;;  %v2007_v45 = vpack.c.bf16 %v1977_v56, %v1977_v56 }
 0x1b3   : > { %v1712_v18 = vmul.f32 %v3828_v22, %v1678_v43  ;;  %1649 = vst.msk [vmem:[#allocation3 + $0x50] sm:$0xff] %vm856_vm3, %v1619_v59  ;;  %850 = vrot.lane.b32.xlu0 %v803_v50, %s3327_s16  ;;  %v4044_v50 = vld [vmem:[#allocation2 + $0x18] sm:$0xff]   ;;  %v1803_v59 = vadd.s32 4, %v3822_v6 }
 0x1b4   : > { %v1534_v31 = vpop.f32.mrf.mxu2  ;;  %2038 = vst.msk [vmem:[#allocation2 + $0x20] sm:$0xf] %vm2029_vm11, %v2007_v45  ;;  %v3205_v53 = vld [vmem:[#allocation2 + $0x18] sm:$0xf0]  ;;  %v2207_v54 = vshll.u32 %v4044_v50, 16  ;;  %v2205_v41 = vshrl.u32 %v4044_v50, 16 }
 0x1b5   : > { %v1746_v11 = vadd.f32 %v3840_v55, %v1712_v18  ;;  %733 = vrot.lane.b32.xlu1 %v686_v4, %s3328_s17  ;;  %731 = vrot.lane.b32.xlu2 %v683_v7, %s3328_s17  ;;  %v3207_v52 = vor.u32 %v3206_v20, %v3205_v53  ;;  %vm1817_vm15 = vcmp.ge.s32.totalorder %v1803_v59, 0  ;;  %vm1827_vm6 = vcmp.lt.s32.totalorder %v1803_v59, 16 }
 0x1b6   : > { %v1384_v32 = vld [vmem:[#allocation3 + $0x60] sm:$0xff]  ;;  %v1134_v47 = vpop.f32.mrf.mxu0  ;;  %v2209_v25 = vrot.slane %v2207_v54, 1  ;;  %vm4074_vm7 = vmand %vm1817_vm15, %vm1827_vm6 }
 0x1b7   : > { %v1776_v38 = vmax.f32 %v1746_v11, 0.0  ;;  %v1414_v57 = vadd.f32 %v1384_v32, %v1327_v12  ;;  %1190 = vst.msk [vmem:[#allocation3 + $0x68] sm:$0xff] %vm856_vm3, %v1134_v47  ;;  %v1329_v13 = vpop.f32.mrf.mxu1  ;;  %vm1858_vm8 = vmand %vm4074_vm7, %vm1843_vm9 }
 0x1b8   : > { %v1590_v63 = vld [vmem:[#allocation3 + $0x58] sm:$0xff]  ;;  %v2210_v10 = vor.u32 %v2209_v25, %v2205_v41 }
 0x1b9   : > { %v1978_v46 = vsel %vm1855_vm13, %v1776_v38, 0.0  ;;  %v1620_v48 = vadd.f32 %v1590_v63, %v1531_v2  ;;  %1444 = vst.msk [vmem:[#allocation3 + $0x60] sm:$0xff] %vm856_vm3, %v1414_v57  ;;  %v2356_v2 = vrot.slane %v3207_v52, 1 }
 0x1ba   : > { %v1679_v0 = vld [vmem:[#allocation3 + $0x50] sm:$0xff]  ;;  %v2008_v8 = vpack.c.bf16 %v1978_v46, %v1978_v46 }
 0x1bb   : > { %v1713_v29 = vmul.f32 %v3828_v22, %v1679_v0  ;;  %1650 = vst.msk [vmem:[#allocation3 + $0x58] sm:$0xff] %vm856_vm3, %v1620_v48  ;;  %v2082_v16 = vld [vmem:[#allocation2 + $0x20] sm:$0x1] }
 0x1bc   : > { %v1536_v49 = vpop.f32.mrf.mxu2  ;;  %v2162_v24 = vunpack.c.l.b16 %v2082_v16  ;;  %2039 = vst.msk [vmem:[#allocation2 + $0x24] sm:$0xf] %vm2029_vm11, %v2008_v8 }
 0x1bd   : > { %v1747_v1 = vadd.f32 %v3840_v55, %v1713_v29 }
 0x1be   : > { %v1385_v5 = vld [vmem:[#allocation3 + $0x68] sm:$0xff]  ;;  %v1137_v14 = vpop.f32.mrf.mxu0  ;;  %v2172_v19 = vpack.c.b16 %v2162_v24, %v2162_v24 }
 0x1bf   : > { %v1777_v30 = vmax.f32 %v1747_v1, 0.0  ;;  %v1415_v61 = vadd.f32 %v1385_v5, %v1329_v13  ;;  %1191 = vst.msk [vmem:[#allocation3 + $0x70] sm:$0xff] %vm856_vm3, %v1137_v14  ;;  %v1332_v17 = vpop.f32.mrf.mxu1 }
 0x1c0   : > { %v1591_v58 = vld [vmem:[#allocation3 + $0x60] sm:$0xff]  ;;  %v2357_v33 = vrot.slane %v2172_v19, 1  ;;  %v2212_v35 = vshll.u32 %v2172_v19, 16 }
 0x1c1   : > { %v1979_v44 = vsel %vm4027_vm10, %v1777_v30, 0.0  ;;  %v1621_v23 = vadd.f32 %v1591_v58, %v1534_v31  ;;  %1445 = vst.msk [vmem:[#allocation3 + $0x68] sm:$0xff] %vm856_vm3, %v1415_v61  ;;  %vm1893_vm10 = vmand %vm4074_vm7, %vm1878_vm12 }
 0x1c2   : > { %v1680_v37 = vld [vmem:[#allocation3 + $0x58] sm:$0xff]  ;;  %v2358_v3 = vsel %vm771_vm0, %v2356_v2, %v2357_v33  ;;  %v2214_v39 = vrot.slane %v2212_v35, 1  ;;  %v2009_v12 = vpack.c.bf16 %v1979_v44, %v1979_v44 }
 0x1c3   : > { %v1714_v60 = vmul.f32 %v3828_v22, %v1680_v37  ;;  %1651 = vst.msk [vmem:[#allocation3 + $0x60] sm:$0xff] %vm856_vm3, %v1621_v23  ;;  %2384 = vrot.lane.b32.xlu0 %v2358_v3, %s3327_s16 }
 0x1c4   : > { %v1539_v56 = vpop.f32.mrf.mxu2  ;;  %v2215_v4 = vsel %vm506_vm1, %v2210_v10, %v2214_v39  ;;  %2040 = vst.msk [vmem:[#allocation2 + $0x28] sm:$0xf] %vm2029_vm11, %v2009_v12 }
 0x1c5   : > { %v1748_v43 = vadd.f32 %v3840_v55, %v1714_v60  ;;  %2304 = vrot.lane.b32.xlu2 %v2215_v4, %s3328_s17 }
 0x1c6   : > { %v1386_v7 = vld [vmem:[#allocation3 + $0x70] sm:$0xff]  ;;  %v1139_v45 = vpop.f32.mrf.mxu0 }
 0x1c7   : > { %v1778_v18 = vmax.f32 %v1748_v43, 0.0  ;;  %v1416_v31 = vadd.f32 %v1386_v7, %v1332_v17  ;;  %1192 = vst.msk [vmem:[#allocation3 + $0x78] sm:$0xff] %vm856_vm3, %v1139_v45  ;;  %v1334_v11 = vpop.f32.mrf.mxu1 }
 0x1c8   : > { %v1592_v32 = vld [vmem:[#allocation3 + $0x68] sm:$0xff] }
 0x1c9   : > { %v1980_v47 = vsel %vm1890_vm14, %v1778_v18, 0.0  ;;  %v1622_v38 = vadd.f32 %v1592_v32, %v1536_v49  ;;  %1446 = vst.msk [vmem:[#allocation3 + $0x70] sm:$0xff] %vm856_vm3, %v1416_v31  ;;  %v3276_v49 = vld [vmem:[#allocation2 + $0x24] sm:$0xe]  ;;  %v1804_v31 = vadd.s32 5, %v3822_v6 }
 0x1ca   : > { %v1681_v57 = vld [vmem:[#allocation3 + $0x60] sm:$0xff]  ;;  %v2010_v13 = vpack.c.bf16 %v1980_v47, %v1980_v47 }
 0x1cb   : > { %v1715_v63 = vmul.f32 %v3828_v22, %v1681_v57  ;;  %1652 = vst.msk [vmem:[#allocation3 + $0x68] sm:$0xff] %vm856_vm3, %v1622_v38  ;;  %v4078_v46 = vld [vmem:[#allocation2 + $0x24] sm:$0xff]   ;;  %vm1818_vm13 = vcmp.ge.s32.totalorder %v1804_v31, 0  ;;  %vm1828_vm14 = vcmp.lt.s32.totalorder %v1804_v31, 16 }
 0x1cc   : > { %v3275_v48 = vld [vmem:[#allocation2 + $0x24] sm:$0xf0]  ;;  %v1541_v53 = vpop.f32.mrf.mxu2  ;;  %2041 = vst.msk [vmem:[#allocation2 + $0x2c] sm:$0xf] %vm2029_vm11, %v2010_v13  ;;  %v2217_v39 = vshrl.u32 %v4078_v46, 16  ;;  %vm4121_vm15 = vmand %vm1818_vm13, %vm1828_vm14 }
 0x1cd   : > { %v1749_v0 = vadd.f32 %v3840_v55, %v1715_v63  ;;  %854 = vrot.lane.b32.xlu2 %v806_v40, %s3327_s16  ;;  %v2219_v40 = vshll.u32 %v4078_v46, 16  ;;  %v3277_v61 = vor.u32 %v3276_v49, %v3275_v48  ;;  %v2442_v38 = vld [vmem:[%s4578_s4 + $0x8] sm:$0xf]  ;;  %vm1861_vm6 = vmand %vm4121_vm15, %vm1843_vm9 }
 0x1ce   : > { %v1387_v54 = vld [vmem:[#allocation3 + $0x78] sm:$0xff]  ;;  %v1142_v8 = vpop.f32.mrf.mxu0  ;;  %v2448_v63 = vunpack.c.l.b16 %v2442_v38 }
 0x1cf   : > { %v1779_v29 = vmax.f32 %v1749_v0, 0.0  ;;  %v1417_v16 = vadd.f32 %v1387_v54, %v1334_v11  ;;  %1193 = vst.msk [vmem:[#allocation3 + $0x80] sm:$0xff] %vm856_vm3, %v1142_v8  ;;  %v1337_v20 = vpop.f32.mrf.mxu1  ;;  %v2221_v41 = vrot.slane %v2219_v40, 1  ;;  %v2359_v3 = vrot.slane %v3277_v61, 1  ;;  %v3080_v40 = vld [vmem:[%s4578_s4] sm:$0xff] }
 0x1d0   : > { %v1593_v24 = vld [vmem:[#allocation3 + $0x70] sm:$0xff]  ;;  %v2450_v8 = vpack.c.b16 %v2448_v63, %v2448_v63 }
 0x1d1   : > { %v1623_v52 = vadd.f32 %v1593_v24, %v1539_v56  ;;  %1447 = vst.msk [vmem:[#allocation3 + $0x78] sm:$0xff] %vm856_vm3, %v1417_v16  ;;  %v1981_v1 = vsel %vm1858_vm8, %v1779_v29, 0.0  ;;  %v2222_v43 = vor.u32 %v2221_v41, %v2217_v39 }
 0x1d2   : > { %v1682_v36 = vld [vmem:[#allocation3 + $0x68] sm:$0xff]  ;;  %v2011_v5 = vpack.c.bf16 %v1981_v1, %v1981_v1  ;;  %v2469_v26 = vsel %vm1089_vm2, %v2450_v8, 0 }
 0x1d3   : > { %v1716_v14 = vmul.f32 %v3828_v22, %v1682_v36  ;;  %1653 = vst.msk [vmem:[#allocation3 + $0x70] sm:$0xff] %vm856_vm3, %v1623_v52  ;;  %v2083_v19 = vld [vmem:[#allocation2 + $0x2c] sm:$0x1]  ;;  %2477 = vmatpush.bf16.msra.mxu3 %v2469_v26  ;;  %v4166_v52 = vld [vmem:[%s4576_s2] ss:$0 sm:$0xff] }
 0x1d4   : > { %v1544_v25 = vpop.f32.mrf.mxu2  ;;  %v2163_v30 = vunpack.c.l.b16 %v2083_v19  ;;  %2042 = vst.msk [vmem:[#allocation2 + $0x30] sm:$0xf] %vm2029_vm11, %v2011_v5 }
 0x1d5   : > { %v1750_v17 = vadd.f32 %v3840_v55, %v1716_v14 }
 0x1d6   : > { %v1388_v58 = vld [vmem:[#allocation3 + $0x80] sm:$0xff]  ;;  %v1144_v2 = vpop.f32.mrf.mxu0  ;;  %v2173_v33 = vpack.c.b16 %v2163_v30, %v2163_v30 }
 0x1d7   : > { %v1780_v35 = vmax.f32 %v1750_v17, 0.0  ;;  %v1418_v44 = vadd.f32 %v1388_v58, %v1337_v20  ;;  %1194 = vst.msk [vmem:[#allocation3 + $0x88] sm:$0xff] %vm856_vm3, %v1144_v2  ;;  %v1339_v23 = vpop.f32.mrf.mxu1  ;;  %2478 = vmatpush.bf16.msra.mxu3 %v3080_v40 }
 0x1d8   : > { %v1594_v37 = vld [vmem:[#allocation3 + $0x78] sm:$0xff]  ;;  %v2360_v10 = vrot.slane %v2173_v33, 1  ;;  %v2224_v12 = vshll.u32 %v2173_v33, 16 }
 0x1d9   : > { %v1624_v60 = vadd.f32 %v1594_v37, %v1541_v53  ;;  %1448 = vst.msk [vmem:[#allocation3 + $0x80] sm:$0xff] %vm856_vm3, %v1418_v44  ;;  %v1982_v56 = vsel %vm4074_vm7, %v1780_v35, 0.0  ;;  %vm1896_vm7 = vmand %vm4121_vm15, %vm1878_vm12 }
 0x1da   : > { %v1683_v59 = vld [vmem:[#allocation3 + $0x70] sm:$0xff]  ;;  %v2361_v4 = vsel %vm771_vm0, %v2359_v3, %v2360_v10  ;;  %v2226_v7 = vrot.slane %v2224_v12, 1  ;;  %v2012_v45 = vpack.c.bf16 %v1982_v56, %v1982_v56 }
 0x1db   : > { %v1717_v18 = vmul.f32 %v3828_v22, %v1683_v59  ;;  %1654 = vst.msk [vmem:[#allocation3 + $0x78] sm:$0xff] %vm856_vm3, %v1624_v60  ;;  %2386 = vrot.lane.b32.xlu1 %v2361_v4, %s3327_s16  ;;  %v3209_v3 = vld [vmem:[#allocation2 + $0x30] sm:$0xe] }
 0x1dc   : > { %v1546_v11 = vpop.f32.mrf.mxu2  ;;  %v2227_v32 = vsel %vm506_vm1, %v2222_v43, %v2226_v7  ;;  %2043 = vst.msk [vmem:[#allocation2 + $0x34] sm:$0xf] %vm2029_vm11, %v2012_v45 }
 0x1dd   : > { %v1751_v47 = vadd.f32 %v3840_v55, %v1717_v18  ;;  %2306 = vrot.lane.b32.xlu0 %v2227_v32, %s3328_s17  ;;  %v1392_v18 = vld [vmem:[#allocation3 + $0xa0] sm:$0xff] }
 0x1de   : > { %v1389_v57 = vld [vmem:[#allocation3 + $0x88] sm:$0xff]  ;;  %v1147_v13 = vpop.f32.mrf.mxu0 }
 0x1df   : > { %v1781_v48 = vmax.f32 %v1751_v47, 0.0  ;;  %v1419_v53 = vadd.f32 %v1389_v57, %v1339_v23  ;;  %1195 = vst.msk [vmem:[#allocation3 + $0x90] sm:$0xff] %vm856_vm3, %v1147_v13  ;;  %v1342_v0 = vpop.f32.mrf.mxu1 }
 0x1e0   : > { %v1595_v54 = vld [vmem:[#allocation3 + $0x80] sm:$0xff] }
 0x1e1   : > { %v1983_v29 = vsel %vm1893_vm10, %v1781_v48, 0.0  ;;  %v1625_v16 = vadd.f32 %v1595_v54, %v1544_v25  ;;  %1449 = vst.msk [vmem:[#allocation3 + $0x88] sm:$0xff] %vm856_vm3, %v1419_v53 }
 0x1e2   : > { %v1684_v20 = vld [vmem:[#allocation3 + $0x78] sm:$0xff]  ;;  %v2013_v49 = vpack.c.bf16 %v1983_v29, %v1983_v29 }
 0x1e3   : > { %v1718_v24 = vmul.f32 %v3828_v22, %v1684_v20  ;;  %1655 = vst.msk [vmem:[#allocation3 + $0x80] sm:$0xff] %vm856_vm3, %v1625_v16  ;;  %v4136_v61 = vld [vmem:[#allocation2 + $0x30] sm:$0xff]   ;;  %v1805_v20 = vadd.s32 6, %v3822_v6 }
 0x1e4   : > { %v1549_v1 = vpop.f32.mrf.mxu2  ;;  %2044 = vst.msk [vmem:[#allocation2 + $0x38] sm:$0xf] %vm2029_vm11, %v2013_v49  ;;  %v3208_v33 = vld [vmem:[#allocation2 + $0x30] sm:$0xf0]  ;;  %v2231_v35 = vshll.u32 %v4136_v61, 16  ;;  %v2229_v31 = vshrl.u32 %v4136_v61, 16 }
 0x1e5   : > { %v1752_v36 = vadd.f32 %v3840_v55, %v1718_v24  ;;  %v3210_v12 = vor.u32 %v3209_v3, %v3208_v33  ;;  %vm1819_vm8 = vcmp.ge.s32.totalorder %v1805_v20, 0  ;;  %vm1829_vm10 = vcmp.lt.s32.totalorder %v1805_v20, 16  ;;  %v1394_v3 = vld [vmem:[#allocation3 + $0xb0] sm:$0xff] }
 0x1e6   : > { %v1390_v5 = vld [vmem:[#allocation3 + $0x90] sm:$0xff]  ;;  %v1149_v14 = vpop.f32.mrf.mxu0  ;;  %v2233_v4 = vrot.slane %v2231_v35, 1  ;;  %vm4170_vm13 = vmand %vm1819_vm8, %vm1829_vm10 }
 0x1e7   : > { %v1782_v19 = vmax.f32 %v1752_v36, 0.0  ;;  %v1420_v25 = vadd.f32 %v1390_v5, %v1342_v0  ;;  %1196 = vst.msk [vmem:[#allocation3 + $0x98] sm:$0xff] %vm856_vm3, %v1149_v14  ;;  %v1344_v30 = vpop.f32.mrf.mxu1  ;;  %v2362_v47 = vrot.slane %v3210_v12, 1  ;;  %vm1864_vm14 = vmand %vm4170_vm13, %vm1843_vm9 }
 0x1e8   : > { %v1596_v17 = vld [vmem:[#allocation3 + $0x88] sm:$0xff]  ;;  %v2234_v0 = vor.u32 %v2233_v4, %v2229_v31 }
 0x1e9   : > { %v1984_v58 = vsel %vm1861_vm6, %v1782_v19, 0.0  ;;  %v1626_v2 = vadd.f32 %v1596_v17, %v1546_v11  ;;  %1450 = vst.msk [vmem:[#allocation3 + $0x90] sm:$0xff] %vm856_vm3, %v1420_v25 }
 0x1ea   : > { %v1685_v41 = vld [vmem:[#allocation3 + $0x80] sm:$0xff]  ;;  %v2014_v44 = vpack.c.bf16 %v1984_v58, %v1984_v58 }
 0x1eb   : > { %v1719_v23 = vmul.f32 %v3828_v22, %v1685_v41  ;;  %1656 = vst.msk [vmem:[#allocation3 + $0x88] sm:$0xff] %vm856_vm3, %v1626_v2  ;;  %v2084_v37 = vld [vmem:[#allocation2 + $0x38] sm:$0x1]  ;;  %v4180_v41 = vld [vmem:[%s4577_s3] ss:$0 sm:$0xff] }
 0x1ec   : > { %v1551_v10 = vpop.f32.mrf.mxu2  ;;  %v2164_v39 = vunpack.c.l.b16 %v2084_v37  ;;  %2045 = vst.msk [vmem:[#allocation2 + $0x3c] sm:$0xf] %vm2029_vm11, %v2014_v44 }
 0x1ed   : > { %v1753_v60 = vadd.f32 %v3840_v55, %v1719_v23 }
 0x1ee   : > { %v1391_v56 = vld [vmem:[#allocation3 + $0x98] sm:$0xff]  ;;  %v2174_v59 = vpack.c.b16 %v2164_v39, %v2164_v39 }
 0x1ef   : > { %v1783_v43 = vmax.f32 %v1753_v60, 0.0  ;;  %v1421_v7 = vadd.f32 %v1391_v56, %v1344_v30  ;;  %v1347_v45 = vpop.f32.mrf.mxu1 }
 0x1f0   : > { %v1597_v11 = vld [vmem:[#allocation3 + $0x90] sm:$0xff]  ;;  %v1422_v32 = vadd.f32 %v1392_v18, %v1347_v45  ;;  %v2363_v38 = vrot.slane %v2174_v59, 1  ;;  %v2236_v57 = vshll.u32 %v2174_v59, 16  ;;  %v1806_v18 = vadd.s32 7, %v3822_v6 }
 0x1f1   : > { %v1985_v13 = vsel %vm4121_vm15, %v1783_v43, 0.0  ;;  %v1627_v63 = vadd.f32 %v1597_v11, %v1549_v1  ;;  %1451 = vst.msk [vmem:[#allocation3 + $0x98] sm:$0xff] %vm856_vm3, %v1421_v7  ;;  %v1393_v1 = vld [vmem:[#allocation3 + $0xa8] sm:$0xff]  ;;  %vm4201_vm15 = vmand %vm4170_vm13, %vm1878_vm12 }
 0x1f2   : > { %v1686_v48 = vld [vmem:[#allocation3 + $0x88] sm:$0xff]  ;;  %1452 = vst.msk [vmem:[#allocation3 + $0xa0] sm:$0xff] %vm856_vm3, %v1422_v32  ;;  %v2364_v53 = vsel %vm771_vm0, %v2362_v47, %v2363_v38  ;;  %v2238_v54 = vrot.slane %v2236_v57, 1  ;;  %v2015_v8 = vpack.c.bf16 %v1985_v13, %v1985_v13  ;;  %vm1820_vm6 = vcmp.ge.s32.totalorder %v1806_v18, 0 }
 0x1f3   : > { %v1720_v29 = vmul.f32 %v3828_v22, %v1686_v48  ;;  %1657 = vst.msk [vmem:[#allocation3 + $0x90] sm:$0xff] %vm856_vm3, %v1627_v63  ;;  %2388 = vrot.lane.b32.xlu0 %v2364_v53, %s3327_s16  ;;  %v2381_v48 = vpop.permute.xlu2 %2380 }
 0x1f4   : > { %v1554_v16 = vpop.f32.mrf.mxu2  ;;  %v2239_v49 = vsel %vm506_vm1, %v2234_v0, %v2238_v54  ;;  %2046 = vst.msk [vmem:[#allocation2 + $0x40] sm:$0xf] %vm2029_vm11, %v2015_v8 }
 0x1f5   : > { %v1754_v26 = vadd.f32 %v3840_v55, %v1720_v29  ;;  %2308 = vrot.lane.b32.xlu2 %v2239_v49, %s3328_s17  ;;  %v1395_v49 = vld [vmem:[#allocation3 + $0xb8] sm:$0xff] }
 0x1f7   : > { %v1784_v22 = vmax.f32 %v1754_v26, 0.0  ;;  %v1349_v24 = vpop.f32.mrf.mxu1 }
 0x1f8   : > { %v1598_v36 = vld [vmem:[#allocation3 + $0x98] sm:$0xff]  ;;  %v1423_v40 = vadd.f32 %v1393_v1, %v1349_v24 }
 0x1f9   : > { %v1986_v5 = vsel %vm1896_vm7, %v1784_v22, 0.0  ;;  %v1628_v14 = vadd.f32 %v1598_v36, %v1551_v10  ;;  %v1599_v19 = vld [vmem:[#allocation3 + $0xa0] sm:$0xff]  ;;  %vm1830_vm7 = vcmp.lt.s32.totalorder %v1806_v18, 16 }
 0x1fa   : > { %v1687_v25 = vld [vmem:[#allocation3 + $0x90] sm:$0xff]  ;;  %v1629_v30 = vadd.f32 %v1599_v19, %v1554_v16  ;;  %1453 = vst.msk [vmem:[#allocation3 + $0xa8] sm:$0xff] %vm856_vm3, %v1423_v40  ;;  %v2016_v55 = vpack.c.bf16 %v1986_v5, %v1986_v5  ;;  %v3279_v10 = vld [vmem:[#allocation2 + $0x3c] sm:$0xe]  ;;  %vm4222_vm8 = vmand %vm1820_vm6, %vm1830_vm7 }
 0x1fb   : > { %v1721_v17 = vmul.f32 %v4166_v52, %v1687_v25  ;;  %1658 = vst.msk [vmem:[#allocation3 + $0x98] sm:$0xff] %vm856_vm3, %v1628_v14  ;;  %v4174_v2 = vld [vmem:[#allocation2 + $0x3c] sm:$0xff]   ;;  %vm1867_vm10 = vmand %vm4222_vm8, %vm1843_vm9 }
 0x1fc   : > { %v3278_v33 = vld [vmem:[#allocation2 + $0x3c] sm:$0xf0]  ;;  %1659 = vst.msk [vmem:[#allocation3 + $0xa0] sm:$0xff] %vm856_vm3, %v1629_v30  ;;  %v1556_v44 = vpop.f32.mrf.mxu2  ;;  %v2243_v4 = vshll.u32 %v4174_v2, 16  ;;  %v2241_v22 = vshrl.u32 %v4174_v2, 16 }
 0x1fd   : > { %v1755_v35 = vadd.f32 %v4180_v41, %v1721_v17  ;;  %2047 = vst.msk [vmem:[#allocation2 + $0x44] sm:$0xf] %vm2029_vm11, %v2016_v55  ;;  %v3280_v32 = vor.u32 %v3279_v10, %v3278_v33 }
 0x1fe   : > { %v2245_v13 = vrot.slane %v2243_v4, 1 }
 0x1ff   : > { %v1785_v23 = vmax.f32 %v1755_v35, 0.0  ;;  %v1352_v37 = vpop.f32.mrf.mxu1  ;;  %v2365_v26 = vrot.slane %v3280_v32, 1  ;;  %v3082_v32 = vld [vmem:[%s4578_s4 + $0x18] sm:$0xff] }
 0x200   : > { %v1424_v39 = vadd.f32 %v1394_v3, %v1352_v37  ;;  %v2246_v25 = vor.u32 %v2245_v13, %v2241_v22 }
 0x201   : > { %v1600_v12 = vld [vmem:[#allocation3 + $0xa8] sm:$0xff]  ;;  %v1987_v60 = vsel %vm1864_vm14, %v1785_v23, 0.0 }
 0x202   : > { %v1688_v56 = vld [vmem:[#allocation3 + $0x98] sm:$0xff]  ;;  %v1630_v59 = vadd.f32 %v1600_v12, %v1556_v44  ;;  %1454 = vst.msk [vmem:[#allocation3 + $0xb0] sm:$0xff] %vm856_vm3, %v1424_v39  ;;  %v2017_v43 = vpack.c.bf16 %v1987_v60, %v1987_v60  ;;  %v3062_v23 = vld [vmem:[%s4578_s4 + $0x20] sm:$0xf] }
 0x203   : > { %v1722_v7 = vmul.f32 %v4166_v52, %v1688_v56  ;;  %v1689_v45 = vld [vmem:[#allocation3 + $0xa0] sm:$0xff]  ;;  %v2660_v58 = vunpack.c.l.b16 %v3062_v23  ;;  %v3271_v39 = vld [vmem:[%s3412_s15 + $0xa0] sm:$0xff]  }
 0x204   : > { %v1723_v31 = vmul.f32 %v4166_v52, %v1689_v45  ;;  %1660 = vst.msk [vmem:[#allocation3 + $0xa8] sm:$0xff] %vm856_vm3, %v1630_v59  ;;  %v2085_v11 = vld [vmem:[#allocation2 + $0x44] sm:$0x1]  ;;  %v1559_v29 = vpop.f32.mrf.mxu2  ;;  %v1396_v45 = vld [vmem:[#allocation3 + $0xc0] sm:$0xff] }
 0x205   : > { %v1756_v47 = vadd.f32 %v4180_v41, %v1722_v7  ;;  %v2165_v38 = vunpack.c.l.b16 %v2085_v11  ;;  %2048 = vst.msk [vmem:[#allocation2 + $0x48] sm:$0xf] %vm2029_vm11, %v2017_v43  ;;  %v2662_v56 = vpack.c.b16 %v2660_v58, %v2660_v58 }
 0x206   : > { %v1757_v57 = vadd.f32 %v4180_v41, %v1723_v31 }
 0x207   : > { %v1786_v63 = vmax.f32 %v1756_v47, 0.0  ;;  %v2301_v0 = vpop.permute.xlu1 %2300  ;;  %v2175_v54 = vpack.c.b16 %v2165_v38, %v2165_v38  ;;  %v1354_v20 = vpop.f32.mrf.mxu1  ;;  %v2667_v18 = vsel %vm1089_vm2, %v2662_v56, 0 }
 0x208   : > { %v1787_v8 = vmax.f32 %v1757_v57, 0.0  ;;  %v2401_v16 = vsel %vm856_vm3, %v3922_v62, %v2301_v0  ;;  %v1425_v1 = vadd.f32 %v1395_v49, %v1354_v20  ;;  %v728_v62 = vpop.permute.xlu0 %727  ;;  %2675 = vmatpush.bf16.msrb.mxu0 %v2667_v18  ;;  %v2303_v38 = vpop.permute.xlu2 %2302 }
 0x209   : > { %v1601_v24 = vld [vmem:[#allocation3 + $0xb0] sm:$0xff]  ;;  %v2421_v36 = vsel %vm917_vm4, %v2401_v16, %v2381_v48  ;;  %v2366_v40 = vrot.slane %v2175_v54, 1  ;;  %v2248_v5 = vshll.u32 %v2175_v54, 16  ;;  %v1988_v30 = vsel %vm4170_vm13, %v1786_v63, 0.0  ;;  %vm1902_vm13 = vmand %vm4222_vm8, %vm1878_vm12 }
 0x20a   : > { %v1989_v14 = vsel %vm4201_vm15, %v1787_v8, 0.0  ;;  %v1631_v19 = vadd.f32 %v1601_v24, %v1559_v29  ;;  %3037 = vmatmul.msk.bf16.vlgmr.msra.gmra.mxu3 %vm1043_vm5, %v2421_v36  ;;  %1455 = vst.msk [vmem:[#allocation3 + $0xb8] sm:$0xff] %vm856_vm3, %v1425_v1  ;;  %v2018_v35 = vpack.c.bf16 %v1988_v30, %v1988_v30  ;;  %v908_v12 = vsel %vm856_vm3, %v3271_v39, %v728_v62  ;;  %v1397_v36 = vld [vmem:[#allocation3 + $0xc8] sm:$0xff] }
 0x20b   : > { %v1690_v55 = vld [vmem:[#allocation3 + $0xa8] sm:$0xff]  ;;  %v2367_v17 = vsel %vm771_vm0, %v2365_v26, %v2366_v40  ;;  %v2250_v33 = vrot.slane %v2248_v5, 1  ;;  %v2019_v44 = vpack.c.bf16 %v1989_v14, %v1989_v14  ;;  %v2403_v58 = vsel %vm856_vm3, %v3967_v9, %v2303_v38 }
 0x20c   : > { %v1724_v37 = vmul.f32 %v4166_v52, %v1690_v55  ;;  %1661 = vst.msk [vmem:[#allocation3 + $0xb0] sm:$0xff] %vm856_vm3, %v1631_v19  ;;  %2390 = vrot.lane.b32.xlu2 %v2367_v17, %s3327_s16  ;;  %v1561_v57 = vpop.f32.mrf.mxu2  ;;  %v3212_v20 = vld [vmem:[#allocation2 + $0x48] sm:$0xe]  ;;  %2676 = vmatpush.bf16.msrb.mxu0 %v3082_v32 }
 0x20d   : > { %v2251_v10 = vsel %vm506_vm1, %v2246_v25, %v2250_v33  ;;  %2049 = vst.msk [vmem:[#allocation2 + $0x4c] sm:$0xf] %vm2029_vm11, %v2018_v35 }
 0x20e   : > { %v1758_v60 = vadd.f32 %v4180_v41, %v1724_v37  ;;  %2310 = vrot.lane.b32.xlu1 %v2251_v10, %s3328_s17  ;;  %2050 = vst.msk [vmem:[#allocation2 + $0x50] sm:$0xf] %vm2029_vm11, %v2019_v44 }
 0x20f   : > { %v849_v59 = vpop.permute.xlu1 %848  ;;  %v1357_v7 = vpop.f32.mrf.mxu1 }
 0x210   : > { %v1788_v4 = vmax.f32 %v1758_v60, 0.0  ;;  %v4240_v43 = vsel %vm917_vm4, %v908_v12, %v849_v59  ;;  %v1426_v11 = vadd.f32 %v1396_v45, %v1357_v7  ;;  %v732_v62 = vpop.permute.xlu2 %731 }
 0x211   : > { %v1209_v31 = vunpack.c.l.b16 %v4240_v43  ;;  %3028 = vmatmul.msk.bf16.gmra.mxu2 %vm1043_vm5, %v4240_v43  ;;  %v1602_v13 = vld [vmem:[#allocation3 + $0xb8] sm:$0xff]  ;;  %v913_v59 = vsel %vm856_vm3, %v3989_v42, %v732_v62 }
 0x212   : > { %v1990_v47 = vsel %vm1867_vm10, %v1788_v4, 0.0  ;;  %v1632_v48 = vadd.f32 %v1602_v13, %v1561_v57  ;;  %1456 = vst.msk [vmem:[#allocation3 + $0xc0] sm:$0xff] %vm856_vm3, %v1426_v11  ;;  %v467_v4 = vpack.c.b16 %v3874_v27, %v3874_v27  ;;  %v1210_v13 = vunpack.c.h.b16 %v4240_v43 }
 0x213   : > { %v1691_v63 = vld [vmem:[#allocation3 + $0xb0] sm:$0xff]  ;;  %v1229_v53 = vpack.c.b16 %v1209_v31, %v1015_v28  ;;  %v2020_v0 = vpack.c.bf16 %v1990_v47, %v1990_v47 }
 0x214   : > { %v1725_v54 = vmul.f32 %v4166_v52, %v1691_v63  ;;  %v3211_v8 = vld [vmem:[#allocation2 + $0x48] sm:$0xf0]  ;;  %1662 = vst.msk [vmem:[#allocation3 + $0xb8] sm:$0xff] %vm856_vm3, %v1632_v48 }
 0x215   : > { %v4253_v29 = vld [vmem:[#allocation2 + $0x48] sm:$0xff]   ;;  %3007 = vmatmul.msk.bf16.gmra.mxu1 %vm1043_vm5, %v1229_v53  ;;  %v2086_v16 = vld [vmem:[#allocation2 + $0x50] sm:$0x1]  ;;  %v3213_v26 = vor.u32 %v3212_v20, %v3211_v8  ;;  %2051 = vst.msk [vmem:[#allocation2 + $0x54] sm:$0xf] %vm2029_vm11, %v2020_v0  ;;  %v469_v0 = vpack.c.b16 %v3969_v51, %v3969_v51 }
 0x216   : > { %v2255_v49 = vshll.u32 %v4253_v29, 16  ;;  %v1759_v15 = vadd.f32 %v4180_v41, %v1725_v54  ;;  %v2166_v28 = vunpack.c.l.b16 %v2086_v16  ;;  %v2253_v19 = vshrl.u32 %v4253_v29, 16 }
 0x217   : > { %v730_v22 = vpop.permute.xlu1 %729  ;;  %v1359_v1 = vpop.f32.mrf.mxu1  ;;  %v2368_v30 = vrot.slane %v3213_v26, 1 }
 0x218   : > { %v1789_v24 = vmax.f32 %v1759_v15, 0.0  ;;  %v2176_v40 = vpack.c.b16 %v2166_v28, %v2166_v28  ;;  %v2257_v5 = vrot.slane %v2255_v49, 1  ;;  %v1427_v14 = vadd.f32 %v1397_v36, %v1359_v1 }
 0x219   : > { %v911_v47 = vsel %vm856_vm3, %v467_v4, %v730_v22 }
 0x21a   : > { %v1991_v25 = vsel %vm4222_vm8, %v1789_v24, 0.0  ;;  %v2369_v55 = vrot.slane %v2176_v40, 1  ;;  %v2260_v17 = vshll.u32 %v2176_v40, 16  ;;  %1457 = vst.msk [vmem:[#allocation3 + $0xc8] sm:$0xff] %vm856_vm3, %v1427_v14  ;;  %v2258_v23 = vor.u32 %v2257_v5, %v2253_v19  ;;  %v3047_v40 = vld [vmem:[%s4578_s4 + $0x14] sm:$0xf] }
 0x21b   : > { %v2021_v33 = vpack.c.bf16 %v1991_v25, %v1991_v25  ;;  %v1692_v35 = vld [vmem:[#allocation3 + $0xb8] sm:$0xff]  ;;  %v2545_v5 = vunpack.c.l.b16 %v3047_v40 }
 0x21c   : > { %v2370_v44 = vsel %vm771_vm0, %v2368_v30, %v2369_v55  ;;  %v2262_v37 = vrot.slane %v2260_v17, 1  ;;  %v1726_v10 = vmul.f32 %v4166_v52, %v1692_v35  ;;  %v3282_v53 = vld [vmem:[#allocation2 + $0x54] sm:$0xe] }
 0x21d   : > { %2392 = vrot.lane.b32.xlu1 %v2370_v44, %s3327_s16  ;;  %v2383_v39 = vpop.permute.xlu0 %2382  ;;  %2052 = vst.msk [vmem:[#allocation2 + $0x58] sm:$0xf] %vm2029_vm11, %v2021_v33  ;;  %v2547_v17 = vpack.c.b16 %v2545_v5, %v2545_v5 }
 0x21e   : > { %v2263_v12 = vsel %vm506_vm1, %v2258_v23, %v2262_v37  ;;  %v4272_v60 = vsel %vm917_vm4, %v2403_v58, %v2383_v39  ;;  %v1760_v56 = vadd.f32 %v4180_v41, %v1726_v10 }
 0x21f   : > { %2312 = vrot.lane.b32.xlu0 %v2263_v12, %s3328_s17  ;;  %3038 = vmatmul.msk.bf16.gmra.mxu3 %vm1043_vm5, %v4272_v60  ;;  %v853_v7 = vpop.permute.xlu1 %852  ;;  %v2305_v31 = vpop.permute.xlu2 %2304  ;;  %v2552_v23 = vsel %vm1089_vm2, %v2547_v17, 0 }
 0x220   : > { %v1790_v9 = vmax.f32 %v1760_v56, 0.0  ;;  %v963_v45 = vsel %vm917_vm4, %v913_v59, %v853_v7  ;;  %v2405_v62 = vsel %vm856_vm3, %v4044_v50, %v2305_v31  ;;  %2560 = vmatpush.bf16.msrb.mxu3 %v2552_v23 }
 0x221   : > { %v1464_v38 = vunpack.c.l.b16 %v963_v45  ;;  %v1465_v44 = vunpack.c.h.b16 %v963_v45 }
 0x222   : > { %v1992_v18 = vsel %vm1902_vm13, %v1790_v9, 0.0 }
 0x223   : > { %v2022_v42 = vpack.c.bf16 %v1992_v18, %v1992_v18 }
 0x224   : > { %v4287_v11 = vld [vmem:[#allocation2 + $0x54] sm:$0xff]  }
 0x225   : > { %v3281_v32 = vld [vmem:[#allocation2 + $0x54] sm:$0xf0]  ;;  %v851_v57 = vpop.permute.xlu0 %850  ;;  %2053 = vst.msk [vmem:[#allocation2 + $0x5c] sm:$0xf] %vm2029_vm11, %v2022_v42  ;;  %v2267_v8 = vshll.u32 %v4287_v11, 16  ;;  %v2265_v51 = vshrl.u32 %v4287_v11, 16 }
 0x226   : > { %v961_v3 = vsel %vm917_vm4, %v911_v47, %v851_v57  ;;  %v3283_v43 = vor.u32 %v3282_v53, %v3281_v32  ;;  %v1398_v47 = vld [vmem:[#allocation3 + $0xd0] sm:$0xff]  ;;  %v1399_v53 = vld [vmem:[#allocation3 + $0xd8] sm:$0xff] }
 0x227   : > { %v1211_v27 = vunpack.c.l.b16 %v961_v3  ;;  %v734_v54 = vpop.permute.xlu1 %733  ;;  %v855_v49 = vpop.permute.xlu2 %854  ;;  %v2269_v26 = vrot.slane %v2267_v8, 1  ;;  %v1604_v8 = vld [vmem:[#allocation3 + $0xc8] sm:$0xff] }
 0x228   : > { %v916_v20 = vsel %vm856_vm3, %v469_v0, %v734_v54  ;;  %v2371_v24 = vrot.slane %v3283_v43, 1 }
 0x229   : > { %v1230_v63 = vpack.c.b16 %v1211_v27, %v1210_v13  ;;  %v1472_v48 = vpack.c.b16 %v1464_v38, %v1211_v27  ;;  %v965_v22 = vsel %vm917_vm4, %v916_v20, %v855_v49  ;;  %v2270_v19 = vor.u32 %v2269_v26, %v2265_v51  ;;  %v1603_v13 = vld [vmem:[#allocation3 + $0xc0] sm:$0xff] }
 0x22a   : > { %v1466_v30 = vunpack.c.l.b16 %v965_v22 }
 0x22b   : > { %3008 = vmatmul.msk.bf16.gmra.mxu1 %vm1043_vm5, %v1230_v63  ;;  %3029 = vmatmul.msk.bf16.gmra.mxu2 %vm1043_vm5, %v1472_v48 }
 0x22c   : > { %v2087_v16 = vld [vmem:[#allocation2 + $0x5c] sm:$0x1]  ;;  %v1473_v50 = vpack.c.b16 %v1466_v30, %v1465_v44 }
 0x22d   : > { %v2167_v15 = vunpack.c.l.b16 %v2087_v16 }
 0x22f   : > { %v2177_v28 = vpack.c.b16 %v2167_v15, %v2167_v15 }
 0x231   : > { %v2372_v1 = vrot.slane %v2177_v28, 1  ;;  %v2272_v36 = vshll.u32 %v2177_v28, 16 }
 0x233   : > { %v2373_v14 = vsel %vm771_vm0, %v2371_v24, %v2372_v1  ;;  %v2274_v25 = vrot.slane %v2272_v36, 1 }
 0x234   : > { %2394 = vrot.lane.b32.xlu0 %v2373_v14, %s3327_s16 }
 0x235   : > { %v2385_v55 = vpop.permute.xlu0 %2384  ;;  %v2275_v33 = vsel %vm506_vm1, %v2270_v19, %v2274_v25  ;;  %v1400_v19 = vld [vmem:[#allocation3 + $0xe0] sm:$0xff] }
 0x236   : > { %v4310_v35 = vsel %vm917_vm4, %v2405_v62, %v2385_v55  ;;  %2314 = vrot.lane.b32.xlu2 %v2275_v33, %s3328_s17 }
 0x237   : > { %3039 = vmatmul.msk.bf16.gmra.mxu3 %vm1043_vm5, %v4310_v35  ;;  %3067 = vmatmul.msk.bf16.vlgmr.msrb.gmra.mxu0 %vm1043_vm5, %v4310_v35 }
 0x23b   : > { %3030 = vmatmul.msk.bf16.gmra.mxu2 %vm1043_vm5, %v1473_v50 }
 0x24d   : > { %v2387_v58 = vpop.permute.xlu1 %2386 }
 0x24f   : > { %v2307_v37 = vpop.permute.xlu0 %2306  ;;  %v2309_v12 = vpop.permute.xlu2 %2308 }
 0x250   : > { %v2407_v10 = vsel %vm856_vm3, %v4078_v46, %v2307_v37  ;;  %v2409_v56 = vsel %vm856_vm3, %v4136_v61, %v2309_v12  ;;  %v3081_v61 = vld [vmem:[%s4578_s4 + $0xc] sm:$0xff] }
 0x251   : > { %v4322_v39 = vsel %vm917_vm4, %v2407_v10, %v2387_v58  ;;  %2561 = vmatpush.bf16.msrb.mxu3 %v3081_v61  ;;  %v1401_v58 = vld [vmem:[#allocation3 + $0xe8] sm:$0xff] }
 0x252   : > { %3040 = vmatmul.msk.bf16.gmra.mxu3 %vm1043_vm5, %v4322_v39  ;;  %3068 = vmatmul.msk.bf16.gmra.mxu0 %vm1043_vm5, %v4322_v39 }
 0x265   : > { %v2389_v59 = vpop.permute.xlu0 %2388 }
 0x266   : > { %v4331_v9 = vsel %vm917_vm4, %v2409_v56, %v2389_v59  ;;  %v2391_v4 = vpop.permute.xlu2 %2390 }
 0x267   : > { %3041 = vmatmul.msk.bf16.gmra.mxu3 %vm1043_vm5, %v4331_v9  ;;  %3069 = vmatmul.msk.bf16.gmra.mxu0 %vm1043_vm5, %v4331_v9 }
 0x280   : > { %v2311_v46 = vpop.permute.xlu1 %2310 }
 0x281   : > { %v2411_v7 = vsel %vm856_vm3, %v4174_v2, %v2311_v46 }
 0x282   : > { %v4340_v45 = vsel %vm917_vm4, %v2411_v7, %v2391_v4  ;;  %v1808_v7 = vadd.s32 9, %v3822_v6 }
 0x283   : > { %3042 = vmatmul.msk.bf16.gmra.mxu3 %vm1043_vm5, %v4340_v45  ;;  %3070 = vmatmul.msk.bf16.gmra.mxu0 %vm1043_vm5, %v4340_v45 }
 0x284   : > { %vm1822_vm8 = vcmp.ge.s32.totalorder %v1808_v7, 0  ;;  %vm1832_vm10 = vcmp.lt.s32.totalorder %v1808_v7, 16 }
 0x285   : > { %vm4407_vm13 = vmand %vm1822_vm8, %vm1832_vm10 }
 0x28d   : > { %v2480_v18 = vpop.f32.mrf.mxu3 }
 0x28e   : > { %2520 = vst.msk [vmem:[#allocation4] sm:$0xff] %vm856_vm3, %v2480_v18 }
 0x28f   : > { %v2393_v42 = vpop.permute.xlu1 %2392 }
 0x290   : > { %v2315_v22 = vpop.permute.xlu2 %2314 }
 0x291   : > { %v2313_v31 = vpop.permute.xlu0 %2312  ;;  %v2415_v36 = vsel %vm856_vm3, %v4287_v11, %v2315_v22 }
 0x292   : > { %v2413_v2 = vsel %vm856_vm3, %v4253_v29, %v2313_v31  ;;  %v1362_v32 = vpop.f32.mrf.mxu1  ;;  %v1807_v29 = vadd.s32 8, %v3822_v6 }
 0x293   : > { %v1428_v38 = vadd.f32 %v1398_v47, %v1362_v32  ;;  %v4353_v57 = vsel %vm917_vm4, %v2413_v2, %v2393_v42 }
 0x294   : > { %3043 = vmatmul.msk.bf16.gmra.mxu3 %vm1043_vm5, %v4353_v57  ;;  %3071 = vmatmul.msk.bf16.gmra.mxu0 %vm1043_vm5, %v4353_v57  ;;  %v1564_v3 = vpop.f32.mrf.mxu2  ;;  %vm1821_vm2 = vcmp.ge.s32.totalorder %v1807_v29, 0  ;;  %vm1831_vm14 = vcmp.lt.s32.totalorder %v1807_v29, 16 }
 0x295   : > { %1458 = vst.msk [vmem:[#allocation3 + $0xd0] sm:$0xff] %vm856_vm3, %v1428_v38  ;;  %v1633_v27 = vadd.f32 %v1603_v13, %v1564_v3  ;;  %v2482_v63 = vpop.f32.mrf.mxu3  ;;  %vm4366_vm15 = vmand %vm1821_vm2, %vm1831_vm14 }
 0x296   : > { %2521 = vst.msk [vmem:[#allocation4 + $0x8] sm:$0xff] %vm856_vm3, %v2482_v63  ;;  %vm1870_vm6 = vmand %vm4366_vm15, %vm1843_vm9 }
 0x297   : > { %1663 = vst.msk [vmem:[#allocation3 + $0xc0] sm:$0xff] %vm856_vm3, %v1633_v27  ;;  %vm1905_vm7 = vmand %vm4366_vm15, %vm1878_vm12 }
 0x298   : > { %vm1873_vm2 = vmand %vm4407_vm13, %vm1843_vm9 }
 0x299   : > { %vm1908_vm9 = vmand %vm4407_vm13, %vm1878_vm12 }
 0x29a   : > { %v1364_v48 = vpop.f32.mrf.mxu1 }
 0x29b   : > { %v1429_v0 = vadd.f32 %v1399_v53, %v1364_v48 }
 0x29c   : > { %v1566_v54 = vpop.f32.mrf.mxu2  ;;  %v1605_v44 = vld [vmem:[#allocation3 + $0xd0] sm:$0xff] }
 0x29d   : > { %1459 = vst.msk [vmem:[#allocation3 + $0xd8] sm:$0xff] %vm856_vm3, %v1429_v0  ;;  %v1634_v16 = vadd.f32 %v1604_v8, %v1566_v54 }
 0x29e   : > { %v1693_v20 = vld [vmem:[#allocation3 + $0xc0] sm:$0xff] }
 0x29f   : > { %v1727_v49 = vmul.f32 %v4166_v52, %v1693_v20  ;;  %1664 = vst.msk [vmem:[#allocation3 + $0xc8] sm:$0xff] %vm856_vm3, %v1634_v16 }
 0x2a1   : > { %v1761_v43 = vadd.f32 %v4180_v41, %v1727_v49 }
 0x2a2   : > { %v2485_v28 = vpop.f32.mrf.mxu3 }
 0x2a3   : > { %v1791_v26 = vmax.f32 %v1761_v43, 0.0  ;;  %2522 = vst.msk [vmem:[#allocation4 + $0x10] sm:$0xff] %vm856_vm3, %v2485_v28 }
 0x2a4   : > { %v1606_v56 = vld [vmem:[#allocation3 + $0xd8] sm:$0xff] }
 0x2a5   : > { %v1993_v24 = vsel %vm1870_vm6, %v1791_v26, 0.0 }
 0x2a6   : > { %v1694_v1 = vld [vmem:[#allocation3 + $0xc8] sm:$0xff]  ;;  %v2023_v51 = vpack.c.bf16 %v1993_v24, %v1993_v24  ;;  %v2395_v5 = vpop.permute.xlu0 %2394 }
 0x2a7   : > { %v1728_v40 = vmul.f32 %v4166_v52, %v1694_v1  ;;  %v4380_v25 = vsel %vm917_vm4, %v2415_v36, %v2395_v5 }
 0x2a8   : > { %v1367_v14 = vpop.f32.mrf.mxu1  ;;  %2054 = vst.msk [vmem:[#allocation2 + $0x60] sm:$0xf] %vm2029_vm11, %v2023_v51  ;;  %3044 = vmatmul.msk.bf16.gmra.mxu3 %vm1043_vm5, %v4380_v25  ;;  %3072 = vmatmul.msk.bf16.gmra.mxu0 %vm1043_vm5, %v4380_v25 }
 0x2a9   : > { %v1762_v62 = vadd.f32 %v4180_v41, %v1728_v40  ;;  %v1430_v30 = vadd.f32 %v1400_v19, %v1367_v14 }
 0x2aa   : > { %v2487_v11 = vpop.f32.mrf.mxu3 }
 0x2ab   : > { %v1792_v55 = vmax.f32 %v1762_v62, 0.0  ;;  %1460 = vst.msk [vmem:[#allocation3 + $0xe0] sm:$0xff] %vm856_vm3, %v1430_v30 }
 0x2ac   : > { %2523 = vst.msk [vmem:[#allocation4 + $0x18] sm:$0xff] %vm856_vm3, %v2487_v11 }
 0x2ad   : > { %v1994_v17 = vsel %vm4366_vm15, %v1792_v55, 0.0 }
 0x2ae   : > { %v1569_v33 = vpop.f32.mrf.mxu2  ;;  %v2024_v23 = vpack.c.bf16 %v1994_v17, %v1994_v17 }
 0x2af   : > { %v1635_v50 = vadd.f32 %v1605_v44, %v1569_v33  ;;  %v3215_v43 = vld [vmem:[#allocation2 + $0x60] sm:$0xe] }
 0x2b0   : > { %v1369_v37 = vpop.f32.mrf.mxu1  ;;  %2055 = vst.msk [vmem:[#allocation2 + $0x64] sm:$0xf] %vm2029_vm11, %v2024_v23 }
 0x2b1   : > { %1665 = vst.msk [vmem:[#allocation3 + $0xd0] sm:$0xff] %vm856_vm3, %v1635_v50  ;;  %v1431_v10 = vadd.f32 %v1401_v58, %v1369_v37 }
 0x2b2   : > { %v1607_v2 = vld [vmem:[#allocation3 + $0xe0] sm:$0xff] }
 0x2b3   : > { %1461 = vst.msk [vmem:[#allocation3 + $0xe8] sm:$0xff] %vm856_vm3, %v1431_v10 }
 0x2b6   : > { %v1571_v12 = vpop.f32.mrf.mxu2 }
 0x2b7   : > { %v1636_v59 = vadd.f32 %v1606_v56, %v1571_v12  ;;  %v4419_v29 = vld [vmem:[#allocation2 + $0x60] sm:$0xff]  }
 0x2b8   : > { %v1695_v46 = vld [vmem:[#allocation3 + $0xd0] sm:$0xff]  ;;  %3052 = vmatmul.msk.bf16.vlgmr.msrb.gmra.mxu3 %vm1043_vm5, %v4272_v60  ;;  %v3214_v8 = vld [vmem:[#allocation2 + $0x60] sm:$0xf0]  ;;  %v2279_v20 = vshll.u32 %v4419_v29, 16  ;;  %v2277_v5 = vshrl.u32 %v4419_v29, 16 }
 0x2b9   : > { %v1729_v4 = vmul.f32 %v4166_v52, %v1695_v46  ;;  %1666 = vst.msk [vmem:[#allocation3 + $0xd8] sm:$0xff] %vm856_vm3, %v1636_v59  ;;  %v3216_v26 = vor.u32 %v3215_v43, %v3214_v8  ;;  %v2604_v8 = vld [vmem:[#allocation4 + $0x8] sm:$0xff] }
 0x2ba   : > { %v2490_v61 = vpop.f32.mrf.mxu3  ;;  %v1608_v53 = vld [vmem:[#allocation3 + $0xe8] sm:$0xff]  ;;  %v2281_v1 = vrot.slane %v2279_v20, 1 }
 0x2bb   : > { %v1763_v18 = vadd.f32 %v4180_v41, %v1729_v4  ;;  %2524 = vst.msk [vmem:[#allocation4 + $0x20] sm:$0xff] %vm856_vm3, %v2490_v61  ;;  %v2374_v36 = vrot.slane %v3216_v26, 1 }
 0x2bc   : > { %v2282_v30 = vor.u32 %v2281_v1, %v2277_v5  ;;  %v4482_v1 = vld [vmem:[%s4579_s5] ss:$0 sm:$0xff] }
 0x2bd   : > { %v1793_v31 = vmax.f32 %v1763_v18, 0.0 }
 0x2be   : > { %v1574_v42 = vpop.f32.mrf.mxu2 }
 0x2bf   : > { %v1995_v32 = vsel %vm1905_vm7, %v1793_v31, 0.0  ;;  %v1637_v47 = vadd.f32 %v1607_v2, %v1574_v42 }
 0x2c0   : > { %v1696_v60 = vld [vmem:[#allocation3 + $0xd8] sm:$0xff]  ;;  %v2025_v38 = vpack.c.bf16 %v1995_v32, %v1995_v32 }
 0x2c1   : > { %v1730_v6 = vmul.f32 %v4166_v52, %v1696_v60  ;;  %1667 = vst.msk [vmem:[#allocation3 + $0xe0] sm:$0xff] %vm856_vm3, %v1637_v47 }
 0x2c2   : > { %v2492_v13 = vpop.f32.mrf.mxu3  ;;  %2056 = vst.msk [vmem:[#allocation2 + $0x68] sm:$0xf] %vm2029_vm11, %v2025_v38 }
 0x2c3   : > { %v1764_v27 = vadd.f32 %v4180_v41, %v1730_v6  ;;  %2525 = vst.msk [vmem:[#allocation4 + $0x28] sm:$0xff] %vm856_vm3, %v2492_v13 }
 0x2c5   : > { %v1794_v63 = vmax.f32 %v1764_v27, 0.0 }
 0x2c6   : > { %v1576_v48 = vpop.f32.mrf.mxu2 }
 0x2c7   : > { %v1996_v0 = vsel %vm1873_vm2, %v1794_v63, 0.0  ;;  %v1638_v54 = vadd.f32 %v1608_v53, %v1576_v48  ;;  %v2678_v63 = vpop.f32.mrf.mxu0  ;;  %v2603_v48 = vld [vmem:[#allocation4] sm:$0xff] }
 0x2c8   : > { %v1697_v16 = vld [vmem:[#allocation3 + $0xe0] sm:$0xff]  ;;  %v2026_v49 = vpack.c.bf16 %v1996_v0, %v1996_v0  ;;  %3053 = vmatmul.msk.bf16.gmra.mxu3 %vm1043_vm5, %v4310_v35 }
 0x2c9   : > { %v1731_v15 = vmul.f32 %v4166_v52, %v1697_v16  ;;  %1668 = vst.msk [vmem:[#allocation3 + $0xe8] sm:$0xff] %vm856_vm3, %v1638_v54  ;;  %v2088_v34 = vld [vmem:[#allocation2 + $0x68] sm:$0x1] }
 0x2ca   : > { %v2168_v28 = vunpack.c.l.b16 %v2088_v34  ;;  %2057 = vst.msk [vmem:[#allocation2 + $0x6c] sm:$0xf] %vm2029_vm11, %v2026_v49 }
 0x2cb   : > { %v1765_v22 = vadd.f32 %v4180_v41, %v1731_v15 }
 0x2cc   : > { %v2178_v24 = vpack.c.b16 %v2168_v28, %v2168_v28 }
 0x2cd   : > { %v1795_v51 = vmax.f32 %v1765_v22, 0.0  ;;  %v2605_v22 = vld [vmem:[#allocation4 + $0x10] sm:$0xff] }
 0x2ce   : > { %v2375_v40 = vrot.slane %v2178_v24, 1  ;;  %v2284_v14 = vshll.u32 %v2178_v24, 16 }
 0x2cf   : > { %v1997_v19 = vsel %vm4407_vm13, %v1795_v51, 0.0  ;;  %v2680_v0 = vpop.f32.mrf.mxu0 }
 0x2d0   : > { %v1698_v35 = vld [vmem:[#allocation3 + $0xe8] sm:$0xff]  ;;  %v2376_v62 = vsel %vm771_vm0, %v2374_v36, %v2375_v40  ;;  %v2286_v11 = vrot.slane %v2284_v14, 1  ;;  %v2027_v55 = vpack.c.bf16 %v1997_v19, %v1997_v19 }
 0x2d1   : > { %v1732_v17 = vmul.f32 %v4166_v52, %v1698_v35  ;;  %2396 = vrot.lane.b32.xlu2 %v2376_v62, %s3327_s16  ;;  %v3285_v12 = vld [vmem:[#allocation2 + $0x6c] sm:$0xe]  ;;  %v4488_v36 = vld [vmem:[%s4580_s6] ss:$0 sm:$0xff] }
 0x2d2   : > { %v2287_v33 = vsel %vm506_vm1, %v2282_v30, %v2286_v11  ;;  %2058 = vst.msk [vmem:[#allocation2 + $0x70] sm:$0xf] %vm2029_vm11, %v2027_v55  ;;  %v2606_v62 = vld [vmem:[#allocation4 + $0x18] sm:$0xff] }
 0x2d3   : > { %v1766_v44 = vadd.f32 %v4180_v41, %v1732_v17  ;;  %2316 = vrot.lane.b32.xlu1 %v2287_v33, %s3328_s17 }
 0x2d5   : > { %v1796_v23 = vmax.f32 %v1766_v44, 0.0  ;;  %v2495_v50 = vpop.f32.mrf.mxu3 }
 0x2d6   : > { %2526 = vst.msk [vmem:[#allocation4 + $0x30] sm:$0xff] %vm856_vm3, %v2495_v50 }
 0x2d7   : > { %v1998_v52 = vsel %vm1908_vm9, %v1796_v23, 0.0  ;;  %v2683_v28 = vpop.f32.mrf.mxu0 }
 0x2d8   : > { %v2028_v37 = vpack.c.bf16 %v1998_v52, %v1998_v52  ;;  %3054 = vmatmul.msk.bf16.gmra.mxu3 %vm1043_vm5, %v4322_v39 }
 0x2d9   : > { %v4445_v58 = vld [vmem:[#allocation2 + $0x6c] sm:$0xff]  }
 0x2da   : > { %v3284_v10 = vld [vmem:[#allocation2 + $0x6c] sm:$0xf0]  ;;  %2059 = vst.msk [vmem:[#allocation2 + $0x74] sm:$0xf] %vm2029_vm11, %v2028_v37  ;;  %v2291_v21 = vshll.u32 %v4445_v58, 16  ;;  %v2289_v39 = vshrl.u32 %v4445_v58, 16 }
 0x2db   : > { %v3286_v46 = vor.u32 %v3285_v12, %v3284_v10  ;;  %v2607_v37 = vld [vmem:[#allocation4 + $0x20] sm:$0xff] }
 0x2dc   : > { %v2293_v7 = vrot.slane %v2291_v21, 1 }
 0x2dd   : > { %v2497_v41 = vpop.f32.mrf.mxu3  ;;  %v2377_v61 = vrot.slane %v3286_v46, 1 }
 0x2de   : > { %2527 = vst.msk [vmem:[#allocation4 + $0x38] sm:$0xff] %vm856_vm3, %v2497_v41  ;;  %v2294_v2 = vor.u32 %v2293_v7, %v2289_v39 }
 0x2df   : > { %v2685_v19 = vpop.f32.mrf.mxu0 }
 0x2e1   : > { %v2089_v56 = vld [vmem:[#allocation2 + $0x74] sm:$0x1] }
 0x2e2   : > { %v2169_v59 = vunpack.c.l.b16 %v2089_v56 }
 0x2e4   : > { %v2179_v4 = vpack.c.b16 %v2169_v59, %v2169_v59 }
 0x2e6   : > { %v2378_v18 = vrot.slane %v2179_v4, 1  ;;  %v2296_v31 = vshll.u32 %v2179_v4, 16 }
 0x2e7   : > { %v2688_v50 = vpop.f32.mrf.mxu0 }
 0x2e8   : > { %v2379_v42 = vsel %vm771_vm0, %v2377_v61, %v2378_v18  ;;  %v2298_v32 = vrot.slane %v2296_v31, 1  ;;  %3055 = vmatmul.msk.bf16.gmra.mxu3 %vm1043_vm5, %v4331_v9  ;;  %v2608_v31 = vld [vmem:[#allocation4 + $0x28] sm:$0xff] }
 0x2e9   : > { %2398 = vrot.lane.b32.xlu1 %v2379_v42, %s3327_s16 }
 0x2ea   : > { %v2500_v47 = vpop.f32.mrf.mxu3  ;;  %v2299_v60 = vsel %vm506_vm1, %v2294_v2, %v2298_v32 }
 0x2eb   : > { %2528 = vst.msk [vmem:[#allocation4 + $0x40] sm:$0xff] %vm856_vm3, %v2500_v47  ;;  %2318 = vrot.lane.b32.xlu0 %v2299_v60, %s3328_s17 }
 0x2f2   : > { %v2502_v38 = vpop.f32.mrf.mxu3 }
 0x2f3   : > { %2529 = vst.msk [vmem:[#allocation4 + $0x48] sm:$0xff] %vm856_vm3, %v2502_v38 }
 0x2f8   : > { %3056 = vmatmul.msk.bf16.gmra.mxu3 %vm1043_vm5, %v4340_v45 }
 0x306   : > { %v2505_v6 = vpop.f32.mrf.mxu3 }
 0x307   : > { %2530 = vst.msk [vmem:[#allocation4 + $0x50] sm:$0xff] %vm856_vm3, %v2505_v6 }
 0x308   : > { %3057 = vmatmul.msk.bf16.gmra.mxu3 %vm1043_vm5, %v4353_v57 }
 0x30e   : > { %v2507_v9 = vpop.f32.mrf.mxu3 }
 0x30f   : > { %2531 = vst.msk [vmem:[#allocation4 + $0x58] sm:$0xff] %vm856_vm3, %v2507_v9 }
 0x317   : > { %v2510_v3 = vpop.f32.mrf.mxu3 }
 0x318   : > { %2532 = vst.msk [vmem:[#allocation4 + $0x60] sm:$0xff] %vm856_vm3, %v2510_v3  ;;  %3058 = vmatmul.msk.bf16.gmra.mxu3 %vm1043_vm5, %v4380_v25  ;;  %v2609_v3 = vld [vmem:[#allocation4 + $0x30] sm:$0xff] }
 0x31f   : > { %v2512_v13 = vpop.f32.mrf.mxu3 }
 0x320   : > { %2533 = vst.msk [vmem:[#allocation4 + $0x68] sm:$0xff] %vm856_vm3, %v2512_v13 }
 0x32b   : > { %v2515_v27 = vpop.f32.mrf.mxu3  ;;  %v2397_v20 = vpop.permute.xlu2 %2396 }
 0x32c   : > { %2534 = vst.msk [vmem:[#allocation4 + $0x70] sm:$0xff] %vm856_vm3, %v2515_v27 }
 0x333   : > { %v2517_v45 = vpop.f32.mrf.mxu3 }
 0x334   : > { %2535 = vst.msk [vmem:[#allocation4 + $0x78] sm:$0xff] %vm856_vm3, %v2517_v45 }
 0x33b   : > { %v2563_v57 = vpop.f32.mrf.mxu3 }
 0x33c   : > { %v2619_v53 = vadd.f32 %v2603_v48, %v2563_v57 }
 0x33e   : > { %2635 = vst.msk [vmem:[#allocation4] sm:$0xff] %vm856_vm3, %v2619_v53 }
 0x343   : > { %v2565_v54 = vpop.f32.mrf.mxu3 }
 0x344   : > { %v2620_v16 = vadd.f32 %v2604_v8, %v2565_v54  ;;  %v2610_v8 = vld [vmem:[#allocation4 + $0x38] sm:$0xff] }
 0x345   : > { %v2317_v25 = vpop.permute.xlu1 %2316  ;;  %v2718_v49 = vld [vmem:[#allocation4] sm:$0xff] }
 0x346   : > { %v2417_v15 = vsel %vm856_vm3, %v4419_v29, %v2317_v25  ;;  %v2734_v34 = vadd.f32 %v2718_v49, %v2678_v63  ;;  %2636 = vst.msk [vmem:[#allocation4 + $0x8] sm:$0xff] %vm856_vm3, %v2620_v16 }
 0x347   : > { %v2437_v43 = vsel %vm917_vm4, %v2417_v15, %v2397_v20 }
 0x348   : > { %3059 = vmatmul.msk.bf16.gmra.mxu3 %vm1043_vm5, %v2437_v43  ;;  %3073 = vmatmul.msk.bf16.gmra.mxu0 %vm1043_vm5, %v2437_v43  ;;  %2750 = vst.msk [vmem:[#allocation4] sm:$0xff] %vm856_vm3, %v2734_v34 }
 0x34b   : > { %v2568_v26 = vpop.f32.mrf.mxu3 }
 0x34c   : > { %v2621_v24 = vadd.f32 %v2605_v22, %v2568_v26  ;;  %v2611_v22 = vld [vmem:[#allocation4 + $0x40] sm:$0xff] }
 0x34d   : > { %v2719_v29 = vld [vmem:[#allocation4 + $0x8] sm:$0xff] }
 0x34e   : > { %v2735_v51 = vadd.f32 %v2719_v29, %v2680_v0  ;;  %2637 = vst.msk [vmem:[#allocation4 + $0x10] sm:$0xff] %vm856_vm3, %v2621_v24 }
 0x34f   : > { %v2766_v40 = vld [vmem:[#allocation4] sm:$0xff] }
 0x350   : > { %2751 = vst.msk [vmem:[#allocation4 + $0x8] sm:$0xff] %vm856_vm3, %v2735_v51  ;;  %v2786_v5 = vmul.f32 %v4482_v1, %v2766_v40 }
 0x352   : > { %v2806_v14 = vadd.f32 %v4488_v36, %v2786_v5 }
 0x353   : > { %v2570_v35 = vpop.f32.mrf.mxu3 }
 0x354   : > { %v2622_v30 = vadd.f32 %v2606_v62, %v2570_v35  ;;  %v2822_v11 = vmax.f32 %v2806_v14, 0.0 }
 0x355   : > { %v2720_v55 = vld [vmem:[#allocation4 + $0x10] sm:$0xff] }
 0x356   : > { %v2736_v17 = vadd.f32 %v2720_v55, %v2683_v28  ;;  %2638 = vst.msk [vmem:[#allocation4 + $0x18] sm:$0xff] %vm856_vm3, %v2622_v30  ;;  %2838 = vxpose.xlu2.b32.start [1/16] (narrow) %v2822_v11, 8  ;;  %v2612_v30 = vld [vmem:[#allocation4 + $0x48] sm:$0xff] }
 0x357   : > { %v2767_v33 = vld [vmem:[#allocation4 + $0x8] sm:$0xff] }
 0x358   : > { %2752 = vst.msk [vmem:[#allocation4 + $0x10] sm:$0xff] %vm856_vm3, %v2736_v17  ;;  %v2787_v44 = vmul.f32 %v4482_v1, %v2767_v33 }
 0x35a   : > { %v2807_v23 = vadd.f32 %v4488_v36, %v2787_v44 }
 0x35b   : > { %v2573_v52 = vpop.f32.mrf.mxu3  ;;  %v2399_v56 = vpop.permute.xlu1 %2398 }
 0x35c   : > { %v2623_v10 = vadd.f32 %v2607_v37, %v2573_v52  ;;  %v2823_v12 = vmax.f32 %v2807_v23, 0.0 }
 0x35d   : > { %v2319_v41 = vpop.permute.xlu0 %2318  ;;  %v2721_v21 = vld [vmem:[#allocation4 + $0x18] sm:$0xff] }
 0x35e   : > { %v2419_v59 = vsel %vm856_vm3, %v4445_v58, %v2319_v41  ;;  %v2737_v46 = vadd.f32 %v2721_v21, %v2685_v19  ;;  %2639 = vst.msk [vmem:[#allocation4 + $0x20] sm:$0xff] %vm856_vm3, %v2623_v10  ;;  %2839 = vxpose.xlu2.b32.cont [2/16] (narrow) %v2823_v12, 8  ;;  %v2690_v58 = vpop.f32.mrf.mxu0  ;;  %v2613_v10 = vld [vmem:[#allocation4 + $0x50] sm:$0xff] }
 0x35f   : > { %v2439_v4 = vsel %vm917_vm4, %v2419_v59, %v2399_v56  ;;  %v2768_v7 = vld [vmem:[#allocation4 + $0x10] sm:$0xff] }
 0x360   : > { %3074 = vmatmul.msk.bf16.gmra.mxu0 %vm1043_vm5, %v2439_v4  ;;  %2753 = vst.msk [vmem:[#allocation4 + $0x18] sm:$0xff] %vm856_vm3, %v2737_v46  ;;  %v2788_v61 = vmul.f32 %v4482_v1, %v2768_v7 }
 0x362   : > { %v2808_v18 = vadd.f32 %v4488_v36, %v2788_v61 }
 0x363   : > { %v2575_v39 = vpop.f32.mrf.mxu3 }
 0x364   : > { %v2624_v42 = vadd.f32 %v2608_v31, %v2575_v39  ;;  %v2824_v2 = vmax.f32 %v2808_v18, 0.0  ;;  %v2614_v18 = vld [vmem:[#allocation4 + $0x58] sm:$0xff] }
 0x365   : > { %v2722_v32 = vld [vmem:[#allocation4 + $0x20] sm:$0xff] }
 0x366   : > { %v2738_v47 = vadd.f32 %v2722_v32, %v2688_v50  ;;  %2640 = vst.msk [vmem:[#allocation4 + $0x28] sm:$0xff] %vm856_vm3, %v2624_v42  ;;  %2840 = vxpose.xlu2.b32.cont [3/16] (narrow) %v2824_v2, 8  ;;  %v2693_v45 = vpop.f32.mrf.mxu0 }
 0x367   : > { %v2769_v60 = vld [vmem:[#allocation4 + $0x18] sm:$0xff] }
 0x368   : > { %2754 = vst.msk [vmem:[#allocation4 + $0x20] sm:$0xff] %vm856_vm3, %v2738_v47  ;;  %v2789_v38 = vmul.f32 %v4482_v1, %v2769_v60 }
 0x36a   : > { %v2809_v6 = vadd.f32 %v4488_v36, %v2789_v38  ;;  %v2615_v38 = vld [vmem:[#allocation4 + $0x60] sm:$0xff] }
 0x36b   : > { %v2578_v9 = vpop.f32.mrf.mxu3 }
 0x36c   : > { %v2625_v13 = vadd.f32 %v2609_v3, %v2578_v9  ;;  %v2825_v27 = vmax.f32 %v2809_v6, 0.0 }
 0x36d   : > { %v2723_v63 = vld [vmem:[#allocation4 + $0x28] sm:$0xff] }
 0x36e   : > { %v2739_v57 = vadd.f32 %v2723_v63, %v2690_v58  ;;  %2641 = vst.msk [vmem:[#allocation4 + $0x30] sm:$0xff] %vm856_vm3, %v2625_v13  ;;  %2841 = vxpose.xlu2.b32.cont [4/16] (narrow) %v2825_v27, 8  ;;  %v2695_v15 = vpop.f32.mrf.mxu0 }
 0x36f   : > { %v2770_v48 = vld [vmem:[#allocation4 + $0x20] sm:$0xff] }
 0x370   : > { %2755 = vst.msk [vmem:[#allocation4 + $0x28] sm:$0xff] %vm856_vm3, %v2739_v57  ;;  %v2790_v53 = vmul.f32 %v4482_v1, %v2770_v48 }
 0x372   : > { %v2810_v0 = vadd.f32 %v4488_v36, %v2790_v53  ;;  %v2616_v53 = vld [vmem:[#allocation4 + $0x68] sm:$0xff] }
 0x373   : > { %v2580_v54 = vpop.f32.mrf.mxu3 }
 0x374   : > { %v2626_v16 = vadd.f32 %v2610_v8, %v2580_v54  ;;  %v2826_v25 = vmax.f32 %v2810_v0, 0.0 }
 0x375   : > { %v2724_v20 = vld [vmem:[#allocation4 + $0x30] sm:$0xff] }
 0x376   : > { %v2740_v49 = vadd.f32 %v2724_v20, %v2693_v45  ;;  %2642 = vst.msk [vmem:[#allocation4 + $0x38] sm:$0xff] %vm856_vm3, %v2626_v16  ;;  %2842 = vxpose.xlu2.b32.cont [5/16] (narrow) %v2826_v25, 8  ;;  %v2698_v19 = vpop.f32.mrf.mxu0 }
 0x377   : > { %v2771_v34 = vld [vmem:[#allocation4 + $0x28] sm:$0xff] }
 0x378   : > { %2756 = vst.msk [vmem:[#allocation4 + $0x30] sm:$0xff] %vm856_vm3, %v2740_v49  ;;  %v2791_v43 = vmul.f32 %v4482_v1, %v2771_v34 }
 0x37a   : > { %v2811_v28 = vadd.f32 %v4488_v36, %v2791_v43 }
 0x37b   : > { %v2583_v26 = vpop.f32.mrf.mxu3 }
 0x37c   : > { %v2627_v24 = vadd.f32 %v2611_v22, %v2583_v26  ;;  %v2827_v29 = vmax.f32 %v2811_v28, 0.0  ;;  %v2617_v28 = vld [vmem:[#allocation4 + $0x70] sm:$0xff] }
 0x37d   : > { %v2725_v51 = vld [vmem:[#allocation4 + $0x38] sm:$0xff] }
 0x37e   : > { %v2741_v40 = vadd.f32 %v2725_v51, %v2695_v15  ;;  %2643 = vst.msk [vmem:[#allocation4 + $0x40] sm:$0xff] %vm856_vm3, %v2627_v24  ;;  %2843 = vxpose.xlu2.b32.cont [6/16] (narrow) %v2827_v29, 8  ;;  %v2700_v52 = vpop.f32.mrf.mxu0 }
 0x37f   : > { %v2772_v5 = vld [vmem:[#allocation4 + $0x30] sm:$0xff] }
 0x380   : > { %2757 = vst.msk [vmem:[#allocation4 + $0x38] sm:$0xff] %vm856_vm3, %v2741_v40  ;;  %v2792_v14 = vmul.f32 %v4482_v1, %v2772_v5 }
 0x382   : > { %v2812_v35 = vadd.f32 %v4488_v36, %v2792_v14 }
 0x383   : > { %v2585_v62 = vpop.f32.mrf.mxu3 }
 0x384   : > { %v2628_v11 = vadd.f32 %v2612_v30, %v2585_v62  ;;  %v2828_v55 = vmax.f32 %v2812_v35, 0.0 }
 0x385   : > { %v2726_v17 = vld [vmem:[#allocation4 + $0x40] sm:$0xff] }
 0x386   : > { %v2742_v33 = vadd.f32 %v2726_v17, %v2698_v19  ;;  %2644 = vst.msk [vmem:[#allocation4 + $0x48] sm:$0xff] %vm856_vm3, %v2628_v11  ;;  %2844 = vxpose.xlu2.b32.cont [7/16] (narrow) %v2828_v55, 8  ;;  %v2703_v7 = vpop.f32.mrf.mxu0  ;;  %v2618_v19 = vld [vmem:[#allocation4 + $0x78] sm:$0xff] }
 0x387   : > { %v2773_v44 = vld [vmem:[#allocation4 + $0x38] sm:$0xff] }
 0x388   : > { %2758 = vst.msk [vmem:[#allocation4 + $0x40] sm:$0xff] %vm856_vm3, %v2742_v33  ;;  %v2793_v23 = vmul.f32 %v4482_v1, %v2773_v44 }
 0x38a   : > { %v2813_v50 = vadd.f32 %v4488_v36, %v2793_v23 }
 0x38b   : > { %v2588_v37 = vpop.f32.mrf.mxu3 }
 0x38c   : > { %v2629_v41 = vadd.f32 %v2613_v10, %v2588_v37  ;;  %v2829_v12 = vmax.f32 %v2813_v50, 0.0 }
 0x38d   : > { %v2727_v21 = vld [vmem:[#allocation4 + $0x48] sm:$0xff] }
 0x38e   : > { %v2743_v56 = vadd.f32 %v2727_v21, %v2700_v52  ;;  %2645 = vst.msk [vmem:[#allocation4 + $0x50] sm:$0xff] %vm856_vm3, %v2629_v41  ;;  %2845 = vxpose.xlu2.b32.cont [8/16] (narrow) %v2829_v12, 8  ;;  %v2705_v3 = vpop.f32.mrf.mxu0 }
 0x38f   : > { %v2774_v59 = vld [vmem:[#allocation4 + $0x40] sm:$0xff] }
 0x390   : > { %2759 = vst.msk [vmem:[#allocation4 + $0x48] sm:$0xff] %vm856_vm3, %v2743_v56  ;;  %v2794_v46 = vmul.f32 %v4482_v1, %v2774_v59 }
 0x392   : > { %v2814_v4 = vadd.f32 %v4488_v36, %v2794_v46 }
 0x393   : > { %v2590_v61 = vpop.f32.mrf.mxu3 }
 0x394   : > { %v2630_v39 = vadd.f32 %v2614_v18, %v2590_v61  ;;  %v2830_v31 = vmax.f32 %v2814_v4, 0.0 }
 0x395   : > { %v2728_v42 = vld [vmem:[#allocation4 + $0x50] sm:$0xff] }
 0x396   : > { %v2744_v2 = vadd.f32 %v2728_v42, %v2703_v7  ;;  %2646 = vst.msk [vmem:[#allocation4 + $0x58] sm:$0xff] %vm856_vm3, %v2630_v39  ;;  %2846 = vxpose.xlu2.b32.cont [9/16] (narrow) %v2830_v31, 8 }
 0x397   : > { %v2775_v58 = vld [vmem:[#allocation4 + $0x48] sm:$0xff] }
 0x398   : > { %2760 = vst.msk [vmem:[#allocation4 + $0x50] sm:$0xff] %vm856_vm3, %v2744_v2  ;;  %v2795_v32 = vmul.f32 %v4482_v1, %v2775_v58 }
 0x39a   : > { %v2815_v47 = vadd.f32 %v4488_v36, %v2795_v32 }
 0x39b   : > { %v2593_v60 = vpop.f32.mrf.mxu3 }
 0x39c   : > { %v2631_v6 = vadd.f32 %v2615_v38, %v2593_v60  ;;  %v2831_v9 = vmax.f32 %v2815_v47, 0.0 }
 0x39d   : > { %v2729_v13 = vld [vmem:[#allocation4 + $0x58] sm:$0xff] }
 0x39e   : > { %v2745_v27 = vadd.f32 %v2729_v13, %v2705_v3  ;;  %2647 = vst.msk [vmem:[#allocation4 + $0x60] sm:$0xff] %vm856_vm3, %v2631_v6  ;;  %2847 = vxpose.xlu2.b32.cont [10/16] (narrow) %v2831_v9, 8 }
 0x39f   : > { %v2776_v45 = vld [vmem:[#allocation4 + $0x50] sm:$0xff] }
 0x3a0   : > { %2761 = vst.msk [vmem:[#allocation4 + $0x58] sm:$0xff] %vm856_vm3, %v2745_v27  ;;  %v2796_v63 = vmul.f32 %v4482_v1, %v2776_v45 }
 0x3a2   : > { %v2816_v57 = vadd.f32 %v4488_v36, %v2796_v63 }
 0x3a3   : > { %v2595_v48 = vpop.f32.mrf.mxu3 }
 0x3a4   : > { %v2632_v0 = vadd.f32 %v2616_v53, %v2595_v48  ;;  %v2832_v54 = vmax.f32 %v2816_v57, 0.0 }
 0x3a5   : > { %v2730_v15 = vld [vmem:[#allocation4 + $0x60] sm:$0xff] }
 0x3a6   : > { %2648 = vst.msk [vmem:[#allocation4 + $0x68] sm:$0xff] %vm856_vm3, %v2632_v0  ;;  %2848 = vxpose.xlu2.b32.cont [11/16] (narrow) %v2832_v54, 8 }
 0x3a7   : > { %v2777_v8 = vld [vmem:[#allocation4 + $0x58] sm:$0xff] }
 0x3a8   : > { %v2797_v16 = vmul.f32 %v4482_v1, %v2777_v8 }
 0x3aa   : > { %v2817_v25 = vadd.f32 %v4488_v36, %v2797_v16 }
 0x3ac   : > { %v2833_v20 = vmax.f32 %v2817_v25, 0.0 }
 0x3ad   : > { %v2731_v24 = vld [vmem:[#allocation4 + $0x68] sm:$0xff] }
 0x3ae   : > { %2849 = vxpose.xlu2.b32.cont [12/16] (narrow) %v2833_v20, 8 }
 0x3c5   : > { %v2708_v49 = vpop.f32.mrf.mxu0 }
 0x3c6   : > { %v2746_v34 = vadd.f32 %v2730_v15, %v2708_v49 }
 0x3c8   : > { %2762 = vst.msk [vmem:[#allocation4 + $0x60] sm:$0xff] %vm856_vm3, %v2746_v34 }
 0x3cb   : > { %v2598_v43 = vpop.f32.mrf.mxu3 }
 0x3cc   : > { %v2633_v26 = vadd.f32 %v2617_v28, %v2598_v43 }
 0x3cd   : > { %v2710_v22 = vpop.f32.mrf.mxu0 }
 0x3ce   : > { %2649 = vst.msk [vmem:[#allocation4 + $0x70] sm:$0xff] %vm856_vm3, %v2633_v26  ;;  %v2747_v29 = vadd.f32 %v2731_v24, %v2710_v22 }
 0x3cf   : > { %v2778_v51 = vld [vmem:[#allocation4 + $0x60] sm:$0xff] }
 0x3d0   : > { %2763 = vst.msk [vmem:[#allocation4 + $0x68] sm:$0xff] %vm856_vm3, %v2747_v29  ;;  %v2798_v40 = vmul.f32 %v4482_v1, %v2778_v51 }
 0x3d2   : > { %v2818_v5 = vadd.f32 %v4488_v36, %v2798_v40 }
 0x3d3   : > { %v2600_v14 = vpop.f32.mrf.mxu3 }
 0x3d4   : > { %v2634_v35 = vadd.f32 %v2618_v19, %v2600_v14  ;;  %v2834_v62 = vmax.f32 %v2818_v5, 0.0 }
 0x3d5   : > { %v2732_v44 = vld [vmem:[#allocation4 + $0x70] sm:$0xff] }
 0x3d6   : > { %2650 = vst.msk [vmem:[#allocation4 + $0x78] sm:$0xff] %vm856_vm3, %v2634_v35  ;;  %2850 = vxpose.xlu2.b32.cont [13/16] (narrow) %v2834_v62, 8 }
 0x3d7   : > { %v2779_v30 = vld [vmem:[#allocation4 + $0x68] sm:$0xff] }
 0x3d8   : > { %v2799_v11 = vmul.f32 %v4482_v1, %v2779_v30 }
 0x3da   : > { %v2819_v55 = vadd.f32 %v4488_v36, %v2799_v11 }
 0x3dc   : > { %v2835_v17 = vmax.f32 %v2819_v55, 0.0 }
 0x3dd   : > { %v2713_v33 = vpop.f32.mrf.mxu0  ;;  %v2733_v52 = vld [vmem:[#allocation4 + $0x78] sm:$0xff] }
 0x3de   : > { %v2748_v23 = vadd.f32 %v2732_v44, %v2713_v33  ;;  %2851 = vxpose.xlu2.b32.cont [14/16] (narrow) %v2835_v17, 8 }
 0x3e0   : > { %2764 = vst.msk [vmem:[#allocation4 + $0x70] sm:$0xff] %vm856_vm3, %v2748_v23 }
 0x3e5   : > { %v2715_v50 = vpop.f32.mrf.mxu0 }
 0x3e6   : > { %v2749_v37 = vadd.f32 %v2733_v52, %v2715_v50 }
 0x3e7   : > { %v2780_v10 = vld [vmem:[#allocation4 + $0x70] sm:$0xff] }
 0x3e8   : > { %2765 = vst.msk [vmem:[#allocation4 + $0x78] sm:$0xff] %vm856_vm3, %v2749_v37  ;;  %v2800_v41 = vmul.f32 %v4482_v1, %v2780_v10 }
 0x3ea   : > { %v2820_v12 = vadd.f32 %v4488_v36, %v2800_v41 }
 0x3ec   : > { %v2836_v21 = vmax.f32 %v2820_v12, 0.0 }
 0x3ee   : > { %2852 = vxpose.xlu2.b32.cont [15/16] (narrow) %v2836_v21, 8 }
 0x3ef   : > { %v2781_v56 = vld [vmem:[#allocation4 + $0x78] sm:$0xff] }
 0x3f0   : > { %v2801_v59 = vmul.f32 %v4482_v1, %v2781_v56 }
 0x3f2   : > { %v2821_v46 = vadd.f32 %v4488_v36, %v2801_v59 }
 0x3f4   : > { %v2837_v4 = vmax.f32 %v2821_v46, 0.0 }
 0x3f6   : > { %2853 = vxpose.xlu2.b32.end [16/16] (narrow) %v2837_v4, 8 }
 0x417   : > { %v2854_v7 = vpop.trf.xlu2 }
 0x418   : > { %2870 = vst [vmem:[%s312_s20] sm:$0xff] %v2854_v7 }
 0x419 PF: > { %s17_s28 = sadd.s32 1, %s3325_s28   ;;  %s4604_s24 = smov %s3317_s26 }
 0x41a   : > { %p14_p7 = scmp.ge.s32.totalorder %s17_s28, 6   ;;  %s4605_s25 = smov %s3321_s27 }
 0x41b   : > { %s4606_s26 = smov %s4609_s29  ;;  %s4607_s27 = smov %s4613_s30 }
 0x41c   :  { %16 = sbr.rel (!%p14_p7) target bundleno = 3 (0x3), region = 82 }

</bundles_post_ra>
